<compile_context>
chip_gen: v7x
topology: tpu7x:2x2x1
jax: 0.10.0
libtpu: 0.0.40
codegen_flags: <defaults>
</compile_context>

<pallas_src>
import functools

import jax
import jax.numpy as jnp
from jax.experimental import pallas as pl
from jax.experimental.pallas import tpu as pltpu

NUM_BLOCKS = 4
LN_EPS = 1e-5
LANE = 128
SUBLANE_BF16 = 16


def _round_up(x, m):
    return (x + m - 1) // m * m


def _cdiv(a, b):
    return (a + b - 1) // b


def _pad_to(a, shape):
    pads = [(0, t - s) for s, t in zip(a.shape, shape)]
    if all(p == (0, 0) for p in pads):
        return a
    return jnp.pad(a, pads)


def _layernorm(x, g, b):
    mu = jnp.mean(x, axis=-1, keepdims=True)
    d = x - mu
    var = jnp.mean(d * d, axis=-1, keepdims=True)
    return d * jax.lax.rsqrt(var + LN_EPS) * g + b


# ----------------------------------------------------------------------------
# Kernel
# ----------------------------------------------------------------------------
def rgbd_vit_kernel(rgb_ref, depth_ref, wer_ref, wed_ref, eb_ref,
                    wa_ref, ba_ref, n1g_ref, n1b_ref,
                    w1_ref, b1_ref, w2_ref, b2_ref, n2g_ref, n2b_ref,
                    fcw_ref, fcb_ref, out_ref, acc_ref, *, e_true):
    ki = pl.program_id(1)

    @pl.when(ki == 0)
    def _init():
        # Start the accumulator at the (broadcast) embedding bias.
        acc_ref[...] = jnp.broadcast_to(eb_ref[...], acc_ref.shape)

    # Partial embedding for this K tile: two bf16 partial matmuls (f32 accumulate)
    # replace the concatenated-input matmul.
    acc_ref[...] += (
        jnp.dot(rgb_ref[...], wer_ref[...], preferred_element_type=jnp.float32)
        + jnp.dot(depth_ref[...], wed_ref[...], preferred_element_type=jnp.float32))

    @pl.when(ki == pl.num_programs(1) - 1)
    def _finish():
        h = acc_ref[...]                       # (tb, e_pad) f32, padded lanes == 0
        e_pad = h.shape[-1]

        if e_pad != e_true:
            lane = jax.lax.broadcasted_iota(jnp.int32, (1, e_pad), 1)
            mask = (lane < e_true).astype(jnp.float32)
        else:
            mask = None
        inv_n = jnp.float32(1.0 / e_true)

        def layernorm(x, g, b):
            # Padded lanes of x are exactly 0, so the sums only see the true lanes;
            # divide by the true E and mask the centered values before the variance.
            mu = jnp.sum(x, axis=-1, keepdims=True) * inv_n
            d = x - mu
            if mask is not None:
                d = d * mask
            var = jnp.sum(d * d, axis=-1, keepdims=True) * inv_n
            return d * jax.lax.rsqrt(var + LN_EPS) * g + b

        # seq_len == 1  =>  attention == out_proj(v_proj(h)), pre-folded to (wa, ba).
        for i in range(NUM_BLOCKS):
            attn = jnp.dot(h.astype(jnp.bfloat16), wa_ref[i],
                           preferred_element_type=jnp.float32) + ba_ref[i]
            h = layernorm(attn + h, n1g_ref[i], n1b_ref[i])
            ff = jnp.dot(h.astype(jnp.bfloat16), w1_ref[i],
                         preferred_element_type=jnp.float32) + b1_ref[i]
            ff = jnp.maximum(ff, 0.0)
            ff = jnp.dot(ff.astype(jnp.bfloat16), w2_ref[i],
                         preferred_element_type=jnp.float32) + b2_ref[i]
            h = layernorm(ff + h, n2g_ref[i], n2b_ref[i])

        # Mean over a length-1 sequence is identity; lane-dense padded classifier.
        out_ref[...] = (jnp.dot(h.astype(jnp.bfloat16), fcw_ref[...],
                                preferred_element_type=jnp.float32) + fcb_ref[...])


# ----------------------------------------------------------------------------
# Parameters (PyTorch-style) and kernel-side preparation
# ----------------------------------------------------------------------------
def init_params(key, channels, image_size, embed_size, num_classes,
                depth_channels=1):
    """Deterministic, PyTorch-default-style uniform init (synthetic weights).

    Weights stored as (in_features, out_features) so y = x @ W + b.
    """
    d_in = (channels + depth_channels) * image_size * image_size
    hid = 4 * embed_size
    E = embed_size
    keys = iter(jax.random.split(key, 64))

    def lin(fan_in, shape):
        bound = 1.0 / (fan_in ** 0.5)
        return jax.random.uniform(next(keys), shape, jnp.float32, -bound, bound)

    emb_w = lin(d_in, (d_in, E))
    emb_b = lin(d_in, (1, E))

    wv = lin(E, (NUM_BLOCKS, E, E))
    bv = lin(E, (NUM_BLOCKS, 1, E))
    wo = lin(E, (NUM_BLOCKS, E, E))
    bo = lin(E, (NUM_BLOCKS, 1, E))
    n1g = jnp.ones((NUM_BLOCKS, 1, E), jnp.float32)
    n1b = jnp.zeros((NUM_BLOCKS, 1, E), jnp.float32)
    w1 = lin(E, (NUM_BLOCKS, E, hid))
    b1 = lin(E, (NUM_BLOCKS, 1, hid))
    w2 = lin(hid, (NUM_BLOCKS, hid, E))
    b2 = lin(hid, (NUM_BLOCKS, 1, E))
    n2g = jnp.ones((NUM_BLOCKS, 1, E), jnp.float32)
    n2b = jnp.zeros((NUM_BLOCKS, 1, E), jnp.float32)

    fc_w = lin(E, (E, num_classes))
    fc_b = lin(E, (1, num_classes))

    return (emb_w, emb_b, wv, bv, wo, bo, n1g, n1b,
            w1, b1, w2, b2, n2g, n2b, fc_w, fc_b)


def fold_params(params, d_rgb, target_tk=1024):
    """Exact algebraic rewrite + padding of the module params into kernel layout.

    Returns (kernel_params, (e_true, nk)).
    """
    (emb_w, emb_b, wv, bv, wo, bo, n1g, n1b,
     w1, b1, w2, b2, n2g, n2b, fc_w, fc_b) = params
    E = emb_w.shape[1]
    H = w1.shape[2]
    nc = fc_w.shape[1]
    E_pad = _round_up(E, LANE)
    H_pad = _round_up(H, LANE)
    nc_pad = _round_up(nc, LANE)

    # Fold seq_len==1 attention: out_proj(v_proj(x)) == x @ (Wv@Wo) + (bv@Wo + bo).
    wa = jnp.einsum('bij,bjk->bik', wv, wo)
    ba = jnp.einsum('bij,bjk->bik', bv, wo) + bo

    # Split embedding weight so the kernel never needs the concatenated input.
    wer, wed = emb_w[:d_rgb], emb_w[d_rgb:]
    k_rgb, k_depth = wer.shape[0], wed.shape[0]

    # K tiling: target ~1024-wide tiles, zero-pad both halves so every tile is a
    # multiple of 128 (never fall back to an un-tiled, fully resident weight).
    nk = max(1, _cdiv(k_rgb, target_tk))
    tkr = _round_up(_cdiv(k_rgb, nk), LANE)
    tkd = _round_up(_cdiv(k_depth, nk), LANE)
    wer = _pad_to(wer, (tkr * nk, E_pad))
    wed = _pad_to(wed, (tkd * nk, E_pad))

    # Zero-pad the embed / hidden / class dims to lane-dense widths.  LN gammas and
    # betas are zero on the padded lanes so padded activations stay exactly 0.
    eb = _pad_to(emb_b, (1, E_pad))
    wa = _pad_to(wa, (NUM_BLOCKS, E_pad, E_pad))
    ba = _pad_to(ba, (NUM_BLOCKS, 1, E_pad))
    n1g = _pad_to(n1g, (NUM_BLOCKS, 1, E_pad))
    n1b = _pad_to(n1b, (NUM_BLOCKS, 1, E_pad))
    w1 = _pad_to(w1, (NUM_BLOCKS, E_pad, H_pad))
    b1 = _pad_to(b1, (NUM_BLOCKS, 1, H_pad))
    w2 = _pad_to(w2, (NUM_BLOCKS, H_pad, E_pad))
    b2 = _pad_to(b2, (NUM_BLOCKS, 1, E_pad))
    n2g = _pad_to(n2g, (NUM_BLOCKS, 1, E_pad))
    n2b = _pad_to(n2b, (NUM_BLOCKS, 1, E_pad))
    fcw = _pad_to(fc_w, (E_pad, nc_pad))
    fcb = _pad_to(fc_b, (1, nc_pad))

    # Big matmul weights in bf16 (halves HBM->VMEM bytes and enables single-pass
    # bf16 MXU matmuls); biases / LN params stay f32; accumulation stays f32.
    bf16 = lambda a: a.astype(jnp.bfloat16)
    kparams = (bf16(wer), bf16(wed), eb, bf16(wa), ba, n1g, n1b,
               bf16(w1), b1, bf16(w2), b2, n2g, n2b, bf16(fcw), fcb)
    return kparams, (E, nk)


# ----------------------------------------------------------------------------
# VMEM sizing helpers
# ----------------------------------------------------------------------------
def _estimate_vmem_bytes(tb, tkr, tkd, e_pad, h_pad, nc_pad, single_buffer):
    nblk = NUM_BLOCKS
    act = 2 * tb * (tkr + tkd) * 2                       # double-buffered bf16 acts
    embw = 2 * (tkr + tkd) * e_pad * 2                   # double-buffered emb tiles
    wmul = 1 if single_buffer else 2
    const = (e_pad * 4                                   # emb bias
             + nblk * e_pad * e_pad * 2                  # folded attn W (bf16)
             + nblk * e_pad * 4 * 6                      # ba, n1g, n1b, b2, n2g, n2b
             + nblk * e_pad * h_pad * 2 * 2              # w1 + w2 (bf16)
             + nblk * h_pad * 4                          # b1
             + e_pad * nc_pad * 2 + nc_pad * 4)          # fc W / b
    out = 2 * tb * nc_pad * 4
    scratch = tb * e_pad * 4
    return act + embw + wmul * const + out + scratch


def _vmem_limit_bytes(footprint):
    try:
        phys = pltpu.get_tpu_info().vmem_capacity_bytes
    except Exception:
        phys = 64 * 1024 * 1024                          # conservative (v7x-sized)
    want = max(32 << 20, int(footprint * 1.25) + (4 << 20))
    return int(min(want, int(phys * 0.9)))


# ----------------------------------------------------------------------------
# Wrapper
# ----------------------------------------------------------------------------
@functools.partial(jax.jit, static_argnums=(3, 4, 5, 6))
def _forward_impl(rgb, depth, kparams, num_classes, e_true, nk, single_buffer):
    (wer, wed, eb, wa, ba, n1g, n1b,
     w1, b1, w2, b2, n2g, n2b, fcw, fcb) = kparams

    B = rgb.shape[0]
    k_rgb_pad, e_pad = wer.shape
    k_depth_pad = wed.shape[0]
    h_pad = w1.shape[2]
    nc_pad = fcw.shape[1]
    tkr = k_rgb_pad // nk
    tkd = k_depth_pad // nk

    # Flatten NCHW row-major exactly like torch .view(B, -1); no concat.  bf16
    # activations -> single-pass bf16 MXU matmuls (f32 accumulation in-kernel).
    rgb_flat = rgb.reshape(B, -1).astype(jnp.bfloat16)
    depth_flat = depth.reshape(B, -1).astype(jnp.bfloat16)

    # Batch tiling: 16-row granularity (bf16 sublane pack).  For B > 16 split into
    # >= 2 tiles (v7x megacore) but cap at 256 rows so the embedding weight is not
    # refetched too many times on single-core v5e/v6e.
    if B <= SUBLANE_BF16:
        tb = _round_up(B, SUBLANE_BF16)
    else:
        tb = min(256, _round_up(_cdiv(B, 2), SUBLANE_BF16))
    b_pad = _round_up(B, tb)
    nb = b_pad // tb

    rgb_flat = _pad_to(rgb_flat, (b_pad, k_rgb_pad))
    depth_flat = _pad_to(depth_flat, (b_pad, k_depth_pad))

    const2 = lambda bi, ki: (0, 0)
    const3 = lambda bi, ki: (0, 0, 0)

    def const_spec(shape, idx):
        # Grid-invariant weights: single-buffer them to halve their VMEM footprint.
        if single_buffer:
            return pl.BlockSpec(shape, idx, pipeline_mode=pl.Buffered(1))
        return pl.BlockSpec(shape, idx)

    in_specs = [
        pl.BlockSpec((tb, tkr), lambda bi, ki: (bi, ki)),    # rgb activations
        pl.BlockSpec((tb, tkd), lambda bi, ki: (bi, ki)),    # depth activations
        pl.BlockSpec((tkr, e_pad), lambda bi, ki: (ki, 0)),  # emb W rgb half
        pl.BlockSpec((tkd, e_pad), lambda bi, ki: (ki, 0)),  # emb W depth half
        const_spec((1, e_pad), const2),                      # emb bias
        const_spec((NUM_BLOCKS, e_pad, e_pad), const3),      # folded attn W
        const_spec((NUM_BLOCKS, 1, e_pad), const3),          # folded attn b
        const_spec((NUM_BLOCKS, 1, e_pad), const3),          # ln1 gamma
        const_spec((NUM_BLOCKS, 1, e_pad), const3),          # ln1 beta
        const_spec((NUM_BLOCKS, e_pad, h_pad), const3),      # ffn w1
        const_spec((NUM_BLOCKS, 1, h_pad), const3),          # ffn b1
        const_spec((NUM_BLOCKS, h_pad, e_pad), const3),      # ffn w2
        const_spec((NUM_BLOCKS, 1, e_pad), const3),          # ffn b2
        const_spec((NUM_BLOCKS, 1, e_pad), const3),          # ln2 gamma
        const_spec((NUM_BLOCKS, 1, e_pad), const3),          # ln2 beta
        const_spec((e_pad, nc_pad), const2),                 # fc W (padded)
        const_spec((1, nc_pad), const2),                     # fc b (padded)
    ]

    vmem_limit = _vmem_limit_bytes(
        _estimate_vmem_bytes(tb, tkr, tkd, e_pad, h_pad, nc_pad, single_buffer))

    kernel = functools.partial(rgbd_vit_kernel, e_true=e_true)

    out = pl.pallas_call(
        kernel,
        out_shape=jax.ShapeDtypeStruct((b_pad, nc_pad), jnp.float32),
        grid_spec=pltpu.PrefetchScalarGridSpec(
            num_scalar_prefetch=0,
            grid=(nb, nk),
            in_specs=in_specs,
            out_specs=pl.BlockSpec((tb, nc_pad), lambda bi, ki: (bi, 0)),
            scratch_shapes=[pltpu.VMEM((tb, e_pad), jnp.float32)],
        ),
        compiler_params=pltpu.CompilerParams(
            dimension_semantics=("parallel", "arbitrary"),
            vmem_limit_bytes=vmem_limit,
        ),
    )(rgb_flat, depth_flat, wer, wed, eb, wa, ba, n1g, n1b,
      w1, b1, w2, b2, n2g, n2b, fcw, fcb)

    return out[:B, :num_classes]


def rgbd_vit_forward(rgb, depth, kparams, num_classes, e_true, nk):
    # Prefer single-buffered grid-invariant weights; fall back to default
    # double-buffering if this jax build does not accept pl.Buffered(1).
    try:
        out = _forward_impl(rgb, depth, kparams, num_classes, e_true, nk, True)
        jax.block_until_ready(out)
        return out
    except Exception:
        out = _forward_impl(rgb, depth, kparams, num_classes, e_true, nk, False)
        jax.block_until_ready(out)
        return out


# ----------------------------------------------------------------------------
# References
# ----------------------------------------------------------------------------
def rgbd_vit_reference(rgb, depth, params):
    """Pure-JAX f32 reference of the (unfolded) module."""
    (emb_w, emb_b, wv, bv, wo, bo, n1g, n1b,
     w1, b1, w2, b2, n2g, n2b, fc_w, fc_b) = params
    B = rgb.shape[0]
    x = jnp.concatenate([rgb.reshape(B, -1), depth.reshape(B, -1)], axis=1)
    h = x @ emb_w + emb_b
    for i in range(NUM_BLOCKS):
        v = h @ wv[i] + bv[i]
        attn = v @ wo[i] + bo[i]
        h = _layernorm(attn + h, n1g[i], n1b[i])
        ff = jnp.maximum(h @ w1[i] + b1[i], 0.0)
        ff = ff @ w2[i] + b2[i]
        h = _layernorm(ff + h, n2g[i], n2b[i])
    return h @ fc_w + fc_b


def rgbd_vit_matched_reference(rgb, depth, kparams, e_true):
    """Pure-JAX emulation of the kernel math (folded/padded params, bf16 matmul
    operands, f32 accumulation, masked LayerNorm) for a tight numerical check."""
    (wer, wed, eb, wa, ba, n1g, n1b,
     w1, b1, w2, b2, n2g, n2b, fcw, fcb) = kparams
    B = rgb.shape[0]
    x_r = _pad_to(rgb.reshape(B, -1).astype(jnp.bfloat16), (B, wer.shape[0]))
    x_d = _pad_to(depth.reshape(B, -1).astype(jnp.bfloat16), (B, wed.shape[0]))
    h = (jnp.dot(x_r, wer, preferred_element_type=jnp.float32)
         + jnp.dot(x_d, wed, preferred_element_type=jnp.float32) + eb)
    e_pad = h.shape[1]
    mask = (jnp.arange(e_pad) < e_true).astype(jnp.float32)[None, :]
    inv_n = 1.0 / e_true

    def ln(x, g, b):
        mu = jnp.sum(x, axis=-1, keepdims=True) * inv_n
        d = (x - mu) * mask
        var = jnp.sum(d * d, axis=-1, keepdims=True) * inv_n
        return d * jax.lax.rsqrt(var + LN_EPS) * g + b

    for i in range(NUM_BLOCKS):
        attn = jnp.dot(h.astype(jnp.bfloat16), wa[i],
                       preferred_element_type=jnp.float32) + ba[i]
        h = ln(attn + h, n1g[i], n1b[i])
        ff = jnp.maximum(jnp.dot(h.astype(jnp.bfloat16), w1[i],
                                 preferred_element_type=jnp.float32) + b1[i], 0.0)
        ff = jnp.dot(ff.astype(jnp.bfloat16), w2[i],
                     preferred_element_type=jnp.float32) + b2[i]
        h = ln(ff + h, n2g[i], n2b[i])
    return jnp.dot(h.astype(jnp.bfloat16), fcw,
                   preferred_element_type=jnp.float32) + fcb


if __name__ == "__main__":
    # Small, module-consistent shapes.
    B = 2
    channels = 3           # RGB
    depth_channels = 1
    image_size = 16
    embed_size = 32
    num_heads = 4          # mathematically irrelevant for seq_len == 1
    num_classes = 10

    key = jax.random.PRNGKey(0)
    k_rgb, k_depth, k_params = jax.random.split(key, 3)

    rgb = jax.random.normal(k_rgb, (B, channels, image_size, image_size), jnp.float32)
    depth = jax.random.normal(k_depth, (B, depth_channels, image_size, image_size),
                              jnp.float32)

    params = init_params(k_params, channels, image_size, embed_size,
                         num_classes, depth_channels)
    d_rgb = channels * image_size * image_size
    kparams, (e_true, nk) = fold_params(params, d_rgb)

    out = rgbd_vit_forward(rgb, depth, kparams, num_classes, e_true, nk)
    jax.block_until_ready(out)
    assert out.shape == (B, num_classes)

    # Tight check against a pure-JAX emulation of the kernel's exact arithmetic.
    matched = rgbd_vit_matched_reference(rgb, depth, kparams, e_true)[:, :num_classes]
    assert jnp.allclose(out, matched, rtol=1e-2, atol=1e-2), \
        "kernel vs matched-precision reference mismatch"

    # Loose check against the full-f32 unfolded module reference (bf16 weights/acts).
    ref = rgbd_vit_reference(rgb, depth, params)
    assert jnp.allclose(out, ref, rtol=1e-1, atol=1e-1), \
        "kernel vs f32 reference mismatch"

    print("KERNEL_OK")
</pallas_src>

<mosaic_0001>
module attributes {stable_mosaic.version = 11 : i64} {
  func.func @rgbd_vit_kernel(%arg0: i32, %arg1: i32, %arg2: memref<16x768xbf16, #tpu.memory_space<vmem>>, %arg3: memref<16x256xbf16, #tpu.memory_space<vmem>>, %arg4: memref<768x128xbf16, #tpu.memory_space<vmem>>, %arg5: memref<256x128xbf16, #tpu.memory_space<vmem>>, %arg6: memref<1x128xf32, #tpu.memory_space<vmem>>, %arg7: memref<4x128x128xbf16, #tpu.memory_space<vmem>>, %arg8: memref<4x1x128xf32, #tpu.memory_space<vmem>>, %arg9: memref<4x1x128xf32, #tpu.memory_space<vmem>>, %arg10: memref<4x1x128xf32, #tpu.memory_space<vmem>>, %arg11: memref<4x128x128xbf16, #tpu.memory_space<vmem>>, %arg12: memref<4x1x128xf32, #tpu.memory_space<vmem>>, %arg13: memref<4x128x128xbf16, #tpu.memory_space<vmem>>, %arg14: memref<4x1x128xf32, #tpu.memory_space<vmem>>, %arg15: memref<4x1x128xf32, #tpu.memory_space<vmem>>, %arg16: memref<4x1x128xf32, #tpu.memory_space<vmem>>, %arg17: memref<128x128xbf16, #tpu.memory_space<vmem>>, %arg18: memref<1x128xf32, #tpu.memory_space<vmem>>, %arg19: memref<16x128xf32, #tpu.memory_space<vmem>>, %arg20: memref<16x128xf32, #tpu.memory_space<vmem>>) attributes {dimension_semantics = [#tpu.dimension_semantics<parallel>, #tpu.dimension_semantics<arbitrary>], iteration_bounds = array<i64: 1, 1>, scalar_prefetch = 0 : i64, scratch_operands = 1 : i64, tpu.core_type = #tpu.core_type<tc>, window_params = [{transform_indices = @transform_0, window_bounds = array<i64: 16, 768>}, {transform_indices = @transform_1, window_bounds = array<i64: 16, 256>}, {transform_indices = @transform_2, window_bounds = array<i64: 768, 128>}, {transform_indices = @transform_3, window_bounds = array<i64: 256, 128>}, {pipeline_mode = #tpu.pipeline_mode<synchronous>, transform_indices = @transform_4, window_bounds = array<i64: 1, 128>}, {pipeline_mode = #tpu.pipeline_mode<synchronous>, transform_indices = @transform_5, window_bounds = array<i64: 4, 128, 128>}, {pipeline_mode = #tpu.pipeline_mode<synchronous>, transform_indices = @transform_6, window_bounds = array<i64: 4, 1, 128>}, {pipeline_mode = #tpu.pipeline_mode<synchronous>, transform_indices = @transform_7, window_bounds = array<i64: 4, 1, 128>}, {pipeline_mode = #tpu.pipeline_mode<synchronous>, transform_indices = @transform_8, window_bounds = array<i64: 4, 1, 128>}, {pipeline_mode = #tpu.pipeline_mode<synchronous>, transform_indices = @transform_9, window_bounds = array<i64: 4, 128, 128>}, {pipeline_mode = #tpu.pipeline_mode<synchronous>, transform_indices = @transform_10, window_bounds = array<i64: 4, 1, 128>}, {pipeline_mode = #tpu.pipeline_mode<synchronous>, transform_indices = @transform_11, window_bounds = array<i64: 4, 128, 128>}, {pipeline_mode = #tpu.pipeline_mode<synchronous>, transform_indices = @transform_12, window_bounds = array<i64: 4, 1, 128>}, {pipeline_mode = #tpu.pipeline_mode<synchronous>, transform_indices = @transform_13, window_bounds = array<i64: 4, 1, 128>}, {pipeline_mode = #tpu.pipeline_mode<synchronous>, transform_indices = @transform_14, window_bounds = array<i64: 4, 1, 128>}, {pipeline_mode = #tpu.pipeline_mode<synchronous>, transform_indices = @transform_15, window_bounds = array<i64: 128, 128>}, {pipeline_mode = #tpu.pipeline_mode<synchronous>, transform_indices = @transform_16, window_bounds = array<i64: 1, 128>}, {transform_indices = @transform_17, window_bounds = array<i64: 16, 128>}]} {
    %c0_i32 = arith.constant 0 : i32
    %0 = arith.cmpi eq, %arg1, %c0_i32 : i32
    %1 = arith.extui %0 : i1 to i32
    %c0_i32_0 = arith.constant 0 : i32
    %2 = arith.cmpi ne, %1, %c0_i32_0 : i32
    scf.if %2 {
      %c0_15 = arith.constant 0 : index
      %c0_16 = arith.constant 0 : index
      %16 = vector.load %arg6[%c0_15, %c0_16] : memref<1x128xf32, #tpu.memory_space<vmem>>, vector<1x128xf32>
      %17 = vector.shape_cast %16 : vector<1x128xf32> to vector<1x128xf32>
      %18 = vector.broadcast %17 : vector<1x128xf32> to vector<16x128xf32>
      %c0_17 = arith.constant 0 : index
      %c0_18 = arith.constant 0 : index
      %19 = vector.load %arg20[%c0_17, %c0_18] : memref<16x128xf32, #tpu.memory_space<vmem>>, vector<16x128xf32>
      tpu.vector_store %arg20[%c0_17, %c0_18], %18 {strides = array<i32>} : memref<16x128xf32, #tpu.memory_space<vmem>>, vector<16x128xf32>,
    } else {
    }
    %c0 = arith.constant 0 : index
    %c0_1 = arith.constant 0 : index
    %3 = vector.load %arg20[%c0, %c0_1] : memref<16x128xf32, #tpu.memory_space<vmem>>, vector<16x128xf32>
    %c0_2 = arith.constant 0 : index
    %c0_3 = arith.constant 0 : index
    %4 = vector.load %arg2[%c0_2, %c0_3] : memref<16x768xbf16, #tpu.memory_space<vmem>>, vector<16x768xbf16>
    %c0_4 = arith.constant 0 : index
    %c0_5 = arith.constant 0 : index
    %5 = vector.load %arg4[%c0_4, %c0_5] : memref<768x128xbf16, #tpu.memory_space<vmem>>, vector<768x128xbf16>
    %cst = arith.constant dense<0.000000e+00> : vector<16x128xf32>
    %6 = tpu.matmul %4, %5, %cst {dimension_numbers = #tpu.dot_dimension_numbers<[1], [0], [0], [1], [0, 0, 1, 1], [], []>} : vector<16x768xbf16>, vector<768x128xbf16>, vector<16x128xf32> -> vector<16x128xf32>
    %c0_6 = arith.constant 0 : index
    %c0_7 = arith.constant 0 : index
    %7 = vector.load %arg3[%c0_6, %c0_7] : memref<16x256xbf16, #tpu.memory_space<vmem>>, vector<16x256xbf16>
    %c0_8 = arith.constant 0 : index
    %c0_9 = arith.constant 0 : index
    %8 = vector.load %arg5[%c0_8, %c0_9] : memref<256x128xbf16, #tpu.memory_space<vmem>>, vector<256x128xbf16>
    %cst_10 = arith.constant dense<0.000000e+00> : vector<16x128xf32>
    %9 = tpu.matmul %7, %8, %cst_10 {dimension_numbers = #tpu.dot_dimension_numbers<[1], [0], [0], [1], [0, 0, 1, 1], [], []>} : vector<16x256xbf16>, vector<256x128xbf16>, vector<16x128xf32> -> vector<16x128xf32>
    %10 = arith.addf %6, %9 : vector<16x128xf32>
    %11 = arith.addf %3, %10 : vector<16x128xf32>
    %c0_11 = arith.constant 0 : index
    %c0_12 = arith.constant 0 : index
    %12 = vector.load %arg20[%c0_11, %c0_12] : memref<16x128xf32, #tpu.memory_space<vmem>>, vector<16x128xf32>
    tpu.vector_store %arg20[%c0_11, %c0_12], %11 {strides = array<i32>} : memref<16x128xf32, #tpu.memory_space<vmem>>, vector<16x128xf32>,
    %c0_i32_13 = arith.constant 0 : i32
    %13 = arith.cmpi eq, %arg1, %c0_i32_13 : i32
    %14 = arith.extui %13 : i1 to i32
    %c0_i32_14 = arith.constant 0 : i32
    %15 = arith.cmpi ne, %14, %c0_i32_14 : i32
    scf.if %15 {
      %c0_15 = arith.constant 0 : index
      %c0_16 = arith.constant 0 : index
      %16 = vector.load %arg20[%c0_15, %c0_16] : memref<16x128xf32, #tpu.memory_space<vmem>>, vector<16x128xf32>
      %17 = tpu.iota {dimensions = array<i32: 1>} : vector<1x128xi32>
      %c32_i32 = arith.constant 32 : i32
      %18 = vector.broadcast %c32_i32 : i32 to vector<1x128xi32>
      %19 = arith.cmpi slt, %17, %18 : vector<1x128xi32>
      %20 = arith.extui %19 : vector<1x128xi1> to vector<1x128xi32>
      %21 = arith.sitofp %20 : vector<1x128xi32> to vector<1x128xf32>
      %22 = arith.truncf %16 : vector<16x128xf32> to vector<16x128xbf16>
      %c0_17 = arith.constant 0 : index
      %c0_18 = arith.constant 0 : index
      %c0_19 = arith.constant 0 : index
      %23 = vector.load %arg7[%c0_17, %c0_18, %c0_19] : memref<4x128x128xbf16, #tpu.memory_space<vmem>>, vector<1x128x128xbf16>
      %24 = vector.shape_cast %23 : vector<1x128x128xbf16> to vector<128x128xbf16>
      %cst_20 = arith.constant dense<0.000000e+00> : vector<16x128xf32>
      %25 = tpu.matmul %22, %24, %cst_20 {dimension_numbers = #tpu.dot_dimension_numbers<[1], [0], [0], [1], [0, 0, 1, 1], [], []>} : vector<16x128xbf16>, vector<128x128xbf16>, vector<16x128xf32> -> vector<16x128xf32>
      %c0_21 = arith.constant 0 : index
      %c0_22 = arith.constant 0 : index
      %c0_23 = arith.constant 0 : index
      %26 = vector.load %arg8[%c0_21, %c0_22, %c0_23] : memref<4x1x128xf32, #tpu.memory_space<vmem>>, vector<1x1x128xf32>
      %27 = vector.shape_cast %26 : vector<1x1x128xf32> to vector<1x128xf32>
      %28 = vector.broadcast %27 : vector<1x128xf32> to vector<16x128xf32>
      %29 = arith.addf %25, %28 : vector<16x128xf32>
      %30 = arith.addf %29, %16 : vector<16x128xf32>
      %c0_24 = arith.constant 0 : index
      %c0_25 = arith.constant 0 : index
      %c0_26 = arith.constant 0 : index
      %31 = vector.load %arg9[%c0_24, %c0_25, %c0_26] : memref<4x1x128xf32, #tpu.memory_space<vmem>>, vector<1x1x128xf32>
      %32 = vector.shape_cast %31 : vector<1x1x128xf32> to vector<1x128xf32>
      %c0_27 = arith.constant 0 : index
      %c0_28 = arith.constant 0 : index
      %c0_29 = arith.constant 0 : index
      %33 = vector.load %arg10[%c0_27, %c0_28, %c0_29] : memref<4x1x128xf32, #tpu.memory_space<vmem>>, vector<1x1x128xf32>
      %34 = vector.shape_cast %33 : vector<1x1x128xf32> to vector<1x128xf32>
      %cst_30 = arith.constant dense<0.000000e+00> : vector<16xf32>
      %35 = vector.multi_reduction <add>, %30, %cst_30 [1] : vector<16x128xf32> to vector<16xf32>
      %36 = vector.shape_cast %35 : vector<16xf32> to vector<16x1xf32>
      %cst_31 = arith.constant 3.125000e-02 : f32
      %37 = vector.broadcast %cst_31 : f32 to vector<16x1xf32>
      %38 = arith.mulf %36, %37 : vector<16x1xf32>
      %39 = vector.broadcast %38 : vector<16x1xf32> to vector<16x128xf32>
      %40 = arith.subf %30, %39 : vector<16x128xf32>
      %41 = vector.broadcast %21 : vector<1x128xf32> to vector<16x128xf32>
      %42 = arith.mulf %40, %41 : vector<16x128xf32>
      %43 = arith.mulf %42, %42 : vector<16x128xf32>
      %cst_32 = arith.constant dense<0.000000e+00> : vector<16xf32>
      %44 = vector.multi_reduction <add>, %43, %cst_32 [1] : vector<16x128xf32> to vector<16xf32>
      %45 = vector.shape_cast %44 : vector<16xf32> to vector<16x1xf32>
      %cst_33 = arith.constant 3.125000e-02 : f32
      %46 = vector.broadcast %cst_33 : f32 to vector<16x1xf32>
      %47 = arith.mulf %45, %46 : vector<16x1xf32>
      %cst_34 = arith.constant 9.99999974E-6 : f32
      %48 = vector.broadcast %cst_34 : f32 to vector<16x1xf32>
      %49 = arith.addf %47, %48 : vector<16x1xf32>
      %50 = math.rsqrt %49 : vector<16x1xf32>
      %51 = vector.broadcast %50 : vector<16x1xf32> to vector<16x128xf32>
      %52 = arith.mulf %42, %51 : vector<16x128xf32>
      %53 = vector.broadcast %32 : vector<1x128xf32> to vector<16x128xf32>
      %54 = arith.mulf %52, %53 : vector<16x128xf32>
      %55 = vector.broadcast %34 : vector<1x128xf32> to vector<16x128xf32>
      %56 = arith.addf %54, %55 : vector<16x128xf32>
      %57 = arith.truncf %56 : vector<16x128xf32> to vector<16x128xbf16>
      %c0_35 = arith.constant 0 : index
      %c0_36 = arith.constant 0 : index
      %c0_37 = arith.constant 0 : index
      %58 = vector.load %arg11[%c0_35, %c0_36, %c0_37] : memref<4x128x128xbf16, #tpu.memory_space<vmem>>, vector<1x128x128xbf16>
      %59 = vector.shape_cast %58 : vector<1x128x128xbf16> to vector<128x128xbf16>
      %cst_38 = arith.constant dense<0.000000e+00> : vector<16x128xf32>
      %60 = tpu.matmul %57, %59, %cst_38 {dimension_numbers = #tpu.dot_dimension_numbers<[1], [0], [0], [1], [0, 0, 1, 1], [], []>} : vector<16x128xbf16>, vector<128x128xbf16>, vector<16x128xf32> -> vector<16x128xf32>
      %c0_39 = arith.constant 0 : index
      %c0_40 = arith.constant 0 : index
      %c0_41 = arith.constant 0 : index
      %61 = vector.load %arg12[%c0_39, %c0_40, %c0_41] : memref<4x1x128xf32, #tpu.memory_space<vmem>>, vector<1x1x128xf32>
      %62 = vector.shape_cast %61 : vector<1x1x128xf32> to vector<1x128xf32>
      %63 = vector.broadcast %62 : vector<1x128xf32> to vector<16x128xf32>
      %64 = arith.addf %60, %63 : vector<16x128xf32>
      %cst_42 = arith.constant 0.000000e+00 : f32
      %65 = vector.broadcast %cst_42 : f32 to vector<16x128xf32>
      %66 = arith.maximumf %64, %65 : vector<16x128xf32>
      %67 = arith.truncf %66 : vector<16x128xf32> to vector<16x128xbf16>
      %c0_43 = arith.constant 0 : index
      %c0_44 = arith.constant 0 : index
      %c0_45 = arith.constant 0 : index
      %68 = vector.load %arg13[%c0_43, %c0_44, %c0_45] : memref<4x128x128xbf16, #tpu.memory_space<vmem>>, vector<1x128x128xbf16>
      %69 = vector.shape_cast %68 : vector<1x128x128xbf16> to vector<128x128xbf16>
      %cst_46 = arith.constant dense<0.000000e+00> : vector<16x128xf32>
      %70 = tpu.matmul %67, %69, %cst_46 {dimension_numbers = #tpu.dot_dimension_numbers<[1], [0], [0], [1], [0, 0, 1, 1], [], []>} : vector<16x128xbf16>, vector<128x128xbf16>, vector<16x128xf32> -> vector<16x128xf32>
      %c0_47 = arith.constant 0 : index
      %c0_48 = arith.constant 0 : index
      %c0_49 = arith.constant 0 : index
      %71 = vector.load %arg14[%c0_47, %c0_48, %c0_49] : memref<4x1x128xf32, #tpu.memory_space<vmem>>, vector<1x1x128xf32>
      %72 = vector.shape_cast %71 : vector<1x1x128xf32> to vector<1x128xf32>
      %73 = vector.broadcast %72 : vector<1x128xf32> to vector<16x128xf32>
      %74 = arith.addf %70, %73 : vector<16x128xf32>
      %75 = arith.addf %74, %56 : vector<16x128xf32>
      %c0_50 = arith.constant 0 : index
      %c0_51 = arith.constant 0 : index
      %c0_52 = arith.constant 0 : index
      %76 = vector.load %arg15[%c0_50, %c0_51, %c0_52] : memref<4x1x128xf32, #tpu.memory_space<vmem>>, vector<1x1x128xf32>
      %77 = vector.shape_cast %76 : vector<1x1x128xf32> to vector<1x128xf32>
      %c0_53 = arith.constant 0 : index
      %c0_54 = arith.constant 0 : index
      %c0_55 = arith.constant 0 : index
      %78 = vector.load %arg16[%c0_53, %c0_54, %c0_55] : memref<4x1x128xf32, #tpu.memory_space<vmem>>, vector<1x1x128xf32>
      %79 = vector.shape_cast %78 : vector<1x1x128xf32> to vector<1x128xf32>
      %cst_56 = arith.constant dense<0.000000e+00> : vector<16xf32>
      %80 = vector.multi_reduction <add>, %75, %cst_56 [1] : vector<16x128xf32> to vector<16xf32>
      %81 = vector.shape_cast %80 : vector<16xf32> to vector<16x1xf32>
      %cst_57 = arith.constant 3.125000e-02 : f32
      %82 = vector.broadcast %cst_57 : f32 to vector<16x1xf32>
      %83 = arith.mulf %81, %82 : vector<16x1xf32>
      %84 = vector.broadcast %83 : vector<16x1xf32> to vector<16x128xf32>
      %85 = arith.subf %75, %84 : vector<16x128xf32>
      %86 = vector.broadcast %21 : vector<1x128xf32> to vector<16x128xf32>
      %87 = arith.mulf %85, %86 : vector<16x128xf32>
      %88 = arith.mulf %87, %87 : vector<16x128xf32>
      %cst_58 = arith.constant dense<0.000000e+00> : vector<16xf32>
      %89 = vector.multi_reduction <add>, %88, %cst_58 [1] : vector<16x128xf32> to vector<16xf32>
      %90 = vector.shape_cast %89 : vector<16xf32> to vector<16x1xf32>
      %cst_59 = arith.constant 3.125000e-02 : f32
      %91 = vector.broadcast %cst_59 : f32 to vector<16x1xf32>
      %92 = arith.mulf %90, %91 : vector<16x1xf32>
      %cst_60 = arith.constant 9.99999974E-6 : f32
      %93 = vector.broadcast %cst_60 : f32 to vector<16x1xf32>
      %94 = arith.addf %92, %93 : vector<16x1xf32>
      %95 = math.rsqrt %94 : vector<16x1xf32>
      %96 = vector.broadcast %95 : vector<16x1xf32> to vector<16x128xf32>
      %97 = arith.mulf %87, %96 : vector<16x128xf32>
      %98 = vector.broadcast %77 : vector<1x128xf32> to vector<16x128xf32>
      %99 = arith.mulf %97, %98 : vector<16x128xf32>
      %100 = vector.broadcast %79 : vector<1x128xf32> to vector<16x128xf32>
      %101 = arith.addf %99, %100 : vector<16x128xf32>
      %102 = arith.truncf %101 : vector<16x128xf32> to vector<16x128xbf16>
      %c1 = arith.constant 1 : index
      %c0_61 = arith.constant 0 : index
      %c0_62 = arith.constant 0 : index
      %103 = vector.load %arg7[%c1, %c0_61, %c0_62] : memref<4x128x128xbf16, #tpu.memory_space<vmem>>, vector<1x128x128xbf16>
      %104 = vector.shape_cast %103 : vector<1x128x128xbf16> to vector<128x128xbf16>
      %cst_63 = arith.constant dense<0.000000e+00> : vector<16x128xf32>
      %105 = tpu.matmul %102, %104, %cst_63 {dimension_numbers = #tpu.dot_dimension_numbers<[1], [0], [0], [1], [0, 0, 1, 1], [], []>} : vector<16x128xbf16>, vector<128x128xbf16>, vector<16x128xf32> -> vector<16x128xf32>
      %c1_64 = arith.constant 1 : index
      %c0_65 = arith.constant 0 : index
      %c0_66 = arith.constant 0 : index
      %106 = vector.load %arg8[%c1_64, %c0_65, %c0_66] : memref<4x1x128xf32, #tpu.memory_space<vmem>>, vector<1x1x128xf32>
      %107 = vector.shape_cast %106 : vector<1x1x128xf32> to vector<1x128xf32>
      %108 = vector.broadcast %107 : vector<1x128xf32> to vector<16x128xf32>
      %109 = arith.addf %105, %108 : vector<16x128xf32>
      %110 = arith.addf %109, %101 : vector<16x128xf32>
      %c1_67 = arith.constant 1 : index
      %c0_68 = arith.constant 0 : index
      %c0_69 = arith.constant 0 : index
      %111 = vector.load %arg9[%c1_67, %c0_68, %c0_69] : memref<4x1x128xf32, #tpu.memory_space<vmem>>, vector<1x1x128xf32>
      %112 = vector.shape_cast %111 : vector<1x1x128xf32> to vector<1x128xf32>
      %c1_70 = arith.constant 1 : index
      %c0_71 = arith.constant 0 : index
      %c0_72 = arith.constant 0 : index
      %113 = vector.load %arg10[%c1_70, %c0_71, %c0_72] : memref<4x1x128xf32, #tpu.memory_space<vmem>>, vector<1x1x128xf32>
      %114 = vector.shape_cast %113 : vector<1x1x128xf32> to vector<1x128xf32>
      %cst_73 = arith.constant dense<0.000000e+00> : vector<16xf32>
      %115 = vector.multi_reduction <add>, %110, %cst_73 [1] : vector<16x128xf32> to vector<16xf32>
      %116 = vector.shape_cast %115 : vector<16xf32> to vector<16x1xf32>
      %cst_74 = arith.constant 3.125000e-02 : f32
      %117 = vector.broadcast %cst_74 : f32 to vector<16x1xf32>
      %118 = arith.mulf %116, %117 : vector<16x1xf32>
      %119 = vector.broadcast %118 : vector<16x1xf32> to vector<16x128xf32>
      %120 = arith.subf %110, %119 : vector<16x128xf32>
      %121 = vector.broadcast %21 : vector<1x128xf32> to vector<16x128xf32>
      %122 = arith.mulf %120, %121 : vector<16x128xf32>
      %123 = arith.mulf %122, %122 : vector<16x128xf32>
      %cst_75 = arith.constant dense<0.000000e+00> : vector<16xf32>
      %124 = vector.multi_reduction <add>, %123, %cst_75 [1] : vector<16x128xf32> to vector<16xf32>
      %125 = vector.shape_cast %124 : vector<16xf32> to vector<16x1xf32>
      %cst_76 = arith.constant 3.125000e-02 : f32
      %126 = vector.broadcast %cst_76 : f32 to vector<16x1xf32>
      %127 = arith.mulf %125, %126 : vector<16x1xf32>
      %cst_77 = arith.constant 9.99999974E-6 : f32
      %128 = vector.broadcast %cst_77 : f32 to vector<16x1xf32>
      %129 = arith.addf %127, %128 : vector<16x1xf32>
      %130 = math.rsqrt %129 : vector<16x1xf32>
      %131 = vector.broadcast %130 : vector<16x1xf32> to vector<16x128xf32>
      %132 = arith.mulf %122, %131 : vector<16x128xf32>
      %133 = vector.broadcast %112 : vector<1x128xf32> to vector<16x128xf32>
      %134 = arith.mulf %132, %133 : vector<16x128xf32>
      %135 = vector.broadcast %114 : vector<1x128xf32> to vector<16x128xf32>
      %136 = arith.addf %134, %135 : vector<16x128xf32>
      %137 = arith.truncf %136 : vector<16x128xf32> to vector<16x128xbf16>
      %c1_78 = arith.constant 1 : index
      %c0_79 = arith.constant 0 : index
      %c0_80 = arith.constant 0 : index
      %138 = vector.load %arg11[%c1_78, %c0_79, %c0_80] : memref<4x128x128xbf16, #tpu.memory_space<vmem>>, vector<1x128x128xbf16>
      %139 = vector.shape_cast %138 : vector<1x128x128xbf16> to vector<128x128xbf16>
      %cst_81 = arith.constant dense<0.000000e+00> : vector<16x128xf32>
      %140 = tpu.matmul %137, %139, %cst_81 {dimension_numbers = #tpu.dot_dimension_numbers<[1], [0], [0], [1], [0, 0, 1, 1], [], []>} : vector<16x128xbf16>, vector<128x128xbf16>, vector<16x128xf32> -> vector<16x128xf32>
      %c1_82 = arith.constant 1 : index
      %c0_83 = arith.constant 0 : index
      %c0_84 = arith.constant 0 : index
      %141 = vector.load %arg12[%c1_82, %c0_83, %c0_84] : memref<4x1x128xf32, #tpu.memory_space<vmem>>, vector<1x1x128xf32>
      %142 = vector.shape_cast %141 : vector<1x1x128xf32> to vector<1x128xf32>
      %143 = vector.broadcast %142 : vector<1x128xf32> to vector<16x128xf32>
      %144 = arith.addf %140, %143 : vector<16x128xf32>
      %cst_85 = arith.constant 0.000000e+00 : f32
      %145 = vector.broadcast %cst_85 : f32 to vector<16x128xf32>
      %146 = arith.maximumf %144, %145 : vector<16x128xf32>
      %147 = arith.truncf %146 : vector<16x128xf32> to vector<16x128xbf16>
      %c1_86 = arith.constant 1 : index
      %c0_87 = arith.constant 0 : index
      %c0_88 = arith.constant 0 : index
      %148 = vector.load %arg13[%c1_86, %c0_87, %c0_88] : memref<4x128x128xbf16, #tpu.memory_space<vmem>>, vector<1x128x128xbf16>
      %149 = vector.shape_cast %148 : vector<1x128x128xbf16> to vector<128x128xbf16>
      %cst_89 = arith.constant dense<0.000000e+00> : vector<16x128xf32>
      %150 = tpu.matmul %147, %149, %cst_89 {dimension_numbers = #tpu.dot_dimension_numbers<[1], [0], [0], [1], [0, 0, 1, 1], [], []>} : vector<16x128xbf16>, vector<128x128xbf16>, vector<16x128xf32> -> vector<16x128xf32>
      %c1_90 = arith.constant 1 : index
      %c0_91 = arith.constant 0 : index
      %c0_92 = arith.constant 0 : index
      %151 = vector.load %arg14[%c1_90, %c0_91, %c0_92] : memref<4x1x128xf32, #tpu.memory_space<vmem>>, vector<1x1x128xf32>
      %152 = vector.shape_cast %151 : vector<1x1x128xf32> to vector<1x128xf32>
      %153 = vector.broadcast %152 : vector<1x128xf32> to vector<16x128xf32>
      %154 = arith.addf %150, %153 : vector<16x128xf32>
      %155 = arith.addf %154, %136 : vector<16x128xf32>
      %c1_93 = arith.constant 1 : index
      %c0_94 = arith.constant 0 : index
      %c0_95 = arith.constant 0 : index
      %156 = vector.load %arg15[%c1_93, %c0_94, %c0_95] : memref<4x1x128xf32, #tpu.memory_space<vmem>>, vector<1x1x128xf32>
      %157 = vector.shape_cast %156 : vector<1x1x128xf32> to vector<1x128xf32>
      %c1_96 = arith.constant 1 : index
      %c0_97 = arith.constant 0 : index
      %c0_98 = arith.constant 0 : index
      %158 = vector.load %arg16[%c1_96, %c0_97, %c0_98] : memref<4x1x128xf32, #tpu.memory_space<vmem>>, vector<1x1x128xf32>
      %159 = vector.shape_cast %158 : vector<1x1x128xf32> to vector<1x128xf32>
      %cst_99 = arith.constant dense<0.000000e+00> : vector<16xf32>
      %160 = vector.multi_reduction <add>, %155, %cst_99 [1] : vector<16x128xf32> to vector<16xf32>
      %161 = vector.shape_cast %160 : vector<16xf32> to vector<16x1xf32>
      %cst_100 = arith.constant 3.125000e-02 : f32
      %162 = vector.broadcast %cst_100 : f32 to vector<16x1xf32>
      %163 = arith.mulf %161, %162 : vector<16x1xf32>
      %164 = vector.broadcast %163 : vector<16x1xf32> to vector<16x128xf32>
      %165 = arith.subf %155, %164 : vector<16x128xf32>
      %166 = vector.broadcast %21 : vector<1x128xf32> to vector<16x128xf32>
      %167 = arith.mulf %165, %166 : vector<16x128xf32>
      %168 = arith.mulf %167, %167 : vector<16x128xf32>
      %cst_101 = arith.constant dense<0.000000e+00> : vector<16xf32>
      %169 = vector.multi_reduction <add>, %168, %cst_101 [1] : vector<16x128xf32> to vector<16xf32>
      %170 = vector.shape_cast %169 : vector<16xf32> to vector<16x1xf32>
      %cst_102 = arith.constant 3.125000e-02 : f32
      %171 = vector.broadcast %cst_102 : f32 to vector<16x1xf32>
      %172 = arith.mulf %170, %171 : vector<16x1xf32>
      %cst_103 = arith.constant 9.99999974E-6 : f32
      %173 = vector.broadcast %cst_103 : f32 to vector<16x1xf32>
      %174 = arith.addf %172, %173 : vector<16x1xf32>
      %175 = math.rsqrt %174 : vector<16x1xf32>
      %176 = vector.broadcast %175 : vector<16x1xf32> to vector<16x128xf32>
      %177 = arith.mulf %167, %176 : vector<16x128xf32>
      %178 = vector.broadcast %157 : vector<1x128xf32> to vector<16x128xf32>
      %179 = arith.mulf %177, %178 : vector<16x128xf32>
      %180 = vector.broadcast %159 : vector<1x128xf32> to vector<16x128xf32>
      %181 = arith.addf %179, %180 : vector<16x128xf32>
      %182 = arith.truncf %181 : vector<16x128xf32> to vector<16x128xbf16>
      %c2 = arith.constant 2 : index
      %c0_104 = arith.constant 0 : index
      %c0_105 = arith.constant 0 : index
      %183 = vector.load %arg7[%c2, %c0_104, %c0_105] : memref<4x128x128xbf16, #tpu.memory_space<vmem>>, vector<1x128x128xbf16>
      %184 = vector.shape_cast %183 : vector<1x128x128xbf16> to vector<128x128xbf16>
      %cst_106 = arith.constant dense<0.000000e+00> : vector<16x128xf32>
      %185 = tpu.matmul %182, %184, %cst_106 {dimension_numbers = #tpu.dot_dimension_numbers<[1], [0], [0], [1], [0, 0, 1, 1], [], []>} : vector<16x128xbf16>, vector<128x128xbf16>, vector<16x128xf32> -> vector<16x128xf32>
      %c2_107 = arith.constant 2 : index
      %c0_108 = arith.constant 0 : index
      %c0_109 = arith.constant 0 : index
      %186 = vector.load %arg8[%c2_107, %c0_108, %c0_109] : memref<4x1x128xf32, #tpu.memory_space<vmem>>, vector<1x1x128xf32>
      %187 = vector.shape_cast %186 : vector<1x1x128xf32> to vector<1x128xf32>
      %188 = vector.broadcast %187 : vector<1x128xf32> to vector<16x128xf32>
      %189 = arith.addf %185, %188 : vector<16x128xf32>
      %190 = arith.addf %189, %181 : vector<16x128xf32>
      %c2_110 = arith.constant 2 : index
      %c0_111 = arith.constant 0 : index
      %c0_112 = arith.constant 0 : index
      %191 = vector.load %arg9[%c2_110, %c0_111, %c0_112] : memref<4x1x128xf32, #tpu.memory_space<vmem>>, vector<1x1x128xf32>
      %192 = vector.shape_cast %191 : vector<1x1x128xf32> to vector<1x128xf32>
      %c2_113 = arith.constant 2 : index
      %c0_114 = arith.constant 0 : index
      %c0_115 = arith.constant 0 : index
      %193 = vector.load %arg10[%c2_113, %c0_114, %c0_115] : memref<4x1x128xf32, #tpu.memory_space<vmem>>, vector<1x1x128xf32>
      %194 = vector.shape_cast %193 : vector<1x1x128xf32> to vector<1x128xf32>
      %cst_116 = arith.constant dense<0.000000e+00> : vector<16xf32>
      %195 = vector.multi_reduction <add>, %190, %cst_116 [1] : vector<16x128xf32> to vector<16xf32>
      %196 = vector.shape_cast %195 : vector<16xf32> to vector<16x1xf32>
      %cst_117 = arith.constant 3.125000e-02 : f32
      %197 = vector.broadcast %cst_117 : f32 to vector<16x1xf32>
      %198 = arith.mulf %196, %197 : vector<16x1xf32>
      %199 = vector.broadcast %198 : vector<16x1xf32> to vector<16x128xf32>
      %200 = arith.subf %190, %199 : vector<16x128xf32>
      %201 = vector.broadcast %21 : vector<1x128xf32> to vector<16x128xf32>
      %202 = arith.mulf %200, %201 : vector<16x128xf32>
      %203 = arith.mulf %202, %202 : vector<16x128xf32>
      %cst_118 = arith.constant dense<0.000000e+00> : vector<16xf32>
      %204 = vector.multi_reduction <add>, %203, %cst_118 [1] : vector<16x128xf32> to vector<16xf32>
      %205 = vector.shape_cast %204 : vector<16xf32> to vector<16x1xf32>
      %cst_119 = arith.constant 3.125000e-02 : f32
      %206 = vector.broadcast %cst_119 : f32 to vector<16x1xf32>
      %207 = arith.mulf %205, %206 : vector<16x1xf32>
      %cst_120 = arith.constant 9.99999974E-6 : f32
      %208 = vector.broadcast %cst_120 : f32 to vector<16x1xf32>
      %209 = arith.addf %207, %208 : vector<16x1xf32>
      %210 = math.rsqrt %209 : vector<16x1xf32>
      %211 = vector.broadcast %210 : vector<16x1xf32> to vector<16x128xf32>
      %212 = arith.mulf %202, %211 : vector<16x128xf32>
      %213 = vector.broadcast %192 : vector<1x128xf32> to vector<16x128xf32>
      %214 = arith.mulf %212, %213 : vector<16x128xf32>
      %215 = vector.broadcast %194 : vector<1x128xf32> to vector<16x128xf32>
      %216 = arith.addf %214, %215 : vector<16x128xf32>
      %217 = arith.truncf %216 : vector<16x128xf32> to vector<16x128xbf16>
      %c2_121 = arith.constant 2 : index
      %c0_122 = arith.constant 0 : index
      %c0_123 = arith.constant 0 : index
      %218 = vector.load %arg11[%c2_121, %c0_122, %c0_123] : memref<4x128x128xbf16, #tpu.memory_space<vmem>>, vector<1x128x128xbf16>
      %219 = vector.shape_cast %218 : vector<1x128x128xbf16> to vector<128x128xbf16>
      %cst_124 = arith.constant dense<0.000000e+00> : vector<16x128xf32>
      %220 = tpu.matmul %217, %219, %cst_124 {dimension_numbers = #tpu.dot_dimension_numbers<[1], [0], [0], [1], [0, 0, 1, 1], [], []>} : vector<16x128xbf16>, vector<128x128xbf16>, vector<16x128xf32> -> vector<16x128xf32>
      %c2_125 = arith.constant 2 : index
      %c0_126 = arith.constant 0 : index
      %c0_127 = arith.constant 0 : index
      %221 = vector.load %arg12[%c2_125, %c0_126, %c0_127] : memref<4x1x128xf32, #tpu.memory_space<vmem>>, vector<1x1x128xf32>
      %222 = vector.shape_cast %221 : vector<1x1x128xf32> to vector<1x128xf32>
      %223 = vector.broadcast %222 : vector<1x128xf32> to vector<16x128xf32>
      %224 = arith.addf %220, %223 : vector<16x128xf32>
      %cst_128 = arith.constant 0.000000e+00 : f32
      %225 = vector.broadcast %cst_128 : f32 to vector<16x128xf32>
      %226 = arith.maximumf %224, %225 : vector<16x128xf32>
      %227 = arith.truncf %226 : vector<16x128xf32> to vector<16x128xbf16>
      %c2_129 = arith.constant 2 : index
      %c0_130 = arith.constant 0 : index
      %c0_131 = arith.constant 0 : index
      %228 = vector.load %arg13[%c2_129, %c0_130, %c0_131] : memref<4x128x128xbf16, #tpu.memory_space<vmem>>, vector<1x128x128xbf16>
      %229 = vector.shape_cast %228 : vector<1x128x128xbf16> to vector<128x128xbf16>
      %cst_132 = arith.constant dense<0.000000e+00> : vector<16x128xf32>
      %230 = tpu.matmul %227, %229, %cst_132 {dimension_numbers = #tpu.dot_dimension_numbers<[1], [0], [0], [1], [0, 0, 1, 1], [], []>} : vector<16x128xbf16>, vector<128x128xbf16>, vector<16x128xf32> -> vector<16x128xf32>
      %c2_133 = arith.constant 2 : index
      %c0_134 = arith.constant 0 : index
      %c0_135 = arith.constant 0 : index
      %231 = vector.load %arg14[%c2_133, %c0_134, %c0_135] : memref<4x1x128xf32, #tpu.memory_space<vmem>>, vector<1x1x128xf32>
      %232 = vector.shape_cast %231 : vector<1x1x128xf32> to vector<1x128xf32>
      %233 = vector.broadcast %232 : vector<1x128xf32> to vector<16x128xf32>
      %234 = arith.addf %230, %233 : vector<16x128xf32>
      %235 = arith.addf %234, %216 : vector<16x128xf32>
      %c2_136 = arith.constant 2 : index
      %c0_137 = arith.constant 0 : index
      %c0_138 = arith.constant 0 : index
      %236 = vector.load %arg15[%c2_136, %c0_137, %c0_138] : memref<4x1x128xf32, #tpu.memory_space<vmem>>, vector<1x1x128xf32>
      %237 = vector.shape_cast %236 : vector<1x1x128xf32> to vector<1x128xf32>
      %c2_139 = arith.constant 2 : index
      %c0_140 = arith.constant 0 : index
      %c0_141 = arith.constant 0 : index
      %238 = vector.load %arg16[%c2_139, %c0_140, %c0_141] : memref<4x1x128xf32, #tpu.memory_space<vmem>>, vector<1x1x128xf32>
      %239 = vector.shape_cast %238 : vector<1x1x128xf32> to vector<1x128xf32>
      %cst_142 = arith.constant dense<0.000000e+00> : vector<16xf32>
      %240 = vector.multi_reduction <add>, %235, %cst_142 [1] : vector<16x128xf32> to vector<16xf32>
      %241 = vector.shape_cast %240 : vector<16xf32> to vector<16x1xf32>
      %cst_143 = arith.constant 3.125000e-02 : f32
      %242 = vector.broadcast %cst_143 : f32 to vector<16x1xf32>
      %243 = arith.mulf %241, %242 : vector<16x1xf32>
      %244 = vector.broadcast %243 : vector<16x1xf32> to vector<16x128xf32>
      %245 = arith.subf %235, %244 : vector<16x128xf32>
      %246 = vector.broadcast %21 : vector<1x128xf32> to vector<16x128xf32>
      %247 = arith.mulf %245, %246 : vector<16x128xf32>
      %248 = arith.mulf %247, %247 : vector<16x128xf32>
      %cst_144 = arith.constant dense<0.000000e+00> : vector<16xf32>
      %249 = vector.multi_reduction <add>, %248, %cst_144 [1] : vector<16x128xf32> to vector<16xf32>
      %250 = vector.shape_cast %249 : vector<16xf32> to vector<16x1xf32>
      %cst_145 = arith.constant 3.125000e-02 : f32
      %251 = vector.broadcast %cst_145 : f32 to vector<16x1xf32>
      %252 = arith.mulf %250, %251 : vector<16x1xf32>
      %cst_146 = arith.constant 9.99999974E-6 : f32
      %253 = vector.broadcast %cst_146 : f32 to vector<16x1xf32>
      %254 = arith.addf %252, %253 : vector<16x1xf32>
      %255 = math.rsqrt %254 : vector<16x1xf32>
      %256 = vector.broadcast %255 : vector<16x1xf32> to vector<16x128xf32>
      %257 = arith.mulf %247, %256 : vector<16x128xf32>
      %258 = vector.broadcast %237 : vector<1x128xf32> to vector<16x128xf32>
      %259 = arith.mulf %257, %258 : vector<16x128xf32>
      %260 = vector.broadcast %239 : vector<1x128xf32> to vector<16x128xf32>
      %261 = arith.addf %259, %260 : vector<16x128xf32>
      %262 = arith.truncf %261 : vector<16x128xf32> to vector<16x128xbf16>
      %c3 = arith.constant 3 : index
      %c0_147 = arith.constant 0 : index
      %c0_148 = arith.constant 0 : index
      %263 = vector.load %arg7[%c3, %c0_147, %c0_148] : memref<4x128x128xbf16, #tpu.memory_space<vmem>>, vector<1x128x128xbf16>
      %264 = vector.shape_cast %263 : vector<1x128x128xbf16> to vector<128x128xbf16>
      %cst_149 = arith.constant dense<0.000000e+00> : vector<16x128xf32>
      %265 = tpu.matmul %262, %264, %cst_149 {dimension_numbers = #tpu.dot_dimension_numbers<[1], [0], [0], [1], [0, 0, 1, 1], [], []>} : vector<16x128xbf16>, vector<128x128xbf16>, vector<16x128xf32> -> vector<16x128xf32>
      %c3_150 = arith.constant 3 : index
      %c0_151 = arith.constant 0 : index
      %c0_152 = arith.constant 0 : index
      %266 = vector.load %arg8[%c3_150, %c0_151, %c0_152] : memref<4x1x128xf32, #tpu.memory_space<vmem>>, vector<1x1x128xf32>
      %267 = vector.shape_cast %266 : vector<1x1x128xf32> to vector<1x128xf32>
      %268 = vector.broadcast %267 : vector<1x128xf32> to vector<16x128xf32>
      %269 = arith.addf %265, %268 : vector<16x128xf32>
      %270 = arith.addf %269, %261 : vector<16x128xf32>
      %c3_153 = arith.constant 3 : index
      %c0_154 = arith.constant 0 : index
      %c0_155 = arith.constant 0 : index
      %271 = vector.load %arg9[%c3_153, %c0_154, %c0_155] : memref<4x1x128xf32, #tpu.memory_space<vmem>>, vector<1x1x128xf32>
      %272 = vector.shape_cast %271 : vector<1x1x128xf32> to vector<1x128xf32>
      %c3_156 = arith.constant 3 : index
      %c0_157 = arith.constant 0 : index
      %c0_158 = arith.constant 0 : index
      %273 = vector.load %arg10[%c3_156, %c0_157, %c0_158] : memref<4x1x128xf32, #tpu.memory_space<vmem>>, vector<1x1x128xf32>
      %274 = vector.shape_cast %273 : vector<1x1x128xf32> to vector<1x128xf32>
      %cst_159 = arith.constant dense<0.000000e+00> : vector<16xf32>
      %275 = vector.multi_reduction <add>, %270, %cst_159 [1] : vector<16x128xf32> to vector<16xf32>
      %276 = vector.shape_cast %275 : vector<16xf32> to vector<16x1xf32>
      %cst_160 = arith.constant 3.125000e-02 : f32
      %277 = vector.broadcast %cst_160 : f32 to vector<16x1xf32>
      %278 = arith.mulf %276, %277 : vector<16x1xf32>
      %279 = vector.broadcast %278 : vector<16x1xf32> to vector<16x128xf32>
      %280 = arith.subf %270, %279 : vector<16x128xf32>
      %281 = vector.broadcast %21 : vector<1x128xf32> to vector<16x128xf32>
      %282 = arith.mulf %280, %281 : vector<16x128xf32>
      %283 = arith.mulf %282, %282 : vector<16x128xf32>
      %cst_161 = arith.constant dense<0.000000e+00> : vector<16xf32>
      %284 = vector.multi_reduction <add>, %283, %cst_161 [1] : vector<16x128xf32> to vector<16xf32>
      %285 = vector.shape_cast %284 : vector<16xf32> to vector<16x1xf32>
      %cst_162 = arith.constant 3.125000e-02 : f32
      %286 = vector.broadcast %cst_162 : f32 to vector<16x1xf32>
      %287 = arith.mulf %285, %286 : vector<16x1xf32>
      %cst_163 = arith.constant 9.99999974E-6 : f32
      %288 = vector.broadcast %cst_163 : f32 to vector<16x1xf32>
      %289 = arith.addf %287, %288 : vector<16x1xf32>
      %290 = math.rsqrt %289 : vector<16x1xf32>
      %291 = vector.broadcast %290 : vector<16x1xf32> to vector<16x128xf32>
      %292 = arith.mulf %282, %291 : vector<16x128xf32>
      %293 = vector.broadcast %272 : vector<1x128xf32> to vector<16x128xf32>
      %294 = arith.mulf %292, %293 : vector<16x128xf32>
      %295 = vector.broadcast %274 : vector<1x128xf32> to vector<16x128xf32>
      %296 = arith.addf %294, %295 : vector<16x128xf32>
      %297 = arith.truncf %296 : vector<16x128xf32> to vector<16x128xbf16>
      %c3_164 = arith.constant 3 : index
      %c0_165 = arith.constant 0 : index
      %c0_166 = arith.constant 0 : index
      %298 = vector.load %arg11[%c3_164, %c0_165, %c0_166] : memref<4x128x128xbf16, #tpu.memory_space<vmem>>, vector<1x128x128xbf16>
      %299 = vector.shape_cast %298 : vector<1x128x128xbf16> to vector<128x128xbf16>
      %cst_167 = arith.constant dense<0.000000e+00> : vector<16x128xf32>
      %300 = tpu.matmul %297, %299, %cst_167 {dimension_numbers = #tpu.dot_dimension_numbers<[1], [0], [0], [1], [0, 0, 1, 1], [], []>} : vector<16x128xbf16>, vector<128x128xbf16>, vector<16x128xf32> -> vector<16x128xf32>
      %c3_168 = arith.constant 3 : index
      %c0_169 = arith.constant 0 : index
      %c0_170 = arith.constant 0 : index
      %301 = vector.load %arg12[%c3_168, %c0_169, %c0_170] : memref<4x1x128xf32, #tpu.memory_space<vmem>>, vector<1x1x128xf32>
      %302 = vector.shape_cast %301 : vector<1x1x128xf32> to vector<1x128xf32>
      %303 = vector.broadcast %302 : vector<1x128xf32> to vector<16x128xf32>
      %304 = arith.addf %300, %303 : vector<16x128xf32>
      %cst_171 = arith.constant 0.000000e+00 : f32
      %305 = vector.broadcast %cst_171 : f32 to vector<16x128xf32>
      %306 = arith.maximumf %304, %305 : vector<16x128xf32>
      %307 = arith.truncf %306 : vector<16x128xf32> to vector<16x128xbf16>
      %c3_172 = arith.constant 3 : index
      %c0_173 = arith.constant 0 : index
      %c0_174 = arith.constant 0 : index
      %308 = vector.load %arg13[%c3_172, %c0_173, %c0_174] : memref<4x128x128xbf16, #tpu.memory_space<vmem>>, vector<1x128x128xbf16>
      %309 = vector.shape_cast %308 : vector<1x128x128xbf16> to vector<128x128xbf16>
      %cst_175 = arith.constant dense<0.000000e+00> : vector<16x128xf32>
      %310 = tpu.matmul %307, %309, %cst_175 {dimension_numbers = #tpu.dot_dimension_numbers<[1], [0], [0], [1], [0, 0, 1, 1], [], []>} : vector<16x128xbf16>, vector<128x128xbf16>, vector<16x128xf32> -> vector<16x128xf32>
      %c3_176 = arith.constant 3 : index
      %c0_177 = arith.constant 0 : index
      %c0_178 = arith.constant 0 : index
      %311 = vector.load %arg14[%c3_176, %c0_177, %c0_178] : memref<4x1x128xf32, #tpu.memory_space<vmem>>, vector<1x1x128xf32>
      %312 = vector.shape_cast %311 : vector<1x1x128xf32> to vector<1x128xf32>
      %313 = vector.broadcast %312 : vector<1x128xf32> to vector<16x128xf32>
      %314 = arith.addf %310, %313 : vector<16x128xf32>
      %315 = arith.addf %314, %296 : vector<16x128xf32>
      %c3_179 = arith.constant 3 : index
      %c0_180 = arith.constant 0 : index
      %c0_181 = arith.constant 0 : index
      %316 = vector.load %arg15[%c3_179, %c0_180, %c0_181] : memref<4x1x128xf32, #tpu.memory_space<vmem>>, vector<1x1x128xf32>
      %317 = vector.shape_cast %316 : vector<1x1x128xf32> to vector<1x128xf32>
      %c3_182 = arith.constant 3 : index
      %c0_183 = arith.constant 0 : index
      %c0_184 = arith.constant 0 : index
      %318 = vector.load %arg16[%c3_182, %c0_183, %c0_184] : memref<4x1x128xf32, #tpu.memory_space<vmem>>, vector<1x1x128xf32>
      %319 = vector.shape_cast %318 : vector<1x1x128xf32> to vector<1x128xf32>
      %cst_185 = arith.constant dense<0.000000e+00> : vector<16xf32>
      %320 = vector.multi_reduction <add>, %315, %cst_185 [1] : vector<16x128xf32> to vector<16xf32>
      %321 = vector.shape_cast %320 : vector<16xf32> to vector<16x1xf32>
      %cst_186 = arith.constant 3.125000e-02 : f32
      %322 = vector.broadcast %cst_186 : f32 to vector<16x1xf32>
      %323 = arith.mulf %321, %322 : vector<16x1xf32>
      %324 = vector.broadcast %323 : vector<16x1xf32> to vector<16x128xf32>
      %325 = arith.subf %315, %324 : vector<16x128xf32>
      %326 = vector.broadcast %21 : vector<1x128xf32> to vector<16x128xf32>
      %327 = arith.mulf %325, %326 : vector<16x128xf32>
      %328 = arith.mulf %327, %327 : vector<16x128xf32>
      %cst_187 = arith.constant dense<0.000000e+00> : vector<16xf32>
      %329 = vector.multi_reduction <add>, %328, %cst_187 [1] : vector<16x128xf32> to vector<16xf32>
      %330 = vector.shape_cast %329 : vector<16xf32> to vector<16x1xf32>
      %cst_188 = arith.constant 3.125000e-02 : f32
      %331 = vector.broadcast %cst_188 : f32 to vector<16x1xf32>
      %332 = arith.mulf %330, %331 : vector<16x1xf32>
      %cst_189 = arith.constant 9.99999974E-6 : f32
      %333 = vector.broadcast %cst_189 : f32 to vector<16x1xf32>
      %334 = arith.addf %332, %333 : vector<16x1xf32>
      %335 = math.rsqrt %334 : vector<16x1xf32>
      %336 = vector.broadcast %335 : vector<16x1xf32> to vector<16x128xf32>
      %337 = arith.mulf %327, %336 : vector<16x128xf32>
      %338 = vector.broadcast %317 : vector<1x128xf32> to vector<16x128xf32>
      %339 = arith.mulf %337, %338 : vector<16x128xf32>
      %340 = vector.broadcast %319 : vector<1x128xf32> to vector<16x128xf32>
      %341 = arith.addf %339, %340 : vector<16x128xf32>
      %342 = arith.truncf %341 : vector<16x128xf32> to vector<16x128xbf16>
      %c0_190 = arith.constant 0 : index
      %c0_191 = arith.constant 0 : index
      %343 = vector.load %arg17[%c0_190, %c0_191] : memref<128x128xbf16, #tpu.memory_space<vmem>>, vector<128x128xbf16>
      %cst_192 = arith.constant dense<0.000000e+00> : vector<16x128xf32>
      %344 = tpu.matmul %342, %343, %cst_192 {dimension_numbers = #tpu.dot_dimension_numbers<[1], [0], [0], [1], [0, 0, 1, 1], [], []>} : vector<16x128xbf16>, vector<128x128xbf16>, vector<16x128xf32> -> vector<16x128xf32>
      %c0_193 = arith.constant 0 : index
      %c0_194 = arith.constant 0 : index
      %345 = vector.load %arg18[%c0_193, %c0_194] : memref<1x128xf32, #tpu.memory_space<vmem>>, vector<1x128xf32>
      %346 = vector.broadcast %345 : vector<1x128xf32> to vector<16x128xf32>
      %347 = arith.addf %344, %346 : vector<16x128xf32>
      %c0_195 = arith.constant 0 : index
      %c0_196 = arith.constant 0 : index
      %348 = vector.load %arg19[%c0_195, %c0_196] : memref<16x128xf32, #tpu.memory_space<vmem>>, vector<16x128xf32>
      tpu.vector_store %arg19[%c0_195, %c0_196], %347 {strides = array<i32>} : memref<16x128xf32, #tpu.memory_space<vmem>>, vector<16x128xf32>,
    } else {
    }
    return
  }
  func.func @transform_0(%arg0: i32, %arg1: i32) -> (i32, i32) {
    %c0_i32 = arith.constant 0 : i32
    return %arg0, %arg1 : i32, i32
  }
  func.func @transform_1(%arg0: i32, %arg1: i32) -> (i32, i32) {
    %c0_i32 = arith.constant 0 : i32
    return %arg0, %arg1 : i32, i32
  }
  func.func @transform_2(%arg0: i32, %arg1: i32) -> (i32, i32) {
    %c0_i32 = arith.constant 0 : i32
    %c0_i32_0 = arith.constant 0 : i32
    return %arg1, %c0_i32 : i32, i32
  }
  func.func @transform_3(%arg0: i32, %arg1: i32) -> (i32, i32) {
    %c0_i32 = arith.constant 0 : i32
    %c0_i32_0 = arith.constant 0 : i32
    return %arg1, %c0_i32 : i32, i32
  }
  func.func @transform_4(%arg0: i32, %arg1: i32) -> (i32, i32) {
    %c0_i32 = arith.constant 0 : i32
    %c0_i32_0 = arith.constant 0 : i32
    %c0_i32_1 = arith.constant 0 : i32
    return %c0_i32, %c0_i32_0 : i32, i32
  }
  func.func @transform_5(%arg0: i32, %arg1: i32) -> (i32, i32, i32) {
    %c0_i32 = arith.constant 0 : i32
    %c0_i32_0 = arith.constant 0 : i32
    %c0_i32_1 = arith.constant 0 : i32
    %c0_i32_2 = arith.constant 0 : i32
    return %c0_i32, %c0_i32_0, %c0_i32_1 : i32, i32, i32
  }
  func.func @transform_6(%arg0: i32, %arg1: i32) -> (i32, i32, i32) {
    %c0_i32 = arith.constant 0 : i32
    %c0_i32_0 = arith.constant 0 : i32
    %c0_i32_1 = arith.constant 0 : i32
    %c0_i32_2 = arith.constant 0 : i32
    return %c0_i32, %c0_i32_0, %c0_i32_1 : i32, i32, i32
  }
  func.func @transform_7(%arg0: i32, %arg1: i32) -> (i32, i32, i32) {
    %c0_i32 = arith.constant 0 : i32
    %c0_i32_0 = arith.constant 0 : i32
    %c0_i32_1 = arith.constant 0 : i32
    %c0_i32_2 = arith.constant 0 : i32
    return %c0_i32, %c0_i32_0, %c0_i32_1 : i32, i32, i32
  }
  func.func @transform_8(%arg0: i32, %arg1: i32) -> (i32, i32, i32) {
    %c0_i32 = arith.constant 0 : i32
    %c0_i32_0 = arith.constant 0 : i32
    %c0_i32_1 = arith.constant 0 : i32
    %c0_i32_2 = arith.constant 0 : i32
    return %c0_i32, %c0_i32_0, %c0_i32_1 : i32, i32, i32
  }
  func.func @transform_9(%arg0: i32, %arg1: i32) -> (i32, i32, i32) {
    %c0_i32 = arith.constant 0 : i32
    %c0_i32_0 = arith.constant 0 : i32
    %c0_i32_1 = arith.constant 0 : i32
    %c0_i32_2 = arith.constant 0 : i32
    return %c0_i32, %c0_i32_0, %c0_i32_1 : i32, i32, i32
  }
  func.func @transform_10(%arg0: i32, %arg1: i32) -> (i32, i32, i32) {
    %c0_i32 = arith.constant 0 : i32
    %c0_i32_0 = arith.constant 0 : i32
    %c0_i32_1 = arith.constant 0 : i32
    %c0_i32_2 = arith.constant 0 : i32
    return %c0_i32, %c0_i32_0, %c0_i32_1 : i32, i32, i32
  }
  func.func @transform_11(%arg0: i32, %arg1: i32) -> (i32, i32, i32) {
    %c0_i32 = arith.constant 0 : i32
    %c0_i32_0 = arith.constant 0 : i32
    %c0_i32_1 = arith.constant 0 : i32
    %c0_i32_2 = arith.constant 0 : i32
    return %c0_i32, %c0_i32_0, %c0_i32_1 : i32, i32, i32
  }
  func.func @transform_12(%arg0: i32, %arg1: i32) -> (i32, i32, i32) {
    %c0_i32 = arith.constant 0 : i32
    %c0_i32_0 = arith.constant 0 : i32
    %c0_i32_1 = arith.constant 0 : i32
    %c0_i32_2 = arith.constant 0 : i32
    return %c0_i32, %c0_i32_0, %c0_i32_1 : i32, i32, i32
  }
  func.func @transform_13(%arg0: i32, %arg1: i32) -> (i32, i32, i32) {
    %c0_i32 = arith.constant 0 : i32
    %c0_i32_0 = arith.constant 0 : i32
    %c0_i32_1 = arith.constant 0 : i32
    %c0_i32_2 = arith.constant 0 : i32
    return %c0_i32, %c0_i32_0, %c0_i32_1 : i32, i32, i32
  }
  func.func @transform_14(%arg0: i32, %arg1: i32) -> (i32, i32, i32) {
    %c0_i32 = arith.constant 0 : i32
    %c0_i32_0 = arith.constant 0 : i32
    %c0_i32_1 = arith.constant 0 : i32
    %c0_i32_2 = arith.constant 0 : i32
    return %c0_i32, %c0_i32_0, %c0_i32_1 : i32, i32, i32
  }
  func.func @transform_15(%arg0: i32, %arg1: i32) -> (i32, i32) {
    %c0_i32 = arith.constant 0 : i32
    %c0_i32_0 = arith.constant 0 : i32
    %c0_i32_1 = arith.constant 0 : i32
    return %c0_i32, %c0_i32_0 : i32, i32
  }
  func.func @transform_16(%arg0: i32, %arg1: i32) -> (i32, i32) {
    %c0_i32 = arith.constant 0 : i32
    %c0_i32_0 = arith.constant 0 : i32
    %c0_i32_1 = arith.constant 0 : i32
    return %c0_i32, %c0_i32_0 : i32, i32
  }
  func.func @transform_17(%arg0: i32, %arg1: i32) -> (i32, i32) {
    %c0_i32 = arith.constant 0 : i32
    %c0_i32_0 = arith.constant 0 : i32
    return %arg0, %c0_i32 : i32, i32
  }
}

module attributes {stable_mosaic.version = 11 : i64} {
  func.func @rgbd_vit_kernel(%arg0: i32, %arg1: i32, %arg2: memref<16x768xbf16, #tpu.memory_space<vmem>>, %arg3: memref<16x256xbf16, #tpu.memory_space<vmem>>, %arg4: memref<768x128xbf16, #tpu.memory_space<vmem>>, %arg5: memref<256x128xbf16, #tpu.memory_space<vmem>>, %arg6: memref<1x128xf32, #tpu.memory_space<vmem>>, %arg7: memref<4x128x128xbf16, #tpu.memory_space<vmem>>, %arg8: memref<4x1x128xf32, #tpu.memory_space<vmem>>, %arg9: memref<4x1x128xf32, #tpu.memory_space<vmem>>, %arg10: memref<4x1x128xf32, #tpu.memory_space<vmem>>, %arg11: memref<4x128x128xbf16, #tpu.memory_space<vmem>>, %arg12: memref<4x1x128xf32, #tpu.memory_space<vmem>>, %arg13: memref<4x128x128xbf16, #tpu.memory_space<vmem>>, %arg14: memref<4x1x128xf32, #tpu.memory_space<vmem>>, %arg15: memref<4x1x128xf32, #tpu.memory_space<vmem>>, %arg16: memref<4x1x128xf32, #tpu.memory_space<vmem>>, %arg17: memref<128x128xbf16, #tpu.memory_space<vmem>>, %arg18: memref<1x128xf32, #tpu.memory_space<vmem>>, %arg19: memref<16x128xf32, #tpu.memory_space<vmem>>, %arg20: memref<16x128xf32, #tpu.memory_space<vmem>>) attributes {dimension_semantics = [#tpu.dimension_semantics<parallel>, #tpu.dimension_semantics<arbitrary>], iteration_bounds = array<i64: 1, 1>, scalar_prefetch = 0 : i64, scratch_operands = 1 : i64, tpu.core_type = #tpu.core_type<tc>, window_params = [{transform_indices = @transform_0, window_bounds = array<i64: 16, 768>}, {transform_indices = @transform_1, window_bounds = array<i64: 16, 256>}, {transform_indices = @transform_2, window_bounds = array<i64: 768, 128>}, {transform_indices = @transform_3, window_bounds = array<i64: 256, 128>}, {pipeline_mode = #tpu.pipeline_mode<synchronous>, transform_indices = @transform_4, window_bounds = array<i64: 1, 128>}, {pipeline_mode = #tpu.pipeline_mode<synchronous>, transform_indices = @transform_5, window_bounds = array<i64: 4, 128, 128>}, {pipeline_mode = #tpu.pipeline_mode<synchronous>, transform_indices = @transform_6, window_bounds = array<i64: 4, 1, 128>}, {pipeline_mode = #tpu.pipeline_mode<synchronous>, transform_indices = @transform_7, window_bounds = array<i64: 4, 1, 128>}, {pipeline_mode = #tpu.pipeline_mode<synchronous>, transform_indices = @transform_8, window_bounds = array<i64: 4, 1, 128>}, {pipeline_mode = #tpu.pipeline_mode<synchronous>, transform_indices = @transform_9, window_bounds = array<i64: 4, 128, 128>}, {pipeline_mode = #tpu.pipeline_mode<synchronous>, transform_indices = @transform_10, window_bounds = array<i64: 4, 1, 128>}, {pipeline_mode = #tpu.pipeline_mode<synchronous>, transform_indices = @transform_11, window_bounds = array<i64: 4, 128, 128>}, {pipeline_mode = #tpu.pipeline_mode<synchronous>, transform_indices = @transform_12, window_bounds = array<i64: 4, 1, 128>}, {pipeline_mode = #tpu.pipeline_mode<synchronous>, transform_indices = @transform_13, window_bounds = array<i64: 4, 1, 128>}, {pipeline_mode = #tpu.pipeline_mode<synchronous>, transform_indices = @transform_14, window_bounds = array<i64: 4, 1, 128>}, {pipeline_mode = #tpu.pipeline_mode<synchronous>, transform_indices = @transform_15, window_bounds = array<i64: 128, 128>}, {pipeline_mode = #tpu.pipeline_mode<synchronous>, transform_indices = @transform_16, window_bounds = array<i64: 1, 128>}, {transform_indices = @transform_17, window_bounds = array<i64: 16, 128>}]} {
    %c0_i32 = arith.constant 0 : i32
    %0 = arith.cmpi eq, %arg1, %c0_i32 : i32
    %1 = arith.extui %0 : i1 to i32
    %c0_i32_0 = arith.constant 0 : i32
    %2 = arith.cmpi ne, %1, %c0_i32_0 : i32
    scf.if %2 {
      %c0_15 = arith.constant 0 : index
      %c0_16 = arith.constant 0 : index
      %16 = vector.load %arg6[%c0_15, %c0_16] : memref<1x128xf32, #tpu.memory_space<vmem>>, vector<1x128xf32>
      %17 = vector.shape_cast %16 : vector<1x128xf32> to vector<1x128xf32>
      %18 = vector.broadcast %17 : vector<1x128xf32> to vector<16x128xf32>
      %c0_17 = arith.constant 0 : index
      %c0_18 = arith.constant 0 : index
      %19 = vector.load %arg20[%c0_17, %c0_18] : memref<16x128xf32, #tpu.memory_space<vmem>>, vector<16x128xf32>
      tpu.vector_store %arg20[%c0_17, %c0_18], %18 {strides = array<i32>} : memref<16x128xf32, #tpu.memory_space<vmem>>, vector<16x128xf32>,
    } else {
    }
    %c0 = arith.constant 0 : index
    %c0_1 = arith.constant 0 : index
    %3 = vector.load %arg20[%c0, %c0_1] : memref<16x128xf32, #tpu.memory_space<vmem>>, vector<16x128xf32>
    %c0_2 = arith.constant 0 : index
    %c0_3 = arith.constant 0 : index
    %4 = vector.load %arg2[%c0_2, %c0_3] : memref<16x768xbf16, #tpu.memory_space<vmem>>, vector<16x768xbf16>
    %c0_4 = arith.constant 0 : index
    %c0_5 = arith.constant 0 : index
    %5 = vector.load %arg4[%c0_4, %c0_5] : memref<768x128xbf16, #tpu.memory_space<vmem>>, vector<768x128xbf16>
    %cst = arith.constant dense<0.000000e+00> : vector<16x128xf32>
    %6 = tpu.matmul %4, %5, %cst {dimension_numbers = #tpu.dot_dimension_numbers<[1], [0], [0], [1], [0, 0, 1, 1], [], []>} : vector<16x768xbf16>, vector<768x128xbf16>, vector<16x128xf32> -> vector<16x128xf32>
    %c0_6 = arith.constant 0 : index
    %c0_7 = arith.constant 0 : index
    %7 = vector.load %arg3[%c0_6, %c0_7] : memref<16x256xbf16, #tpu.memory_space<vmem>>, vector<16x256xbf16>
    %c0_8 = arith.constant 0 : index
    %c0_9 = arith.constant 0 : index
    %8 = vector.load %arg5[%c0_8, %c0_9] : memref<256x128xbf16, #tpu.memory_space<vmem>>, vector<256x128xbf16>
    %cst_10 = arith.constant dense<0.000000e+00> : vector<16x128xf32>
    %9 = tpu.matmul %7, %8, %cst_10 {dimension_numbers = #tpu.dot_dimension_numbers<[1], [0], [0], [1], [0, 0, 1, 1], [], []>} : vector<16x256xbf16>, vector<256x128xbf16>, vector<16x128xf32> -> vector<16x128xf32>
    %10 = arith.addf %6, %9 : vector<16x128xf32>
    %11 = arith.addf %3, %10 : vector<16x128xf32>
    %c0_11 = arith.constant 0 : index
    %c0_12 = arith.constant 0 : index
    %12 = vector.load %arg20[%c0_11, %c0_12] : memref<16x128xf32, #tpu.memory_space<vmem>>, vector<16x128xf32>
    tpu.vector_store %arg20[%c0_11, %c0_12], %11 {strides = array<i32>} : memref<16x128xf32, #tpu.memory_space<vmem>>, vector<16x128xf32>,
    %c0_i32_13 = arith.constant 0 : i32
    %13 = arith.cmpi eq, %arg1, %c0_i32_13 : i32
    %14 = arith.extui %13 : i1 to i32
    %c0_i32_14 = arith.constant 0 : i32
    %15 = arith.cmpi ne, %14, %c0_i32_14 : i32
    scf.if %15 {
      %c0_15 = arith.constant 0 : index
      %c0_16 = arith.constant 0 : index
      %16 = vector.load %arg20[%c0_15, %c0_16] : memref<16x128xf32, #tpu.memory_space<vmem>>, vector<16x128xf32>
      %17 = tpu.iota {dimensions = array<i32: 1>} : vector<1x128xi32>
      %c32_i32 = arith.constant 32 : i32
      %18 = vector.broadcast %c32_i32 : i32 to vector<1x128xi32>
      %19 = arith.cmpi slt, %17, %18 : vector<1x128xi32>
      %20 = arith.extui %19 : vector<1x128xi1> to vector<1x128xi32>
      %21 = arith.sitofp %20 : vector<1x128xi32> to vector<1x128xf32>
      %22 = arith.truncf %16 : vector<16x128xf32> to vector<16x128xbf16>
      %c0_17 = arith.constant 0 : index
      %c0_18 = arith.constant 0 : index
      %c0_19 = arith.constant 0 : index
      %23 = vector.load %arg7[%c0_17, %c0_18, %c0_19] : memref<4x128x128xbf16, #tpu.memory_space<vmem>>, vector<1x128x128xbf16>
      %24 = vector.shape_cast %23 : vector<1x128x128xbf16> to vector<128x128xbf16>
      %cst_20 = arith.constant dense<0.000000e+00> : vector<16x128xf32>
      %25 = tpu.matmul %22, %24, %cst_20 {dimension_numbers = #tpu.dot_dimension_numbers<[1], [0], [0], [1], [0, 0, 1, 1], [], []>} : vector<16x128xbf16>, vector<128x128xbf16>, vector<16x128xf32> -> vector<16x128xf32>
      %c0_21 = arith.constant 0 : index
      %c0_22 = arith.constant 0 : index
      %c0_23 = arith.constant 0 : index
      %26 = vector.load %arg8[%c0_21, %c0_22, %c0_23] : memref<4x1x128xf32, #tpu.memory_space<vmem>>, vector<1x1x128xf32>
      %27 = vector.shape_cast %26 : vector<1x1x128xf32> to vector<1x128xf32>
      %28 = vector.broadcast %27 : vector<1x128xf32> to vector<16x128xf32>
      %29 = arith.addf %25, %28 : vector<16x128xf32>
      %30 = arith.addf %29, %16 : vector<16x128xf32>
      %c0_24 = arith.constant 0 : index
      %c0_25 = arith.constant 0 : index
      %c0_26 = arith.constant 0 : index
      %31 = vector.load %arg9[%c0_24, %c0_25, %c0_26] : memref<4x1x128xf32, #tpu.memory_space<vmem>>, vector<1x1x128xf32>
      %32 = vector.shape_cast %31 : vector<1x1x128xf32> to vector<1x128xf32>
      %c0_27 = arith.constant 0 : index
      %c0_28 = arith.constant 0 : index
      %c0_29 = arith.constant 0 : index
      %33 = vector.load %arg10[%c0_27, %c0_28, %c0_29] : memref<4x1x128xf32, #tpu.memory_space<vmem>>, vector<1x1x128xf32>
      %34 = vector.shape_cast %33 : vector<1x1x128xf32> to vector<1x128xf32>
      %cst_30 = arith.constant dense<0.000000e+00> : vector<16xf32>
      %35 = vector.multi_reduction <add>, %30, %cst_30 [1] : vector<16x128xf32> to vector<16xf32>
      %36 = vector.shape_cast %35 : vector<16xf32> to vector<16x1xf32>
      %cst_31 = arith.constant 3.125000e-02 : f32
      %37 = vector.broadcast %cst_31 : f32 to vector<16x1xf32>
      %38 = arith.mulf %36, %37 : vector<16x1xf32>
      %39 = vector.broadcast %38 : vector<16x1xf32> to vector<16x128xf32>
      %40 = arith.subf %30, %39 : vector<16x128xf32>
      %41 = vector.broadcast %21 : vector<1x128xf32> to vector<16x128xf32>
      %42 = arith.mulf %40, %41 : vector<16x128xf32>
      %43 = arith.mulf %42, %42 : vector<16x128xf32>
      %cst_32 = arith.constant dense<0.000000e+00> : vector<16xf32>
      %44 = vector.multi_reduction <add>, %43, %cst_32 [1] : vector<16x128xf32> to vector<16xf32>
      %45 = vector.shape_cast %44 : vector<16xf32> to vector<16x1xf32>
      %cst_33 = arith.constant 3.125000e-02 : f32
      %46 = vector.broadcast %cst_33 : f32 to vector<16x1xf32>
      %47 = arith.mulf %45, %46 : vector<16x1xf32>
      %cst_34 = arith.constant 9.99999974E-6 : f32
      %48 = vector.broadcast %cst_34 : f32 to vector<16x1xf32>
      %49 = arith.addf %47, %48 : vector<16x1xf32>
      %50 = math.rsqrt %49 : vector<16x1xf32>
      %51 = vector.broadcast %50 : vector<16x1xf32> to vector<16x128xf32>
      %52 = arith.mulf %42, %51 : vector<16x128xf32>
      %53 = vector.broadcast %32 : vector<1x128xf32> to vector<16x128xf32>
      %54 = arith.mulf %52, %53 : vector<16x128xf32>
      %55 = vector.broadcast %34 : vector<1x128xf32> to vector<16x128xf32>
      %56 = arith.addf %54, %55 : vector<16x128xf32>
      %57 = arith.truncf %56 : vector<16x128xf32> to vector<16x128xbf16>
      %c0_35 = arith.constant 0 : index
      %c0_36 = arith.constant 0 : index
      %c0_37 = arith.constant 0 : index
      %58 = vector.load %arg11[%c0_35, %c0_36, %c0_37] : memref<4x128x128xbf16, #tpu.memory_space<vmem>>, vector<1x128x128xbf16>
      %59 = vector.shape_cast %58 : vector<1x128x128xbf16> to vector<128x128xbf16>
      %cst_38 = arith.constant dense<0.000000e+00> : vector<16x128xf32>
      %60 = tpu.matmul %57, %59, %cst_38 {dimension_numbers = #tpu.dot_dimension_numbers<[1], [0], [0], [1], [0, 0, 1, 1], [], []>} : vector<16x128xbf16>, vector<128x128xbf16>, vector<16x128xf32> -> vector<16x128xf32>
      %c0_39 = arith.constant 0 : index
      %c0_40 = arith.constant 0 : index
      %c0_41 = arith.constant 0 : index
      %61 = vector.load %arg12[%c0_39, %c0_40, %c0_41] : memref<4x1x128xf32, #tpu.memory_space<vmem>>, vector<1x1x128xf32>
      %62 = vector.shape_cast %61 : vector<1x1x128xf32> to vector<1x128xf32>
      %63 = vector.broadcast %62 : vector<1x128xf32> to vector<16x128xf32>
      %64 = arith.addf %60, %63 : vector<16x128xf32>
      %cst_42 = arith.constant 0.000000e+00 : f32
      %65 = vector.broadcast %cst_42 : f32 to vector<16x128xf32>
      %66 = arith.maximumf %64, %65 : vector<16x128xf32>
      %67 = arith.truncf %66 : vector<16x128xf32> to vector<16x128xbf16>
      %c0_43 = arith.constant 0 : index
      %c0_44 = arith.constant 0 : index
      %c0_45 = arith.constant 0 : index
      %68 = vector.load %arg13[%c0_43, %c0_44, %c0_45] : memref<4x128x128xbf16, #tpu.memory_space<vmem>>, vector<1x128x128xbf16>
      %69 = vector.shape_cast %68 : vector<1x128x128xbf16> to vector<128x128xbf16>
      %cst_46 = arith.constant dense<0.000000e+00> : vector<16x128xf32>
      %70 = tpu.matmul %67, %69, %cst_46 {dimension_numbers = #tpu.dot_dimension_numbers<[1], [0], [0], [1], [0, 0, 1, 1], [], []>} : vector<16x128xbf16>, vector<128x128xbf16>, vector<16x128xf32> -> vector<16x128xf32>
      %c0_47 = arith.constant 0 : index
      %c0_48 = arith.constant 0 : index
      %c0_49 = arith.constant 0 : index
      %71 = vector.load %arg14[%c0_47, %c0_48, %c0_49] : memref<4x1x128xf32, #tpu.memory_space<vmem>>, vector<1x1x128xf32>
      %72 = vector.shape_cast %71 : vector<1x1x128xf32> to vector<1x128xf32>
      %73 = vector.broadcast %72 : vector<1x128xf32> to vector<16x128xf32>
      %74 = arith.addf %70, %73 : vector<16x128xf32>
      %75 = arith.addf %74, %56 : vector<16x128xf32>
      %c0_50 = arith.constant 0 : index
      %c0_51 = arith.constant 0 : index
      %c0_52 = arith.constant 0 : index
      %76 = vector.load %arg15[%c0_50, %c0_51, %c0_52] : memref<4x1x128xf32, #tpu.memory_space<vmem>>, vector<1x1x128xf32>
      %77 = vector.shape_cast %76 : vector<1x1x128xf32> to vector<1x128xf32>
      %c0_53 = arith.constant 0 : index
      %c0_54 = arith.constant 0 : index
      %c0_55 = arith.constant 0 : index
      %78 = vector.load %arg16[%c0_53, %c0_54, %c0_55] : memref<4x1x128xf32, #tpu.memory_space<vmem>>, vector<1x1x128xf32>
      %79 = vector.shape_cast %78 : vector<1x1x128xf32> to vector<1x128xf32>
      %cst_56 = arith.constant dense<0.000000e+00> : vector<16xf32>
      %80 = vector.multi_reduction <add>, %75, %cst_56 [1] : vector<16x128xf32> to vector<16xf32>
      %81 = vector.shape_cast %80 : vector<16xf32> to vector<16x1xf32>
      %cst_57 = arith.constant 3.125000e-02 : f32
      %82 = vector.broadcast %cst_57 : f32 to vector<16x1xf32>
      %83 = arith.mulf %81, %82 : vector<16x1xf32>
      %84 = vector.broadcast %83 : vector<16x1xf32> to vector<16x128xf32>
      %85 = arith.subf %75, %84 : vector<16x128xf32>
      %86 = vector.broadcast %21 : vector<1x128xf32> to vector<16x128xf32>
      %87 = arith.mulf %85, %86 : vector<16x128xf32>
      %88 = arith.mulf %87, %87 : vector<16x128xf32>
      %cst_58 = arith.constant dense<0.000000e+00> : vector<16xf32>
      %89 = vector.multi_reduction <add>, %88, %cst_58 [1] : vector<16x128xf32> to vector<16xf32>
      %90 = vector.shape_cast %89 : vector<16xf32> to vector<16x1xf32>
      %cst_59 = arith.constant 3.125000e-02 : f32
      %91 = vector.broadcast %cst_59 : f32 to vector<16x1xf32>
      %92 = arith.mulf %90, %91 : vector<16x1xf32>
      %cst_60 = arith.constant 9.99999974E-6 : f32
      %93 = vector.broadcast %cst_60 : f32 to vector<16x1xf32>
      %94 = arith.addf %92, %93 : vector<16x1xf32>
      %95 = math.rsqrt %94 : vector<16x1xf32>
      %96 = vector.broadcast %95 : vector<16x1xf32> to vector<16x128xf32>
      %97 = arith.mulf %87, %96 : vector<16x128xf32>
      %98 = vector.broadcast %77 : vector<1x128xf32> to vector<16x128xf32>
      %99 = arith.mulf %97, %98 : vector<16x128xf32>
      %100 = vector.broadcast %79 : vector<1x128xf32> to vector<16x128xf32>
      %101 = arith.addf %99, %100 : vector<16x128xf32>
      %102 = arith.truncf %101 : vector<16x128xf32> to vector<16x128xbf16>
      %c1 = arith.constant 1 : index
      %c0_61 = arith.constant 0 : index
      %c0_62 = arith.constant 0 : index
      %103 = vector.load %arg7[%c1, %c0_61, %c0_62] : memref<4x128x128xbf16, #tpu.memory_space<vmem>>, vector<1x128x128xbf16>
      %104 = vector.shape_cast %103 : vector<1x128x128xbf16> to vector<128x128xbf16>
      %cst_63 = arith.constant dense<0.000000e+00> : vector<16x128xf32>
      %105 = tpu.matmul %102, %104, %cst_63 {dimension_numbers = #tpu.dot_dimension_numbers<[1], [0], [0], [1], [0, 0, 1, 1], [], []>} : vector<16x128xbf16>, vector<128x128xbf16>, vector<16x128xf32> -> vector<16x128xf32>
      %c1_64 = arith.constant 1 : index
      %c0_65 = arith.constant 0 : index
      %c0_66 = arith.constant 0 : index
      %106 = vector.load %arg8[%c1_64, %c0_65, %c0_66] : memref<4x1x128xf32, #tpu.memory_space<vmem>>, vector<1x1x128xf32>
      %107 = vector.shape_cast %106 : vector<1x1x128xf32> to vector<1x128xf32>
      %108 = vector.broadcast %107 : vector<1x128xf32> to vector<16x128xf32>
      %109 = arith.addf %105, %108 : vector<16x128xf32>
      %110 = arith.addf %109, %101 : vector<16x128xf32>
      %c1_67 = arith.constant 1 : index
      %c0_68 = arith.constant 0 : index
      %c0_69 = arith.constant 0 : index
      %111 = vector.load %arg9[%c1_67, %c0_68, %c0_69] : memref<4x1x128xf32, #tpu.memory_space<vmem>>, vector<1x1x128xf32>
      %112 = vector.shape_cast %111 : vector<1x1x128xf32> to vector<1x128xf32>
      %c1_70 = arith.constant 1 : index
      %c0_71 = arith.constant 0 : index
      %c0_72 = arith.constant 0 : index
      %113 = vector.load %arg10[%c1_70, %c0_71, %c0_72] : memref<4x1x128xf32, #tpu.memory_space<vmem>>, vector<1x1x128xf32>
      %114 = vector.shape_cast %113 : vector<1x1x128xf32> to vector<1x128xf32>
      %cst_73 = arith.constant dense<0.000000e+00> : vector<16xf32>
      %115 = vector.multi_reduction <add>, %110, %cst_73 [1] : vector<16x128xf32> to vector<16xf32>
      %116 = vector.shape_cast %115 : vector<16xf32> to vector<16x1xf32>
      %cst_74 = arith.constant 3.125000e-02 : f32
      %117 = vector.broadcast %cst_74 : f32 to vector<16x1xf32>
      %118 = arith.mulf %116, %117 : vector<16x1xf32>
      %119 = vector.broadcast %118 : vector<16x1xf32> to vector<16x128xf32>
      %120 = arith.subf %110, %119 : vector<16x128xf32>
      %121 = vector.broadcast %21 : vector<1x128xf32> to vector<16x128xf32>
      %122 = arith.mulf %120, %121 : vector<16x128xf32>
      %123 = arith.mulf %122, %122 : vector<16x128xf32>
      %cst_75 = arith.constant dense<0.000000e+00> : vector<16xf32>
      %124 = vector.multi_reduction <add>, %123, %cst_75 [1] : vector<16x128xf32> to vector<16xf32>
      %125 = vector.shape_cast %124 : vector<16xf32> to vector<16x1xf32>
      %cst_76 = arith.constant 3.125000e-02 : f32
      %126 = vector.broadcast %cst_76 : f32 to vector<16x1xf32>
      %127 = arith.mulf %125, %126 : vector<16x1xf32>
      %cst_77 = arith.constant 9.99999974E-6 : f32
      %128 = vector.broadcast %cst_77 : f32 to vector<16x1xf32>
      %129 = arith.addf %127, %128 : vector<16x1xf32>
      %130 = math.rsqrt %129 : vector<16x1xf32>
      %131 = vector.broadcast %130 : vector<16x1xf32> to vector<16x128xf32>
      %132 = arith.mulf %122, %131 : vector<16x128xf32>
      %133 = vector.broadcast %112 : vector<1x128xf32> to vector<16x128xf32>
      %134 = arith.mulf %132, %133 : vector<16x128xf32>
      %135 = vector.broadcast %114 : vector<1x128xf32> to vector<16x128xf32>
      %136 = arith.addf %134, %135 : vector<16x128xf32>
      %137 = arith.truncf %136 : vector<16x128xf32> to vector<16x128xbf16>
      %c1_78 = arith.constant 1 : index
      %c0_79 = arith.constant 0 : index
      %c0_80 = arith.constant 0 : index
      %138 = vector.load %arg11[%c1_78, %c0_79, %c0_80] : memref<4x128x128xbf16, #tpu.memory_space<vmem>>, vector<1x128x128xbf16>
      %139 = vector.shape_cast %138 : vector<1x128x128xbf16> to vector<128x128xbf16>
      %cst_81 = arith.constant dense<0.000000e+00> : vector<16x128xf32>
      %140 = tpu.matmul %137, %139, %cst_81 {dimension_numbers = #tpu.dot_dimension_numbers<[1], [0], [0], [1], [0, 0, 1, 1], [], []>} : vector<16x128xbf16>, vector<128x128xbf16>, vector<16x128xf32> -> vector<16x128xf32>
      %c1_82 = arith.constant 1 : index
      %c0_83 = arith.constant 0 : index
      %c0_84 = arith.constant 0 : index
      %141 = vector.load %arg12[%c1_82, %c0_83, %c0_84] : memref<4x1x128xf32, #tpu.memory_space<vmem>>, vector<1x1x128xf32>
      %142 = vector.shape_cast %141 : vector<1x1x128xf32> to vector<1x128xf32>
      %143 = vector.broadcast %142 : vector<1x128xf32> to vector<16x128xf32>
      %144 = arith.addf %140, %143 : vector<16x128xf32>
      %cst_85 = arith.constant 0.000000e+00 : f32
      %145 = vector.broadcast %cst_85 : f32 to vector<16x128xf32>
      %146 = arith.maximumf %144, %145 : vector<16x128xf32>
      %147 = arith.truncf %146 : vector<16x128xf32> to vector<16x128xbf16>
      %c1_86 = arith.constant 1 : index
      %c0_87 = arith.constant 0 : index
      %c0_88 = arith.constant 0 : index
      %148 = vector.load %arg13[%c1_86, %c0_87, %c0_88] : memref<4x128x128xbf16, #tpu.memory_space<vmem>>, vector<1x128x128xbf16>
      %149 = vector.shape_cast %148 : vector<1x128x128xbf16> to vector<128x128xbf16>
      %cst_89 = arith.constant dense<0.000000e+00> : vector<16x128xf32>
      %150 = tpu.matmul %147, %149, %cst_89 {dimension_numbers = #tpu.dot_dimension_numbers<[1], [0], [0], [1], [0, 0, 1, 1], [], []>} : vector<16x128xbf16>, vector<128x128xbf16>, vector<16x128xf32> -> vector<16x128xf32>
      %c1_90 = arith.constant 1 : index
      %c0_91 = arith.constant 0 : index
      %c0_92 = arith.constant 0 : index
      %151 = vector.load %arg14[%c1_90, %c0_91, %c0_92] : memref<4x1x128xf32, #tpu.memory_space<vmem>>, vector<1x1x128xf32>
      %152 = vector.shape_cast %151 : vector<1x1x128xf32> to vector<1x128xf32>
      %153 = vector.broadcast %152 : vector<1x128xf32> to vector<16x128xf32>
      %154 = arith.addf %150, %153 : vector<16x128xf32>
      %155 = arith.addf %154, %136 : vector<16x128xf32>
      %c1_93 = arith.constant 1 : index
      %c0_94 = arith.constant 0 : index
      %c0_95 = arith.constant 0 : index
      %156 = vector.load %arg15[%c1_93, %c0_94, %c0_95] : memref<4x1x128xf32, #tpu.memory_space<vmem>>, vector<1x1x128xf32>
      %157 = vector.shape_cast %156 : vector<1x1x128xf32> to vector<1x128xf32>
      %c1_96 = arith.constant 1 : index
      %c0_97 = arith.constant 0 : index
      %c0_98 = arith.constant 0 : index
      %158 = vector.load %arg16[%c1_96, %c0_97, %c0_98] : memref<4x1x128xf32, #tpu.memory_space<vmem>>, vector<1x1x128xf32>
      %159 = vector.shape_cast %158 : vector<1x1x128xf32> to vector<1x128xf32>
      %cst_99 = arith.constant dense<0.000000e+00> : vector<16xf32>
      %160 = vector.multi_reduction <add>, %155, %cst_99 [1] : vector<16x128xf32> to vector<16xf32>
      %161 = vector.shape_cast %160 : vector<16xf32> to vector<16x1xf32>
      %cst_100 = arith.constant 3.125000e-02 : f32
      %162 = vector.broadcast %cst_100 : f32 to vector<16x1xf32>
      %163 = arith.mulf %161, %162 : vector<16x1xf32>
      %164 = vector.broadcast %163 : vector<16x1xf32> to vector<16x128xf32>
      %165 = arith.subf %155, %164 : vector<16x128xf32>
      %166 = vector.broadcast %21 : vector<1x128xf32> to vector<16x128xf32>
      %167 = arith.mulf %165, %166 : vector<16x128xf32>
      %168 = arith.mulf %167, %167 : vector<16x128xf32>
      %cst_101 = arith.constant dense<0.000000e+00> : vector<16xf32>
      %169 = vector.multi_reduction <add>, %168, %cst_101 [1] : vector<16x128xf32> to vector<16xf32>
      %170 = vector.shape_cast %169 : vector<16xf32> to vector<16x1xf32>
      %cst_102 = arith.constant 3.125000e-02 : f32
      %171 = vector.broadcast %cst_102 : f32 to vector<16x1xf32>
      %172 = arith.mulf %170, %171 : vector<16x1xf32>
      %cst_103 = arith.constant 9.99999974E-6 : f32
      %173 = vector.broadcast %cst_103 : f32 to vector<16x1xf32>
      %174 = arith.addf %172, %173 : vector<16x1xf32>
      %175 = math.rsqrt %174 : vector<16x1xf32>
      %176 = vector.broadcast %175 : vector<16x1xf32> to vector<16x128xf32>
      %177 = arith.mulf %167, %176 : vector<16x128xf32>
      %178 = vector.broadcast %157 : vector<1x128xf32> to vector<16x128xf32>
      %179 = arith.mulf %177, %178 : vector<16x128xf32>
      %180 = vector.broadcast %159 : vector<1x128xf32> to vector<16x128xf32>
      %181 = arith.addf %179, %180 : vector<16x128xf32>
      %182 = arith.truncf %181 : vector<16x128xf32> to vector<16x128xbf16>
      %c2 = arith.constant 2 : index
      %c0_104 = arith.constant 0 : index
      %c0_105 = arith.constant 0 : index
      %183 = vector.load %arg7[%c2, %c0_104, %c0_105] : memref<4x128x128xbf16, #tpu.memory_space<vmem>>, vector<1x128x128xbf16>
      %184 = vector.shape_cast %183 : vector<1x128x128xbf16> to vector<128x128xbf16>
      %cst_106 = arith.constant dense<0.000000e+00> : vector<16x128xf32>
      %185 = tpu.matmul %182, %184, %cst_106 {dimension_numbers = #tpu.dot_dimension_numbers<[1], [0], [0], [1], [0, 0, 1, 1], [], []>} : vector<16x128xbf16>, vector<128x128xbf16>, vector<16x128xf32> -> vector<16x128xf32>
      %c2_107 = arith.constant 2 : index
      %c0_108 = arith.constant 0 : index
      %c0_109 = arith.constant 0 : index
      %186 = vector.load %arg8[%c2_107, %c0_108, %c0_109] : memref<4x1x128xf32, #tpu.memory_space<vmem>>, vector<1x1x128xf32>
      %187 = vector.shape_cast %186 : vector<1x1x128xf32> to vector<1x128xf32>
      %188 = vector.broadcast %187 : vector<1x128xf32> to vector<16x128xf32>
      %189 = arith.addf %185, %188 : vector<16x128xf32>
      %190 = arith.addf %189, %181 : vector<16x128xf32>
      %c2_110 = arith.constant 2 : index
      %c0_111 = arith.constant 0 : index
      %c0_112 = arith.constant 0 : index
      %191 = vector.load %arg9[%c2_110, %c0_111, %c0_112] : memref<4x1x128xf32, #tpu.memory_space<vmem>>, vector<1x1x128xf32>
      %192 = vector.shape_cast %191 : vector<1x1x128xf32> to vector<1x128xf32>
      %c2_113 = arith.constant 2 : index
      %c0_114 = arith.constant 0 : index
      %c0_115 = arith.constant 0 : index
      %193 = vector.load %arg10[%c2_113, %c0_114, %c0_115] : memref<4x1x128xf32, #tpu.memory_space<vmem>>, vector<1x1x128xf32>
      %194 = vector.shape_cast %193 : vector<1x1x128xf32> to vector<1x128xf32>
      %cst_116 = arith.constant dense<0.000000e+00> : vector<16xf32>
      %195 = vector.multi_reduction <add>, %190, %cst_116 [1] : vector<16x128xf32> to vector<16xf32>
      %196 = vector.shape_cast %195 : vector<16xf32> to vector<16x1xf32>
      %cst_117 = arith.constant 3.125000e-02 : f32
      %197 = vector.broadcast %cst_117 : f32 to vector<16x1xf32>
      %198 = arith.mulf %196, %197 : vector<16x1xf32>
      %199 = vector.broadcast %198 : vector<16x1xf32> to vector<16x128xf32>
      %200 = arith.subf %190, %199 : vector<16x128xf32>
      %201 = vector.broadcast %21 : vector<1x128xf32> to vector<16x128xf32>
      %202 = arith.mulf %200, %201 : vector<16x128xf32>
      %203 = arith.mulf %202, %202 : vector<16x128xf32>
      %cst_118 = arith.constant dense<0.000000e+00> : vector<16xf32>
      %204 = vector.multi_reduction <add>, %203, %cst_118 [1] : vector<16x128xf32> to vector<16xf32>
      %205 = vector.shape_cast %204 : vector<16xf32> to vector<16x1xf32>
      %cst_119 = arith.constant 3.125000e-02 : f32
      %206 = vector.broadcast %cst_119 : f32 to vector<16x1xf32>
      %207 = arith.mulf %205, %206 : vector<16x1xf32>
      %cst_120 = arith.constant 9.99999974E-6 : f32
      %208 = vector.broadcast %cst_120 : f32 to vector<16x1xf32>
      %209 = arith.addf %207, %208 : vector<16x1xf32>
      %210 = math.rsqrt %209 : vector<16x1xf32>
      %211 = vector.broadcast %210 : vector<16x1xf32> to vector<16x128xf32>
      %212 = arith.mulf %202, %211 : vector<16x128xf32>
      %213 = vector.broadcast %192 : vector<1x128xf32> to vector<16x128xf32>
      %214 = arith.mulf %212, %213 : vector<16x128xf32>
      %215 = vector.broadcast %194 : vector<1x128xf32> to vector<16x128xf32>
      %216 = arith.addf %214, %215 : vector<16x128xf32>
      %217 = arith.truncf %216 : vector<16x128xf32> to vector<16x128xbf16>
      %c2_121 = arith.constant 2 : index
      %c0_122 = arith.constant 0 : index
      %c0_123 = arith.constant 0 : index
      %218 = vector.load %arg11[%c2_121, %c0_122, %c0_123] : memref<4x128x128xbf16, #tpu.memory_space<vmem>>, vector<1x128x128xbf16>
      %219 = vector.shape_cast %218 : vector<1x128x128xbf16> to vector<128x128xbf16>
      %cst_124 = arith.constant dense<0.000000e+00> : vector<16x128xf32>
      %220 = tpu.matmul %217, %219, %cst_124 {dimension_numbers = #tpu.dot_dimension_numbers<[1], [0], [0], [1], [0, 0, 1, 1], [], []>} : vector<16x128xbf16>, vector<128x128xbf16>, vector<16x128xf32> -> vector<16x128xf32>
      %c2_125 = arith.constant 2 : index
      %c0_126 = arith.constant 0 : index
      %c0_127 = arith.constant 0 : index
      %221 = vector.load %arg12[%c2_125, %c0_126, %c0_127] : memref<4x1x128xf32, #tpu.memory_space<vmem>>, vector<1x1x128xf32>
      %222 = vector.shape_cast %221 : vector<1x1x128xf32> to vector<1x128xf32>
      %223 = vector.broadcast %222 : vector<1x128xf32> to vector<16x128xf32>
      %224 = arith.addf %220, %223 : vector<16x128xf32>
      %cst_128 = arith.constant 0.000000e+00 : f32
      %225 = vector.broadcast %cst_128 : f32 to vector<16x128xf32>
      %226 = arith.maximumf %224, %225 : vector<16x128xf32>
      %227 = arith.truncf %226 : vector<16x128xf32> to vector<16x128xbf16>
      %c2_129 = arith.constant 2 : index
      %c0_130 = arith.constant 0 : index
      %c0_131 = arith.constant 0 : index
      %228 = vector.load %arg13[%c2_129, %c0_130, %c0_131] : memref<4x128x128xbf16, #tpu.memory_space<vmem>>, vector<1x128x128xbf16>
      %229 = vector.shape_cast %228 : vector<1x128x128xbf16> to vector<128x128xbf16>
      %cst_132 = arith.constant dense<0.000000e+00> : vector<16x128xf32>
      %230 = tpu.matmul %227, %229, %cst_132 {dimension_numbers = #tpu.dot_dimension_numbers<[1], [0], [0], [1], [0, 0, 1, 1], [], []>} : vector<16x128xbf16>, vector<128x128xbf16>, vector<16x128xf32> -> vector<16x128xf32>
      %c2_133 = arith.constant 2 : index
      %c0_134 = arith.constant 0 : index
      %c0_135 = arith.constant 0 : index
      %231 = vector.load %arg14[%c2_133, %c0_134, %c0_135] : memref<4x1x128xf32, #tpu.memory_space<vmem>>, vector<1x1x128xf32>
      %232 = vector.shape_cast %231 : vector<1x1x128xf32> to vector<1x128xf32>
      %233 = vector.broadcast %232 : vector<1x128xf32> to vector<16x128xf32>
      %234 = arith.addf %230, %233 : vector<16x128xf32>
      %235 = arith.addf %234, %216 : vector<16x128xf32>
      %c2_136 = arith.constant 2 : index
      %c0_137 = arith.constant 0 : index
      %c0_138 = arith.constant 0 : index
      %236 = vector.load %arg15[%c2_136, %c0_137, %c0_138] : memref<4x1x128xf32, #tpu.memory_space<vmem>>, vector<1x1x128xf32>
      %237 = vector.shape_cast %236 : vector<1x1x128xf32> to vector<1x128xf32>
      %c2_139 = arith.constant 2 : index
      %c0_140 = arith.constant 0 : index
      %c0_141 = arith.constant 0 : index
      %238 = vector.load %arg16[%c2_139, %c0_140, %c0_141] : memref<4x1x128xf32, #tpu.memory_space<vmem>>, vector<1x1x128xf32>
      %239 = vector.shape_cast %238 : vector<1x1x128xf32> to vector<1x128xf32>
      %cst_142 = arith.constant dense<0.000000e+00> : vector<16xf32>
      %240 = vector.multi_reduction <add>, %235, %cst_142 [1] : vector<16x128xf32> to vector<16xf32>
      %241 = vector.shape_cast %240 : vector<16xf32> to vector<16x1xf32>
      %cst_143 = arith.constant 3.125000e-02 : f32
      %242 = vector.broadcast %cst_143 : f32 to vector<16x1xf32>
      %243 = arith.mulf %241, %242 : vector<16x1xf32>
      %244 = vector.broadcast %243 : vector<16x1xf32> to vector<16x128xf32>
      %245 = arith.subf %235, %244 : vector<16x128xf32>
      %246 = vector.broadcast %21 : vector<1x128xf32> to vector<16x128xf32>
      %247 = arith.mulf %245, %246 : vector<16x128xf32>
      %248 = arith.mulf %247, %247 : vector<16x128xf32>
      %cst_144 = arith.constant dense<0.000000e+00> : vector<16xf32>
      %249 = vector.multi_reduction <add>, %248, %cst_144 [1] : vector<16x128xf32> to vector<16xf32>
      %250 = vector.shape_cast %249 : vector<16xf32> to vector<16x1xf32>
      %cst_145 = arith.constant 3.125000e-02 : f32
      %251 = vector.broadcast %cst_145 : f32 to vector<16x1xf32>
      %252 = arith.mulf %250, %251 : vector<16x1xf32>
      %cst_146 = arith.constant 9.99999974E-6 : f32
      %253 = vector.broadcast %cst_146 : f32 to vector<16x1xf32>
      %254 = arith.addf %252, %253 : vector<16x1xf32>
      %255 = math.rsqrt %254 : vector<16x1xf32>
      %256 = vector.broadcast %255 : vector<16x1xf32> to vector<16x128xf32>
      %257 = arith.mulf %247, %256 : vector<16x128xf32>
      %258 = vector.broadcast %237 : vector<1x128xf32> to vector<16x128xf32>
      %259 = arith.mulf %257, %258 : vector<16x128xf32>
      %260 = vector.broadcast %239 : vector<1x128xf32> to vector<16x128xf32>
      %261 = arith.addf %259, %260 : vector<16x128xf32>
      %262 = arith.truncf %261 : vector<16x128xf32> to vector<16x128xbf16>
      %c3 = arith.constant 3 : index
      %c0_147 = arith.constant 0 : index
      %c0_148 = arith.constant 0 : index
      %263 = vector.load %arg7[%c3, %c0_147, %c0_148] : memref<4x128x128xbf16, #tpu.memory_space<vmem>>, vector<1x128x128xbf16>
      %264 = vector.shape_cast %263 : vector<1x128x128xbf16> to vector<128x128xbf16>
      %cst_149 = arith.constant dense<0.000000e+00> : vector<16x128xf32>
      %265 = tpu.matmul %262, %264, %cst_149 {dimension_numbers = #tpu.dot_dimension_numbers<[1], [0], [0], [1], [0, 0, 1, 1], [], []>} : vector<16x128xbf16>, vector<128x128xbf16>, vector<16x128xf32> -> vector<16x128xf32>
      %c3_150 = arith.constant 3 : index
      %c0_151 = arith.constant 0 : index
      %c0_152 = arith.constant 0 : index
      %266 = vector.load %arg8[%c3_150, %c0_151, %c0_152] : memref<4x1x128xf32, #tpu.memory_space<vmem>>, vector<1x1x128xf32>
      %267 = vector.shape_cast %266 : vector<1x1x128xf32> to vector<1x128xf32>
      %268 = vector.broadcast %267 : vector<1x128xf32> to vector<16x128xf32>
      %269 = arith.addf %265, %268 : vector<16x128xf32>
      %270 = arith.addf %269, %261 : vector<16x128xf32>
      %c3_153 = arith.constant 3 : index
      %c0_154 = arith.constant 0 : index
      %c0_155 = arith.constant 0 : index
      %271 = vector.load %arg9[%c3_153, %c0_154, %c0_155] : memref<4x1x128xf32, #tpu.memory_space<vmem>>, vector<1x1x128xf32>
      %272 = vector.shape_cast %271 : vector<1x1x128xf32> to vector<1x128xf32>
      %c3_156 = arith.constant 3 : index
      %c0_157 = arith.constant 0 : index
      %c0_158 = arith.constant 0 : index
      %273 = vector.load %arg10[%c3_156, %c0_157, %c0_158] : memref<4x1x128xf32, #tpu.memory_space<vmem>>, vector<1x1x128xf32>
      %274 = vector.shape_cast %273 : vector<1x1x128xf32> to vector<1x128xf32>
      %cst_159 = arith.constant dense<0.000000e+00> : vector<16xf32>
      %275 = vector.multi_reduction <add>, %270, %cst_159 [1] : vector<16x128xf32> to vector<16xf32>
      %276 = vector.shape_cast %275 : vector<16xf32> to vector<16x1xf32>
      %cst_160 = arith.constant 3.125000e-02 : f32
      %277 = vector.broadcast %cst_160 : f32 to vector<16x1xf32>
      %278 = arith.mulf %276, %277 : vector<16x1xf32>
      %279 = vector.broadcast %278 : vector<16x1xf32> to vector<16x128xf32>
      %280 = arith.subf %270, %279 : vector<16x128xf32>
      %281 = vector.broadcast %21 : vector<1x128xf32> to vector<16x128xf32>
      %282 = arith.mulf %280, %281 : vector<16x128xf32>
      %283 = arith.mulf %282, %282 : vector<16x128xf32>
      %cst_161 = arith.constant dense<0.000000e+00> : vector<16xf32>
      %284 = vector.multi_reduction <add>, %283, %cst_161 [1] : vector<16x128xf32> to vector<16xf32>
      %285 = vector.shape_cast %284 : vector<16xf32> to vector<16x1xf32>
      %cst_162 = arith.constant 3.125000e-02 : f32
      %286 = vector.broadcast %cst_162 : f32 to vector<16x1xf32>
      %287 = arith.mulf %285, %286 : vector<16x1xf32>
      %cst_163 = arith.constant 9.99999974E-6 : f32
      %288 = vector.broadcast %cst_163 : f32 to vector<16x1xf32>
      %289 = arith.addf %287, %288 : vector<16x1xf32>
      %290 = math.rsqrt %289 : vector<16x1xf32>
      %291 = vector.broadcast %290 : vector<16x1xf32> to vector<16x128xf32>
      %292 = arith.mulf %282, %291 : vector<16x128xf32>
      %293 = vector.broadcast %272 : vector<1x128xf32> to vector<16x128xf32>
      %294 = arith.mulf %292, %293 : vector<16x128xf32>
      %295 = vector.broadcast %274 : vector<1x128xf32> to vector<16x128xf32>
      %296 = arith.addf %294, %295 : vector<16x128xf32>
      %297 = arith.truncf %296 : vector<16x128xf32> to vector<16x128xbf16>
      %c3_164 = arith.constant 3 : index
      %c0_165 = arith.constant 0 : index
      %c0_166 = arith.constant 0 : index
      %298 = vector.load %arg11[%c3_164, %c0_165, %c0_166] : memref<4x128x128xbf16, #tpu.memory_space<vmem>>, vector<1x128x128xbf16>
      %299 = vector.shape_cast %298 : vector<1x128x128xbf16> to vector<128x128xbf16>
      %cst_167 = arith.constant dense<0.000000e+00> : vector<16x128xf32>
      %300 = tpu.matmul %297, %299, %cst_167 {dimension_numbers = #tpu.dot_dimension_numbers<[1], [0], [0], [1], [0, 0, 1, 1], [], []>} : vector<16x128xbf16>, vector<128x128xbf16>, vector<16x128xf32> -> vector<16x128xf32>
      %c3_168 = arith.constant 3 : index
      %c0_169 = arith.constant 0 : index
      %c0_170 = arith.constant 0 : index
      %301 = vector.load %arg12[%c3_168, %c0_169, %c0_170] : memref<4x1x128xf32, #tpu.memory_space<vmem>>, vector<1x1x128xf32>
      %302 = vector.shape_cast %301 : vector<1x1x128xf32> to vector<1x128xf32>
      %303 = vector.broadcast %302 : vector<1x128xf32> to vector<16x128xf32>
      %304 = arith.addf %300, %303 : vector<16x128xf32>
      %cst_171 = arith.constant 0.000000e+00 : f32
      %305 = vector.broadcast %cst_171 : f32 to vector<16x128xf32>
      %306 = arith.maximumf %304, %305 : vector<16x128xf32>
      %307 = arith.truncf %306 : vector<16x128xf32> to vector<16x128xbf16>
      %c3_172 = arith.constant 3 : index
      %c0_173 = arith.constant 0 : index
      %c0_174 = arith.constant 0 : index
      %308 = vector.load %arg13[%c3_172, %c0_173, %c0_174] : memref<4x128x128xbf16, #tpu.memory_space<vmem>>, vector<1x128x128xbf16>
      %309 = vector.shape_cast %308 : vector<1x128x128xbf16> to vector<128x128xbf16>
      %cst_175 = arith.constant dense<0.000000e+00> : vector<16x128xf32>
      %310 = tpu.matmul %307, %309, %cst_175 {dimension_numbers = #tpu.dot_dimension_numbers<[1], [0], [0], [1], [0, 0, 1, 1], [], []>} : vector<16x128xbf16>, vector<128x128xbf16>, vector<16x128xf32> -> vector<16x128xf32>
      %c3_176 = arith.constant 3 : index
      %c0_177 = arith.constant 0 : index
      %c0_178 = arith.constant 0 : index
      %311 = vector.load %arg14[%c3_176, %c0_177, %c0_178] : memref<4x1x128xf32, #tpu.memory_space<vmem>>, vector<1x1x128xf32>
      %312 = vector.shape_cast %311 : vector<1x1x128xf32> to vector<1x128xf32>
      %313 = vector.broadcast %312 : vector<1x128xf32> to vector<16x128xf32>
      %314 = arith.addf %310, %313 : vector<16x128xf32>
      %315 = arith.addf %314, %296 : vector<16x128xf32>
      %c3_179 = arith.constant 3 : index
      %c0_180 = arith.constant 0 : index
      %c0_181 = arith.constant 0 : index
      %316 = vector.load %arg15[%c3_179, %c0_180, %c0_181] : memref<4x1x128xf32, #tpu.memory_space<vmem>>, vector<1x1x128xf32>
      %317 = vector.shape_cast %316 : vector<1x1x128xf32> to vector<1x128xf32>
      %c3_182 = arith.constant 3 : index
      %c0_183 = arith.constant 0 : index
      %c0_184 = arith.constant 0 : index
      %318 = vector.load %arg16[%c3_182, %c0_183, %c0_184] : memref<4x1x128xf32, #tpu.memory_space<vmem>>, vector<1x1x128xf32>
      %319 = vector.shape_cast %318 : vector<1x1x128xf32> to vector<1x128xf32>
      %cst_185 = arith.constant dense<0.000000e+00> : vector<16xf32>
      %320 = vector.multi_reduction <add>, %315, %cst_185 [1] : vector<16x128xf32> to vector<16xf32>
      %321 = vector.shape_cast %320 : vector<16xf32> to vector<16x1xf32>
      %cst_186 = arith.constant 3.125000e-02 : f32
      %322 = vector.broadcast %cst_186 : f32 to vector<16x1xf32>
      %323 = arith.mulf %321, %322 : vector<16x1xf32>
      %324 = vector.broadcast %323 : vector<16x1xf32> to vector<16x128xf32>
      %325 = arith.subf %315, %324 : vector<16x128xf32>
      %326 = vector.broadcast %21 : vector<1x128xf32> to vector<16x128xf32>
      %327 = arith.mulf %325, %326 : vector<16x128xf32>
      %328 = arith.mulf %327, %327 : vector<16x128xf32>
      %cst_187 = arith.constant dense<0.000000e+00> : vector<16xf32>
      %329 = vector.multi_reduction <add>, %328, %cst_187 [1] : vector<16x128xf32> to vector<16xf32>
      %330 = vector.shape_cast %329 : vector<16xf32> to vector<16x1xf32>
      %cst_188 = arith.constant 3.125000e-02 : f32
      %331 = vector.broadcast %cst_188 : f32 to vector<16x1xf32>
      %332 = arith.mulf %330, %331 : vector<16x1xf32>
      %cst_189 = arith.constant 9.99999974E-6 : f32
      %333 = vector.broadcast %cst_189 : f32 to vector<16x1xf32>
      %334 = arith.addf %332, %333 : vector<16x1xf32>
      %335 = math.rsqrt %334 : vector<16x1xf32>
      %336 = vector.broadcast %335 : vector<16x1xf32> to vector<16x128xf32>
      %337 = arith.mulf %327, %336 : vector<16x128xf32>
      %338 = vector.broadcast %317 : vector<1x128xf32> to vector<16x128xf32>
      %339 = arith.mulf %337, %338 : vector<16x128xf32>
      %340 = vector.broadcast %319 : vector<1x128xf32> to vector<16x128xf32>
      %341 = arith.addf %339, %340 : vector<16x128xf32>
      %342 = arith.truncf %341 : vector<16x128xf32> to vector<16x128xbf16>
      %c0_190 = arith.constant 0 : index
      %c0_191 = arith.constant 0 : index
      %343 = vector.load %arg17[%c0_190, %c0_191] : memref<128x128xbf16, #tpu.memory_space<vmem>>, vector<128x128xbf16>
      %cst_192 = arith.constant dense<0.000000e+00> : vector<16x128xf32>
      %344 = tpu.matmul %342, %343, %cst_192 {dimension_numbers = #tpu.dot_dimension_numbers<[1], [0], [0], [1], [0, 0, 1, 1], [], []>} : vector<16x128xbf16>, vector<128x128xbf16>, vector<16x128xf32> -> vector<16x128xf32>
      %c0_193 = arith.constant 0 : index
      %c0_194 = arith.constant 0 : index
      %345 = vector.load %arg18[%c0_193, %c0_194] : memref<1x128xf32, #tpu.memory_space<vmem>>, vector<1x128xf32>
      %346 = vector.broadcast %345 : vector<1x128xf32> to vector<16x128xf32>
      %347 = arith.addf %344, %346 : vector<16x128xf32>
      %c0_195 = arith.constant 0 : index
      %c0_196 = arith.constant 0 : index
      %348 = vector.load %arg19[%c0_195, %c0_196] : memref<16x128xf32, #tpu.memory_space<vmem>>, vector<16x128xf32>
      tpu.vector_store %arg19[%c0_195, %c0_196], %347 {strides = array<i32>} : memref<16x128xf32, #tpu.memory_space<vmem>>, vector<16x128xf32>,
    } else {
    }
    return
  }
  func.func @transform_0(%arg0: i32, %arg1: i32) -> (i32, i32) {
    %c0_i32 = arith.constant 0 : i32
    return %arg0, %arg1 : i32, i32
  }
  func.func @transform_1(%arg0: i32, %arg1: i32) -> (i32, i32) {
    %c0_i32 = arith.constant 0 : i32
    return %arg0, %arg1 : i32, i32
  }
  func.func @transform_2(%arg0: i32, %arg1: i32) -> (i32, i32) {
    %c0_i32 = arith.constant 0 : i32
    %c0_i32_0 = arith.constant 0 : i32
    return %arg1, %c0_i32 : i32, i32
  }
  func.func @transform_3(%arg0: i32, %arg1: i32) -> (i32, i32) {
    %c0_i32 = arith.constant 0 : i32
    %c0_i32_0 = arith.constant 0 : i32
    return %arg1, %c0_i32 : i32, i32
  }
  func.func @transform_4(%arg0: i32, %arg1: i32) -> (i32, i32) {
    %c0_i32 = arith.constant 0 : i32
    %c0_i32_0 = arith.constant 0 : i32
    %c0_i32_1 = arith.constant 0 : i32
    return %c0_i32, %c0_i32_0 : i32, i32
  }
  func.func @transform_5(%arg0: i32, %arg1: i32) -> (i32, i32, i32) {
    %c0_i32 = arith.constant 0 : i32
    %c0_i32_0 = arith.constant 0 : i32
    %c0_i32_1 = arith.constant 0 : i32
    %c0_i32_2 = arith.constant 0 : i32
    return %c0_i32, %c0_i32_0, %c0_i32_1 : i32, i32, i32
  }
  func.func @transform_6(%arg0: i32, %arg1: i32) -> (i32, i32, i32) {
    %c0_i32 = arith.constant 0 : i32
    %c0_i32_0 = arith.constant 0 : i32
    %c0_i32_1 = arith.constant 0 : i32
    %c0_i32_2 = arith.constant 0 : i32
    return %c0_i32, %c0_i32_0, %c0_i32_1 : i32, i32, i32
  }
  func.func @transform_7(%arg0: i32, %arg1: i32) -> (i32, i32, i32) {
    %c0_i32 = arith.constant 0 : i32
    %c0_i32_0 = arith.constant 0 : i32
    %c0_i32_1 = arith.constant 0 : i32
    %c0_i32_2 = arith.constant 0 : i32
    return %c0_i32, %c0_i32_0, %c0_i32_1 : i32, i32, i32
  }
  func.func @transform_8(%arg0: i32, %arg1: i32) -> (i32, i32, i32) {
    %c0_i32 = arith.constant 0 : i32
    %c0_i32_0 = arith.constant 0 : i32
    %c0_i32_1 = arith.constant 0 : i32
    %c0_i32_2 = arith.constant 0 : i32
    return %c0_i32, %c0_i32_0, %c0_i32_1 : i32, i32, i32
  }
  func.func @transform_9(%arg0: i32, %arg1: i32) -> (i32, i32, i32) {
    %c0_i32 = arith.constant 0 : i32
    %c0_i32_0 = arith.constant 0 : i32
    %c0_i32_1 = arith.constant 0 : i32
    %c0_i32_2 = arith.constant 0 : i32
    return %c0_i32, %c0_i32_0, %c0_i32_1 : i32, i32, i32
  }
  func.func @transform_10(%arg0: i32, %arg1: i32) -> (i32, i32, i32) {
    %c0_i32 = arith.constant 0 : i32
    %c0_i32_0 = arith.constant 0 : i32
    %c0_i32_1 = arith.constant 0 : i32
    %c0_i32_2 = arith.constant 0 : i32
    return %c0_i32, %c0_i32_0, %c0_i32_1 : i32, i32, i32
  }
  func.func @transform_11(%arg0: i32, %arg1: i32) -> (i32, i32, i32) {
    %c0_i32 = arith.constant 0 : i32
    %c0_i32_0 = arith.constant 0 : i32
    %c0_i32_1 = arith.constant 0 : i32
    %c0_i32_2 = arith.constant 0 : i32
    return %c0_i32, %c0_i32_0, %c0_i32_1 : i32, i32, i32
  }
  func.func @transform_12(%arg0: i32, %arg1: i32) -> (i32, i32, i32) {
    %c0_i32 = arith.constant 0 : i32
    %c0_i32_0 = arith.constant 0 : i32
    %c0_i32_1 = arith.constant 0 : i32
    %c0_i32_2 = arith.constant 0 : i32
    return %c0_i32, %c0_i32_0, %c0_i32_1 : i32, i32, i32
  }
  func.func @transform_13(%arg0: i32, %arg1: i32) -> (i32, i32, i32) {
    %c0_i32 = arith.constant 0 : i32
    %c0_i32_0 = arith.constant 0 : i32
    %c0_i32_1 = arith.constant 0 : i32
    %c0_i32_2 = arith.constant 0 : i32
    return %c0_i32, %c0_i32_0, %c0_i32_1 : i32, i32, i32
  }
  func.func @transform_14(%arg0: i32, %arg1: i32) -> (i32, i32, i32) {
    %c0_i32 = arith.constant 0 : i32
    %c0_i32_0 = arith.constant 0 : i32
    %c0_i32_1 = arith.constant 0 : i32
    %c0_i32_2 = arith.constant 0 : i32
    return %c0_i32, %c0_i32_0, %c0_i32_1 : i32, i32, i32
  }
  func.func @transform_15(%arg0: i32, %arg1: i32) -> (i32, i32) {
    %c0_i32 = arith.constant 0 : i32
    %c0_i32_0 = arith.constant 0 : i32
    %c0_i32_1 = arith.constant 0 : i32
    return %c0_i32, %c0_i32_0 : i32, i32
  }
  func.func @transform_16(%arg0: i32, %arg1: i32) -> (i32, i32) {
    %c0_i32 = arith.constant 0 : i32
    %c0_i32_0 = arith.constant 0 : i32
    %c0_i32_1 = arith.constant 0 : i32
    return %c0_i32, %c0_i32_0 : i32, i32
  }
  func.func @transform_17(%arg0: i32, %arg1: i32) -> (i32, i32) {
    %c0_i32 = arith.constant 0 : i32
    %c0_i32_0 = arith.constant 0 : i32
    return %arg0, %c0_i32 : i32, i32
  }
}

</mosaic_0001>

<bundles_post_ra>
// kernel: _forward_impl.1
= control target key start
LH: loop header
LB: loop body
LE: loop exit
PB: predicated region body
PF: predicated region fallthrough
CT: control target
= control target key end

     0   :  { %s4349_s0 = inlined_call_operand.vmem [shape: bf16[16,768], index: 0, kind: input, shape index: {}]   ;;  %s4350_s1 = inlined_call_operand.vmem [shape: bf16[16,256], index: 1, kind: input, shape index: {}]   ;;  %s4351_s2 = inlined_call_operand.hbm [shape: bf16[768,128], index: 2, kind: input, shape index: {}]   ;;  %s4352_s3 = inlined_call_operand.hbm [shape: bf16[256,128], index: 3, kind: input, shape index: {}]   ;;  %s4353_s4 = inlined_call_operand.vmem [shape: f32[1,128], index: 4, kind: input, shape index: {}]   ;;  %s4354_s5 = inlined_call_operand.vmem [shape: bf16[4,128,128], index: 5, kind: input, shape index: {}]   ;;  %s4355_s6 = inlined_call_operand.vmem [shape: f32[4,1,128], index: 6, kind: input, shape index: {}]   ;;  %s4356_s7 = inlined_call_operand.vmem [shape: f32[4,1,128], index: 7, kind: input, shape index: {}]   ;;  %s4357_s8 = inlined_call_operand.vmem [shape: f32[4,1,128], index: 8, kind: input, shape index: {}]   ;;  %s4358_s9 = inlined_call_operand.hbm [shape: bf16[4,128,128], index: 9, kind: input, shape index: {}]   ;;  %s4359_s10 = inlined_call_operand.vmem [shape: f32[4,1,128], index: 10, kind: input, shape index: {}]   ;;  %s4360_s11 = inlined_call_operand.hbm [shape: bf16[4,128,128], index: 11, kind: input, shape index: {}]   ;;  %s4361_s12 = inlined_call_operand.vmem [shape: f32[4,1,128], index: 12, kind: input, shape index: {}]   ;;  %s4362_s13 = inlined_call_operand.vmem [shape: f32[4,1,128], index: 13, kind: input, shape index: {}]   ;;  %s4363_s14 = inlined_call_operand.vmem [shape: f32[4,1,128], index: 14, kind: input, shape index: {}]   ;;  %s4364_s15 = inlined_call_operand.vmem [shape: bf16[128,128], index: 15, kind: input, shape index: {}]   ;;  %s4365_s16 = inlined_call_operand.vmem [shape: f32[1,128], index: 16, kind: input, shape index: {}]   ;;  %s4366_s17 = inlined_call_operand.vmem [shape: f32[16,128], index: 17, kind: output, shape index: {}]  }
   0x1   :  { %4369 = sst [smem:[#allocation13_spill]] %s4349_s0 }
   0x2   :  { %4370 = sst [smem:[#allocation14_spill]] %s4350_s1 }
   0x3   :  { %22 = vsyncpa [#allocation4], 0 }
   0x4   :  { %23 = vsyncpa [#allocation6], 0 }
   0x5   :  { %24 = vsyncpa [#allocation9], 0  ;;  %s3788_s24 = smov [#allocation5]   ;;  %s3789_s26 = smov [#allocation3]  }
   0x6   :  { %s46_s25 = sshll.u32 %s3788_s24, 4  ;;  %s34_s27 = sshll.u32 %s3789_s26, 4  ;;  %s47_s25 = int_to_ptr.vmem [resolvable:$true] %s46_s25  ;;  %s3886_s27 = int_to_ptr.vmem [resolvable:$true] %s34_s27 }
   0x7   :  { %s3694_s0 = scalar_lea.hbm %s4352_s3, 2048 }
   0x8   :  { %p3695_p0 = scmp.ne.s32.totalorder %s4352_s3, %s3694_s0  ;;  %p3698_p1 = scmp.lt.u32.totalorder %s3694_s0, %s4352_s3 }
   0xa   :  { %p3700_p2 = pnand %p3698_p1, %p3695_p0 }
   0xc   :  { %3703 = shalt.err (!%p3700_p2)
}
   0xd   :  { %s3704_s20 = scalar_lea.vmem %s47_s25, 2048  ;;  %p3709_p4 = scmp.lt.s32.totalorder %s47_s25, %s47_s25 }
   0xe   :  { %p3705_p3 = scmp.ne.s32.totalorder %s47_s25, %s3704_s20  ;;  %p3710_p5 = scmp.lt.s32.totalorder %s3704_s20, %s3704_s20 }
  0x10   :  { %p3711_p6 = por %p3710_p5, %p3709_p4 }
  0x12   :  { %p3712_p7 = pnand %p3711_p6, %p3705_p3 }
  0x14   :  { %3715 = shalt.err (!%p3712_p7)
}
  0x15   :  { %s3790_s21 = smov 64   ;;  %s3791_s22 = smov 4  }
  0x16   :  { %52 = dma.hbm_to_vmem [thread:$0]  %s4352_s3, 2048, %s47_s25, [#allocation6], %s3790_s21, %s3790_s21, %s3791_s22  }
  0x17   :  { %s3716_s29 = scalar_lea.hbm %s4351_s2, 6144 }
  0x18   :  { %p3717_p8 = scmp.ne.s32.totalorder %s4351_s2, %s3716_s29  ;;  %p3720_p9 = scmp.lt.u32.totalorder %s3716_s29, %s4351_s2 }
  0x1a   :  { %p3722_p10 = pnand %p3720_p9, %p3717_p8 }
  0x1c   :  { %3725 = shalt.err (!%p3722_p10)
}
  0x1d   :  { %s3726_s1 = scalar_lea.vmem %s3886_s27, 6144  ;;  %p3731_p12 = scmp.lt.s32.totalorder %s3886_s27, %s3886_s27 }
  0x1e   :  { %p3727_p11 = scmp.ne.s32.totalorder %s3886_s27, %s3726_s1  ;;  %p3732_p13 = scmp.lt.s32.totalorder %s3726_s1, %s3726_s1 }
  0x20   :  { %p3733_p0 = por %p3732_p13, %p3731_p12 }
  0x22   :  { %p3734_p1 = pnand %p3733_p0, %p3727_p11 }
  0x24   :  { %3737 = shalt.err (!%p3734_p1)
}
  0x25   :  { %40 = dma.hbm_to_vmem [thread:$0]  %s4351_s2, 6144, %s3886_s27, [#allocation4], %s3790_s21, %s3790_s21, %s3791_s22  }
  0x26   :  { %s3792_s20 = smov [#allocation7]   ;;  %s3793_s24 = smov [#allocation8]  }
  0x27   :  { %s68_s23 = sshll.u32 %s3792_s20, 4  ;;  %s82_s26 = sshll.u32 %s3793_s24, 4  ;;  %s69_s23 = int_to_ptr.vmem [resolvable:$true] %s68_s23  ;;  %s3923_s26 = int_to_ptr.vmem [resolvable:$true] %s82_s26 }
  0x28   :  { %s3738_s0 = scalar_lea.hbm %s4358_s9, 4096 }
  0x29   :  { %p3739_p2 = scmp.ne.s32.totalorder %s4358_s9, %s3738_s0  ;;  %p3742_p3 = scmp.lt.u32.totalorder %s3738_s0, %s4358_s9 }
  0x2b   :  { %p3744_p4 = pnand %p3742_p3, %p3739_p2 }
  0x2d   :  { %3747 = shalt.err (!%p3744_p4)
}
  0x2e   :  { %s3748_s2 = scalar_lea.vmem %s69_s23, 4096  ;;  %p3753_p6 = scmp.lt.s32.totalorder %s69_s23, %s69_s23 }
  0x2f   :  { %p3749_p5 = scmp.ne.s32.totalorder %s69_s23, %s3748_s2  ;;  %p3754_p7 = scmp.lt.s32.totalorder %s3748_s2, %s3748_s2 }
  0x31   :  { %p3755_p8 = por %p3754_p7, %p3753_p6 }
  0x33   :  { %p3756_p9 = pnand %p3755_p8, %p3749_p5 }
  0x35   :  { %3759 = shalt.err (!%p3756_p9)
}
  0x36   :  { %74 = dma.hbm_to_vmem [thread:$0]  %s4358_s9, 4096, %s69_s23, [#allocation6], %s3790_s21, %s3790_s21, %s3791_s22  }
  0x37   :  { %s3760_s24 = scalar_lea.hbm %s4360_s11, 4096 }
  0x38   :  { %p3761_p10 = scmp.ne.s32.totalorder %s4360_s11, %s3760_s24  ;;  %p3764_p11 = scmp.lt.u32.totalorder %s3760_s24, %s4360_s11 }
  0x3a   :  { %p3766_p12 = pnand %p3764_p11, %p3761_p10 }
  0x3c   :  { %3769 = shalt.err (!%p3766_p12)
}
  0x3d   :  { %s3770_s18 = scalar_lea.vmem %s3923_s26, 4096  ;;  %p3775_p0 = scmp.lt.s32.totalorder %s3923_s26, %s3923_s26 }
  0x3e   :  { %p3771_p13 = scmp.ne.s32.totalorder %s3923_s26, %s3770_s18  ;;  %p3776_p1 = scmp.lt.s32.totalorder %s3770_s18, %s3770_s18 }
  0x40   :  { %p3777_p2 = por %p3776_p1, %p3775_p0 }
  0x42   :  { %p3778_p3 = pnand %p3777_p2, %p3771_p13 }
  0x44   :  { %3781 = shalt.err (!%p3778_p3)
}
  0x45   :  { %88 = dma.hbm_to_vmem [thread:$0]  %s4360_s11, 4096, %s3923_s26, [#allocation9], %s3790_s21, %s3790_s21, %s3791_s22  }
  0x46   :  { %3782 = dma.done.wait [#allocation4], 6144  }
  0x47   :  { %3783 = vsyncadd [#allocation4], 4294961152 }
  0x48   :  { %3784 = dma.done.wait [#allocation6], 6144  }
  0x49   :  { %3785 = vsyncadd [#allocation6], 4294961152 }
  0x4a   :  { %3786 = dma.done.wait [#allocation9], 4096  }
  0x4b   :  { %3787 = vsyncadd [#allocation9], 4294963200  ;;  %v3482_v0 = vld [vmem:[#allocation5 + $0x40] sm:$0xff]   ;;  %v3486_v4 = vld [vmem:[#allocation5 + $0x48] sm:$0xff]   ;;  %s4371_s22 = sld [smem:[#allocation14_spill]]  ;;  %s4372_s27 = sld [smem:[#allocation13_spill]] }
  0x4c   :  { %v3483_v1 = vld [vmem:[#allocation3 + $0x40] sm:$0xff]   ;;  %3009 = vmatprep.subr.bf16.mxu0 %v3482_v0  ;;  %v3487_v5 = vld [vmem:[#allocation3 + $0x48] sm:$0xff]   ;;  %v3490_v8 = vld [vmem:[#allocation5 + $0x50] sm:$0xff]   ;;  %vm3795_vm0 = vmmov 0  }
  0x4d   :  { %v3484_v2 = vld [vmem:[#allocation5] sm:$0xff]   ;;  %3031 = vmatprep.subr.bf16.mxu1 %v3483_v1  ;;  %v3488_v6 = vld [vmem:[#allocation5 + $0x8] sm:$0xff]   ;;  %v3491_v9 = vld [vmem:[#allocation3 + $0x50] sm:$0xff]  }
  0x4e   :  { %v3485_v3 = vld [vmem:[#allocation3] sm:$0xff]   ;;  %3010 = vmatpush3.bf16.msra.mxu0 %v3484_v2  ;;  %v3489_v7 = vld [vmem:[#allocation3 + $0x8] sm:$0xff]   ;;  %v3492_v10 = vld [vmem:[#allocation5 + $0x10] sm:$0xff]  }
  0x4f   :  { %3032 = vmatpush3.bf16.msra.mxu1 %v3485_v3  ;;  %3011 = vmatprep.subr.bf16.mxu0 %v3486_v4  ;;  %v3493_v11 = vld [vmem:[#allocation3 + $0x10] sm:$0xff]   ;;  %v3494_v12 = vld [vmem:[#allocation5 + $0x58] sm:$0xff]   ;;  %v3498_v16 = vld [vmem:[#allocation5 + $0x60] sm:$0xff]  }
  0x50   :  { %3033 = vmatprep.subr.bf16.mxu1 %v3487_v5  ;;  %v3495_v13 = vld [vmem:[#allocation3 + $0x58] sm:$0xff]   ;;  %v3499_v17 = vld [vmem:[#allocation3 + $0x60] sm:$0xff]   ;;  %v3502_v20 = vld [vmem:[#allocation5 + $0x68] sm:$0xff]  }
  0x51   :  { %v3496_v14 = vld [vmem:[#allocation5 + $0x18] sm:$0xff]   ;;  %v3500_v18 = vld [vmem:[#allocation5 + $0x20] sm:$0xff]   ;;  %v3503_v21 = vld [vmem:[#allocation3 + $0x68] sm:$0xff]  }
  0x52   :  { %3012 = vmatpush3.bf16.msra.mxu0 %v3488_v6  ;;  %v3497_v15 = vld [vmem:[#allocation3 + $0x18] sm:$0xff]   ;;  %v3501_v19 = vld [vmem:[#allocation3 + $0x20] sm:$0xff]   ;;  %v3504_v22 = vld [vmem:[#allocation5 + $0x28] sm:$0xff]  }
  0x53   :  { %3034 = vmatpush3.bf16.msra.mxu1 %v3489_v7  ;;  %3013 = vmatprep.subr.bf16.mxu0 %v3490_v8  ;;  %v3505_v23 = vld [vmem:[#allocation3 + $0x28] sm:$0xff]   ;;  %v3506_v24 = vld [vmem:[#allocation5 + $0x70] sm:$0xff]   ;;  %v3510_v28 = vld [vmem:[#allocation5 + $0x78] sm:$0xff]  }
  0x54   :  { %3035 = vmatprep.subr.bf16.mxu1 %v3491_v9  ;;  %v3507_v25 = vld [vmem:[#allocation3 + $0x70] sm:$0xff]   ;;  %v3511_v29 = vld [vmem:[#allocation3 + $0x78] sm:$0xff]   ;;  %v3514_v32 = vld [vmem:[%s4371_s22] ss:$8 sps:$4 sm:$0xff]   ;;  %v3794_v9 = vmov 0.0  }
  0x55   :  { %v3508_v26 = vld [vmem:[#allocation5 + $0x30] sm:$0xff]   ;;  %v3512_v30 = vld [vmem:[#allocation5 + $0x38] sm:$0xff]   ;;  %v3516_v33 = vld [vmem:[%s4371_s22 + $0x4] ss:$8 sps:$4 sm:$0xff]  }
  0x56   :  { %3014 = vmatpush3.bf16.msra.mxu0 %v3492_v10  ;;  %v3509_v27 = vld [vmem:[#allocation3 + $0x30] sm:$0xff]   ;;  %v3513_v31 = vld [vmem:[#allocation3 + $0x38] sm:$0xff]   ;;  %401 = vmatprep.mubr.bf16.mxu0 %v3516_v33  ;;  %v3520_v36 = vld [vmem:[#allocation3 + $0xc0] sm:$0xff]  }
  0x57   :  { %3036 = vmatpush3.bf16.msra.mxu1 %v3493_v11  ;;  %3015 = vmatprep.subr.bf16.mxu0 %v3494_v12  ;;  %v3517_v34 = vld [vmem:[%s4372_s27] ss:$24 sps:$4 sm:$0xff]   ;;  %v3519_v35 = vld [vmem:[%s4372_s27 + $0x4] ss:$24 sps:$4 sm:$0xff]   ;;  %v3524_v40 = vld [vmem:[#allocation3 + $0xc8] sm:$0xff]  }
  0x58   :  { %3037 = vmatprep.subr.bf16.mxu1 %v3495_v13  ;;  %760 = vmatprep.mubr.bf16.mxu1 %v3519_v35  ;;  %v3521_v37 = vld [vmem:[#allocation3 + $0x140] sm:$0xff]   ;;  %v3525_v41 = vld [vmem:[#allocation3 + $0x148] sm:$0xff]   ;;  %v3528_v44 = vld [vmem:[#allocation3 + $0xd0] sm:$0xff]  }
  0x59   :  { %v3522_v38 = vld [vmem:[#allocation3 + $0x80] sm:$0xff]   ;;  %v3526_v42 = vld [vmem:[#allocation3 + $0x88] sm:$0xff]   ;;  %v3529_v45 = vld [vmem:[#allocation3 + $0x150] sm:$0xff]  }
  0x5a   :  { %3016 = vmatpush3.bf16.msra.mxu0 %v3496_v14  ;;  %v3523_v39 = vld [vmem:[#allocation3 + $0x100] sm:$0xff]   ;;  %v3527_v43 = vld [vmem:[#allocation3 + $0x108] sm:$0xff]   ;;  %v3530_v46 = vld [vmem:[#allocation3 + $0x90] sm:$0xff]  }
  0x5b   :  { %3038 = vmatpush3.bf16.msra.mxu1 %v3497_v15  ;;  %3017 = vmatprep.subr.bf16.mxu0 %v3498_v16  ;;  %v3531_v47 = vld [vmem:[#allocation3 + $0x110] sm:$0xff]   ;;  %v3532_v48 = vld [vmem:[#allocation3 + $0xd8] sm:$0xff]   ;;  %v3536_v52 = vld [vmem:[#allocation3 + $0xe0] sm:$0xff]  }
  0x5c   :  { %3039 = vmatprep.subr.bf16.mxu1 %v3499_v17  ;;  %v3533_v49 = vld [vmem:[#allocation3 + $0x158] sm:$0xff]   ;;  %v3537_v53 = vld [vmem:[#allocation3 + $0x160] sm:$0xff]   ;;  %v3540_v56 = vld [vmem:[#allocation3 + $0xe8] sm:$0xff]  }
  0x5d   :  { %v3534_v50 = vld [vmem:[#allocation3 + $0x98] sm:$0xff]   ;;  %v3538_v54 = vld [vmem:[#allocation3 + $0xa0] sm:$0xff]   ;;  %v3541_v57 = vld [vmem:[#allocation3 + $0x168] sm:$0xff]  }
  0x5e   :  { %3018 = vmatpush3.bf16.msra.mxu0 %v3500_v18  ;;  %v3535_v51 = vld [vmem:[#allocation3 + $0x118] sm:$0xff]   ;;  %v3539_v55 = vld [vmem:[#allocation3 + $0x120] sm:$0xff]   ;;  %v3542_v58 = vld [vmem:[#allocation3 + $0xa8] sm:$0xff]  }
  0x5f   :  { %3040 = vmatpush3.bf16.msra.mxu1 %v3501_v19  ;;  %3019 = vmatprep.subr.bf16.mxu0 %v3502_v20  ;;  %v3543_v59 = vld [vmem:[#allocation3 + $0x128] sm:$0xff]   ;;  %v3544_v60 = vld [vmem:[#allocation3 + $0xf0] sm:$0xff]   ;;  %v3548_v0 = vld [vmem:[#allocation3 + $0xf8] sm:$0xff]  }
  0x60   :  { %3041 = vmatprep.subr.bf16.mxu1 %v3503_v21  ;;  %v3545_v61 = vld [vmem:[#allocation3 + $0x170] sm:$0xff]   ;;  %v3549_v1 = vld [vmem:[#allocation3 + $0x178] sm:$0xff]   ;;  %v3552_v4 = vld [vmem:[%s4372_s27 + $0x8] ss:$24 sps:$4 sm:$0xff]  }
  0x61   :  { %v3546_v62 = vld [vmem:[#allocation3 + $0xb0] sm:$0xff]   ;;  %v3550_v2 = vld [vmem:[#allocation3 + $0xb8] sm:$0xff]   ;;  %v3554_v5 = vld [vmem:[%s4372_s27 + $0xc] ss:$24 sps:$4 sm:$0xff]  }
  0x62   :  { %3020 = vmatpush3.bf16.msra.mxu0 %v3504_v22  ;;  %v3547_v63 = vld [vmem:[#allocation3 + $0x130] sm:$0xff]   ;;  %v3551_v3 = vld [vmem:[#allocation3 + $0x138] sm:$0xff]   ;;  %v3558_v8 = vld [vmem:[%s4354_s5] sm:$0xff]  }
  0x63   :  { %3042 = vmatpush3.bf16.msra.mxu1 %v3505_v23  ;;  %3021 = vmatprep.subr.bf16.mxu0 %v3506_v24  ;;  %v3555_v6 = vld [vmem:[%s4372_s27 + $0x10] ss:$24 sps:$4 sm:$0xff]   ;;  %v3557_v7 = vld [vmem:[%s4372_s27 + $0x14] ss:$24 sps:$4 sm:$0xff]   ;;  %v3561_v12 = vld [vmem:[%s4354_s5 + $0x18] sm:$0xff]  }
  0x64   :  { %3043 = vmatprep.subr.bf16.mxu1 %v3507_v25  ;;  %v3559_v10 = vld [vmem:[%s4354_s5 + $0x8] sm:$0xff]   ;;  %v3560_v11 = vld [vmem:[%s4354_s5 + $0x10] sm:$0xff]   ;;  %v3562_v13 = vld [vmem:[%s4354_s5 + $0x20] sm:$0xff]  }
  0x65   :  { %v3563_v14 = vld [vmem:[%s4354_s5 + $0x28] sm:$0xff]   ;;  %v3564_v15 = vld [vmem:[%s4354_s5 + $0x30] sm:$0xff]   ;;  %v3565_v16 = vld [vmem:[%s4354_s5 + $0x38] sm:$0xff]  }
  0x66   :  { %3022 = vmatpush3.bf16.msra.mxu0 %v3508_v26 }
  0x67   :  { %3044 = vmatpush3.bf16.msra.mxu1 %v3509_v27  ;;  %3023 = vmatprep.subr.bf16.mxu0 %v3510_v28 }
  0x68   :  { %3045 = vmatprep.subr.bf16.mxu1 %v3511_v29 }
  0x6a   :  { %3024 = vmatpush3.bf16.msra.mxu0 %v3512_v30 }
  0x6b   :  { %3046 = vmatpush3.bf16.msra.mxu1 %v3513_v31  ;;  %3053 = vmatprep.subr.bf16.mxu0 %v3520_v36 }
  0x6c   :  { %3075 = vmatprep.subr.bf16.mxu1 %v3521_v37 }
  0x6d   :  { %402 = vmatmul.mubr.bf16.vlgmr.msra.gmra.mrb[0].mxu0 %v3514_v32 }
  0x6e   :  { %761 = vmatmul.mubr.bf16.vlgmr.msra.gmra.mrb[0].mxu1 %v3517_v34  ;;  %3054 = vmatpush3.bf16.msra.mxu0 %v3522_v38 }
  0x6f   :  { %3076 = vmatpush3.bf16.msra.mxu1 %v3523_v39  ;;  %3055 = vmatprep.subr.bf16.mxu0 %v3524_v40 }
  0x70   :  { %3077 = vmatprep.subr.bf16.mxu1 %v3525_v41  ;;  %801 = vmatprep.mubr.bf16.mxu0 %v3554_v5 }
  0x71   :  { %842 = vmatprep.mubr.bf16.mxu1 %v3557_v7 }
  0x72   :  { %3056 = vmatpush3.bf16.msra.mxu0 %v3526_v42 }
  0x73   :  { %3078 = vmatpush3.bf16.msra.mxu1 %v3527_v43  ;;  %3057 = vmatprep.subr.bf16.mxu0 %v3528_v44 }
  0x74   :  { %3079 = vmatprep.subr.bf16.mxu1 %v3529_v45 }
  0x76   :  { %3058 = vmatpush3.bf16.msra.mxu0 %v3530_v46  ;;  %v2733_v46 = vld [vmem:[%s4353_s4] ss:$0 sm:$0xff] }
  0x77   :  { %3080 = vmatpush3.bf16.msra.mxu1 %v3531_v47  ;;  %3059 = vmatprep.subr.bf16.mxu0 %v3532_v48 }
  0x78   :  { %3081 = vmatprep.subr.bf16.mxu1 %v3533_v49 }
  0x7a   :  { %3060 = vmatpush3.bf16.msra.mxu0 %v3534_v50 }
  0x7b   :  { %3082 = vmatpush3.bf16.msra.mxu1 %v3535_v51  ;;  %3061 = vmatprep.subr.bf16.mxu0 %v3536_v52  ;;  %v2807_v51 = vld [vmem:[%s4355_s6] ss:$0 sm:$0xff] }
  0x7c   :  { %3083 = vmatprep.subr.bf16.mxu1 %v3537_v53 }
  0x7e   :  { %3062 = vmatpush3.bf16.msra.mxu0 %v3538_v54 }
  0x7f   :  { %3084 = vmatpush3.bf16.msra.mxu1 %v3539_v55  ;;  %3063 = vmatprep.subr.bf16.mxu0 %v3540_v56 }
  0x80   :  { %3085 = vmatprep.subr.bf16.mxu1 %v3541_v57 }
  0x82   :  { %3064 = vmatpush3.bf16.msra.mxu0 %v3542_v58 }
  0x83   :  { %3086 = vmatpush3.bf16.msra.mxu1 %v3543_v59  ;;  %3065 = vmatprep.subr.bf16.mxu0 %v3544_v60  ;;  %v3566_v60 = vld [vmem:[#allocation7] sm:$0xff]  }
  0x84   :  { %3087 = vmatprep.subr.bf16.mxu1 %v3545_v61  ;;  %v860_v61 = vlaneseq }
  0x86   :  { %3066 = vmatpush3.bf16.msra.mxu0 %v3546_v62  ;;  %v861_v62 = vand.u32 127, %v860_v61 }
  0x87   :  { %3088 = vmatpush3.bf16.msra.mxu1 %v3547_v63  ;;  %3067 = vmatprep.subr.bf16.mxu0 %v3548_v0 }
  0x88   :  { %3089 = vmatprep.subr.bf16.mxu1 %v3549_v1  ;;  %vm862_vm1 = vcmp.lt.s32.totalorder %v861_v62, 32  ;;  %v3582_v62 = vld [vmem:[%s4354_s5 + $0x40] sm:$0xff]  }
  0x89   :  { %v4032_v1 = vsel %vm862_vm1, 1.0, %v3794_v9 }
  0x8a   :  { %3068 = vmatpush3.bf16.msra.mxu0 %v3550_v2 }
  0x8b   :  { %3090 = vmatpush3.bf16.msra.mxu1 %v3551_v3  ;;  %3214 = vmatprep.subr.bf16.mxu0 %v3794_v9 }
  0x8c   :  { %3234 = vmatprep.subr.bf16.mxu1 %v3794_v9 }
  0x8d   :  { %802 = vmatmul.mubr.bf16.vlgmr.msra.gmra.mrb[4].mxu0 %v3552_v4 }
  0x8e   :  { %843 = vmatmul.mubr.bf16.vlgmr.msra.gmra.mrb[4].mxu1 %v3555_v6  ;;  %3215 = vmatpush3.bf16.msra.mxu0 %v3558_v8 }
  0x8f   :  { %3216 = vmatprep.subr.bf16.mxu0 %v3794_v9  ;;  %3230 = vmatprep.mubr.msk.bf16.mxu0 %vm3795_vm0, %v3794_v9 }
  0x90   :  { %3250 = vmatprep.mubr.msk.bf16.mxu1 %vm3795_vm0, %v3794_v9  ;;  %3235 = vmatpush3.bf16.msra.mxu1 %v3566_v60 }
  0x91   :  { %3236 = vmatprep.subr.bf16.mxu1 %v3794_v9 }
  0x92   :  { %3217 = vmatpush3.bf16.msra.mxu0 %v3559_v10 }
  0x93   :  { %3218 = vmatprep.subr.bf16.mxu0 %v3794_v9 }
  0x96   :  { %3219 = vmatpush3.bf16.msra.mxu0 %v3560_v11  ;;  %v3567_v11 = vld [vmem:[#allocation7 + $0x8] sm:$0xff]  }
  0x97   :  { %3220 = vmatprep.subr.bf16.mxu0 %v3794_v9  ;;  %3237 = vmatpush3.bf16.msra.mxu1 %v3567_v11 }
  0x98   :  { %3238 = vmatprep.subr.bf16.mxu1 %v3794_v9 }
  0x9a   :  { %3221 = vmatpush3.bf16.msra.mxu0 %v3561_v12  ;;  %v3568_v12 = vld [vmem:[#allocation7 + $0x10] sm:$0xff]  }
  0x9b   :  { %3222 = vmatprep.subr.bf16.mxu0 %v3794_v9  ;;  %3239 = vmatpush3.bf16.msra.mxu1 %v3568_v12  ;;  %v3584_v12 = vld [vmem:[%s4354_s5 + $0x50] sm:$0xff]  }
  0x9c   :  { %3240 = vmatprep.subr.bf16.mxu1 %v3794_v9 }
  0x9e   :  { %3223 = vmatpush3.bf16.msra.mxu0 %v3562_v13  ;;  %v3569_v13 = vld [vmem:[#allocation7 + $0x18] sm:$0xff]  }
  0x9f   :  { %3224 = vmatprep.subr.bf16.mxu0 %v3794_v9  ;;  %3241 = vmatpush3.bf16.msra.mxu1 %v3569_v13  ;;  %v3585_v13 = vld [vmem:[%s4354_s5 + $0x58] sm:$0xff]  }
  0xa0   :  { %3242 = vmatprep.subr.bf16.mxu1 %v3794_v9 }
  0xa2   :  { %3225 = vmatpush3.bf16.msra.mxu0 %v3563_v14  ;;  %v3570_v14 = vld [vmem:[#allocation7 + $0x20] sm:$0xff]  }
  0xa3   :  { %3226 = vmatprep.subr.bf16.mxu0 %v3794_v9  ;;  %3243 = vmatpush3.bf16.msra.mxu1 %v3570_v14  ;;  %v3586_v14 = vld [vmem:[%s4354_s5 + $0x60] sm:$0xff]  }
  0xa4   :  { %3244 = vmatprep.subr.bf16.mxu1 %v3794_v9 }
  0xa6   :  { %3227 = vmatpush3.bf16.msra.mxu0 %v3564_v15  ;;  %v3571_v15 = vld [vmem:[#allocation7 + $0x28] sm:$0xff]  }
  0xa7   :  { %3228 = vmatprep.subr.bf16.mxu0 %v3794_v9  ;;  %3245 = vmatpush3.bf16.msra.mxu1 %v3571_v15  ;;  %v3587_v15 = vld [vmem:[%s4354_s5 + $0x68] sm:$0xff]  }
  0xa8   :  { %3246 = vmatprep.subr.bf16.mxu1 %v3794_v9 }
  0xaa   :  { %3229 = vmatpush3.bf16.msra.mxu0 %v3565_v16  ;;  %v3572_v16 = vld [vmem:[#allocation7 + $0x30] sm:$0xff]  }
  0xab   :  { %3254 = vmatprep.subr.bf16.mxu0 %v3794_v9  ;;  %3247 = vmatpush3.bf16.msra.mxu1 %v3572_v16  ;;  %v3588_v16 = vld [vmem:[%s4354_s5 + $0x70] sm:$0xff]  }
  0xac   :  { %3248 = vmatprep.subr.bf16.mxu1 %v3794_v9 }
 0x140   :  { %v3025_v17 = vpop.f32.mrb[0].mxu0 }
 0x141   :  { %v3047_v18 = vpop.f32.mrb[0].mxu1  ;;  %v3026_v19 = vpop.f32.mrb[1].mxu0 }
 0x142   :  { %v3027_v20 = vadd.f32 %v3026_v19, %v3025_v17  ;;  %v3048_v21 = vpop.f32.mrb[1].mxu1  ;;  %v3028_v22 = vpop.f32.mrb[2].mxu0  ;;  %v3573_v17 = vld [vmem:[#allocation7 + $0x38] sm:$0xff]   ;;  %v3575_v19 = vld [vmem:[#allocation8 + $0x8] sm:$0xff]  }
 0x143   :  { %v3049_v23 = vadd.f32 %v3048_v21, %v3047_v18  ;;  %v3050_v24 = vpop.f32.mrb[2].mxu1  ;;  %v3029_v25 = vpop.f32.mrb[3].mxu0  ;;  %3249 = vmatpush3.bf16.msra.mxu1 %v3573_v17  ;;  %v3574_v18 = vld [vmem:[#allocation8] sm:$0xff]   ;;  %v3577_v21 = vld [vmem:[#allocation8 + $0x18] sm:$0xff]  }
 0x144   :  { %v3030_v26 = vadd.f32 %v3029_v25, %v3028_v22  ;;  %v3051_v27 = vpop.f32.mrb[3].mxu1  ;;  %3274 = vmatprep.subr.bf16.mxu1 %v3794_v9  ;;  %v3578_v22 = vld [vmem:[#allocation8 + $0x20] sm:$0xff]   ;;  %v3589_v17 = vld [vmem:[%s4354_s5 + $0x78] sm:$0xff]  }
 0x145   :  { %v763_v28 = vadd.f32 %v3049_v23, %v3027_v20  ;;  %v3052_v29 = vadd.f32 %v3051_v27, %v3050_v24  ;;  %v3576_v20 = vld [vmem:[#allocation8 + $0x10] sm:$0xff]   ;;  %v3579_v23 = vld [vmem:[#allocation8 + $0x28] sm:$0xff]  }
 0x147   :  { %v766_v30 = vadd.f32 %v3052_v29, %v3030_v26 }
 0x160   :  { %v3069_v31 = vpop.f32.mrb[4].mxu0 }
 0x161   :  { %v3070_v32 = vpop.f32.mrb[5].mxu0  ;;  %v3091_v33 = vpop.f32.mrb[4].mxu1 }
 0x162   :  { %v3071_v34 = vadd.f32 %v3070_v32, %v3069_v31  ;;  %v3072_v35 = vpop.f32.mrb[6].mxu0  ;;  %v3092_v36 = vpop.f32.mrb[5].mxu1  ;;  %v2816_v32 = vld [vmem:[%s4356_s7] ss:$0 sm:$0xff] }
 0x163   :  { %v3073_v37 = vpop.f32.mrb[7].mxu0  ;;  %v3093_v39 = vadd.f32 %v3092_v36, %v3091_v33  ;;  %v3094_v40 = vpop.f32.mrb[6].mxu1  ;;  %v2817_v36 = vld [vmem:[%s4357_s8] ss:$0 sm:$0xff] }
 0x164   :  { %v804_v38 = vadd.f32 %v3071_v34, %v763_v28  ;;  %v3074_v41 = vadd.f32 %v3073_v37, %v3072_v35  ;;  %v3095_v42 = vpop.f32.mrb[7].mxu1 }
 0x165   :  { %v3096_v45 = vadd.f32 %v3095_v42, %v3094_v40  ;;  %v3581_v42 = vld [vmem:[#allocation8 + $0x38] sm:$0xff]  }
 0x166   :  { %v845_v43 = vadd.f32 %v3093_v39, %v804_v38  ;;  %v807_v44 = vadd.f32 %v3074_v41, %v766_v30  ;;  %v3580_v41 = vld [vmem:[#allocation8 + $0x30] sm:$0xff]  }
 0x168   :  { %v848_v47 = vadd.f32 %v3096_v45, %v807_v44  ;;  %v851_v48 = vadd.f32 %v2733_v46, %v845_v43  ;;  %v2818_v43 = vld [vmem:[%s4359_s10] ss:$0 sm:$0xff] }
 0x16a   :  { %v852_v49 = vadd.f32 %v2733_v46, %v848_v47 }
 0x16c   :  { %v865_v50 = vpack.c.bf16 %v852_v49, %v851_v48 }
 0x16e   :  { %3231 = vmatmul.mubr.bf16.vlgmr.msra.gmra.mrb[8].mxu0 %v865_v50 }
 0x16f   :  { %3270 = vmatprep.mubr.msk.bf16.mxu0 %vm3795_vm0, %v3794_v9  ;;  %3255 = vmatpush3.bf16.msra.mxu0 %v3574_v18 }
 0x170   :  { %3256 = vmatprep.subr.bf16.mxu0 %v3794_v9 }
 0x173   :  { %3257 = vmatpush3.bf16.msra.mxu0 %v3575_v19 }
 0x174   :  { %3258 = vmatprep.subr.bf16.mxu0 %v3794_v9 }
 0x177   :  { %3259 = vmatpush3.bf16.msra.mxu0 %v3576_v20 }
 0x178   :  { %3260 = vmatprep.subr.bf16.mxu0 %v3794_v9 }
 0x17b   :  { %3261 = vmatpush3.bf16.msra.mxu0 %v3577_v21 }
 0x17c   :  { %3262 = vmatprep.subr.bf16.mxu0 %v3794_v9 }
 0x17f   :  { %3263 = vmatpush3.bf16.msra.mxu0 %v3578_v22 }
 0x180   :  { %3264 = vmatprep.subr.bf16.mxu0 %v3794_v9 }
 0x183   :  { %3265 = vmatpush3.bf16.msra.mxu0 %v3579_v23 }
 0x184   :  { %3266 = vmatprep.subr.bf16.mxu0 %v3794_v9 }
 0x187   :  { %3267 = vmatpush3.bf16.msra.mxu0 %v3580_v41 }
 0x188   :  { %3268 = vmatprep.subr.bf16.mxu0 %v3794_v9 }
 0x18b   :  { %3269 = vmatpush3.bf16.msra.mxu0 %v3581_v42 }
 0x18c   :  { %3294 = vmatprep.subr.bf16.mxu0 %v3794_v9 }
 0x241   :  { %v971_v52 = vpop.f32.mrb[8].mxu0 }
 0x242   :  { %v972_v53 = vadd.f32 %v2807_v51, %v971_v52  ;;  %v3232_v54 = vpop.f32.mrb[9].mxu0 }
 0x243   :  { %v974_v55 = vpop.f32.mrb[10].mxu0 }
 0x244   :  { %v975_v56 = vadd.f32 %v2807_v51, %v974_v55  ;;  %v3233_v57 = vpop.f32.mrb[11].mxu0  ;;  %v978_v58 = vadd.f32 %v972_v53, %v851_v48  ;;  %v2827_v53 = vld [vmem:[%s4361_s12] ss:$0 sm:$0xff] }
 0x246   :  { %982 = vadd.xlane.f32.xlu0 %v978_v58  ;;  %v979_v59 = vadd.f32 %v975_v56, %v852_v49 }
 0x24a   :  { %984 = vadd.xlane.f32.xlu0 %v979_v59 }
 0x2d3   :  { %v983_v63 = vpop.xlane.xlu0 %982 }
 0x2d4   :  { %v986_v0 = vmul.f32 0.03125, %v983_v63  ;;  %v3583_v63 = vld [vmem:[%s4354_s5 + $0x48] sm:$0xff]  }
 0x2d6   :  { %v988_v2 = vsub.f32 %v978_v58, %v986_v0 }
 0x2d7   :  { %v985_v3 = vpop.xlane.xlu0 %984 }
 0x2d8   :  { %v987_v4 = vmul.f32 0.03125, %v985_v3  ;;  %v990_v5 = vmul.f32 %v4032_v1, %v988_v2 }
 0x2da   :  { %v989_v6 = vsub.f32 %v979_v59, %v987_v4  ;;  %v992_v7 = vmul.f32 %v990_v5, %v990_v5 }
 0x2dc   :  { %994 = vadd.xlane.f32.xlu1 %v992_v7  ;;  %v991_v8 = vmul.f32 %v4032_v1, %v989_v6 }
 0x2de   :  { %v993_v10 = vmul.f32 %v991_v8, %v991_v8 }
 0x2e0   :  { %996 = vadd.xlane.f32.xlu1 %v993_v10 }
 0x369   :  { %v995_v24 = vpop.xlane.xlu1 %994 }
 0x36a   :  { %v998_v25 = vmul.f32 0.03125, %v995_v24 }
 0x36c   :  { %v1000_v26 = vadd.f32 1e-05, %v998_v25  ;;  %v2836_v25 = vld [vmem:[%s4362_s13] ss:$0 sm:$0xff] }
 0x36d   :  { %v997_v27 = vpop.xlane.xlu1 %996 }
 0x36e   :  { %3662 = vrsqrt.f32 %v1000_v26  ;;  %v999_v28 = vmul.f32 0.03125, %v997_v27 }
 0x370   :  { %v1001_v29 = vadd.f32 1e-05, %v999_v28 }
 0x372   :  { %3664 = vrsqrt.f32 %v1001_v29 }
 0x378   :  { %v3663_v30 = vpop.eup %3662 }
 0x379   :  { %v1004_v31 = vmul.f32 %v3663_v30, %v990_v5  ;;  %v2837_v30 = vld [vmem:[%s4363_s14] ss:$0 sm:$0xff] }
 0x37b   :  { %v1012_v35 = vmul.f32 %v2816_v32, %v1004_v31 }
 0x37c   :  { %v3665_v33 = vpop.eup %3664 }
 0x37d   :  { %v1005_v34 = vmul.f32 %v3665_v33, %v991_v8  ;;  %v1020_v38 = vadd.f32 %v2817_v36, %v1012_v35  ;;  %v2855_v35 = vld [vmem:[%s4355_s6 + $0x1] ss:$0 sm:$0xff] }
 0x37f   :  { %v1013_v37 = vmul.f32 %v2816_v32, %v1005_v34 }
 0x381   :  { %v1021_v39 = vadd.f32 %v2817_v36, %v1013_v37 }
 0x383   :  { %v1022_v40 = vpack.c.bf16 %v1021_v39, %v1020_v38 }
 0x385   :  { %3251 = vmatmul.mubr.bf16.vlgmr.msra.gmra.mrb[8].mxu1 %v1022_v40 }
 0x386   :  { %3290 = vmatprep.mubr.msk.bf16.mxu1 %vm3795_vm0, %v3794_v9  ;;  %3275 = vmatpush3.bf16.msra.mxu1 %v3582_v62  ;;  %v3598_v62 = vld [vmem:[#allocation8 + $0x40] sm:$0xff]  }
 0x387   :  { %3276 = vmatprep.subr.bf16.mxu1 %v3794_v9 }
 0x38a   :  { %3277 = vmatpush3.bf16.msra.mxu1 %v3583_v63  ;;  %v3599_v63 = vld [vmem:[#allocation8 + $0x48] sm:$0xff]  }
 0x38b   :  { %3278 = vmatprep.subr.bf16.mxu1 %v3794_v9 }
 0x38e   :  { %3279 = vmatpush3.bf16.msra.mxu1 %v3584_v12 }
 0x38f   :  { %3280 = vmatprep.subr.bf16.mxu1 %v3794_v9 }
 0x392   :  { %3281 = vmatpush3.bf16.msra.mxu1 %v3585_v13  ;;  %v2866_v13 = vld [vmem:[%s4356_s7 + $0x1] ss:$0 sm:$0xff] }
 0x393   :  { %3282 = vmatprep.subr.bf16.mxu1 %v3794_v9 }
 0x396   :  { %3283 = vmatpush3.bf16.msra.mxu1 %v3586_v14 }
 0x397   :  { %3284 = vmatprep.subr.bf16.mxu1 %v3794_v9 }
 0x39a   :  { %3285 = vmatpush3.bf16.msra.mxu1 %v3587_v15 }
 0x39b   :  { %3286 = vmatprep.subr.bf16.mxu1 %v3794_v9 }
 0x39e   :  { %3287 = vmatpush3.bf16.msra.mxu1 %v3588_v16 }
 0x39f   :  { %3288 = vmatprep.subr.bf16.mxu1 %v3794_v9 }
 0x3a2   :  { %3289 = vmatpush3.bf16.msra.mxu1 %v3589_v17 }
 0x3a3   :  { %3314 = vmatprep.subr.bf16.mxu1 %v3794_v9 }
 0x458   :  { %v1128_v44 = vpop.f32.mrb[8].mxu1 }
 0x459   :  { %v1129_v45 = vadd.f32 %v2818_v43, %v1128_v44  ;;  %v3252_v46 = vpop.f32.mrb[9].mxu1  ;;  %v3590_v44 = vld [vmem:[#allocation7 + $0x40] sm:$0xff]  }
 0x45a   :  { %v1131_v47 = vpop.f32.mrb[10].mxu1 }
 0x45b   :  { %v1132_v48 = vadd.f32 %v2818_v43, %v1131_v47  ;;  %v3253_v49 = vpop.f32.mrb[11].mxu1  ;;  %v1135_v50 = vmax.f32 %v1129_v45, 0.0  ;;  %v3591_v45 = vld [vmem:[#allocation7 + $0x48] sm:$0xff]  }
 0x45d   :  { %v1136_v51 = vmax.f32 %v1132_v48, 0.0 }
 0x45f   :  { %v1137_v52 = vpack.c.bf16 %v1136_v51, %v1135_v50 }
 0x461   :  { %3271 = vmatmul.mubr.bf16.vlgmr.msra.gmra.mrb[12].mxu0 %v1137_v52 }
 0x462   :  { %3310 = vmatprep.mubr.msk.bf16.mxu0 %vm3795_vm0, %v3794_v9  ;;  %3295 = vmatpush3.bf16.msra.mxu0 %v3590_v44  ;;  %v3606_v44 = vld [vmem:[%s4354_s5 + $0x80] sm:$0xff]  }
 0x463   :  { %3296 = vmatprep.subr.bf16.mxu0 %v3794_v9 }
 0x466   :  { %3297 = vmatpush3.bf16.msra.mxu0 %v3591_v45  ;;  %v3607_v45 = vld [vmem:[%s4354_s5 + $0x88] sm:$0xff]  }
 0x467   :  { %3298 = vmatprep.subr.bf16.mxu0 %v3794_v9 }
 0x534   :  { %v1243_v54 = vpop.f32.mrb[12].mxu0 }
 0x535   :  { %v1244_v55 = vadd.f32 %v2827_v53, %v1243_v54  ;;  %v3272_v56 = vpop.f32.mrb[13].mxu0 }
 0x536   :  { %v1246_v57 = vpop.f32.mrb[14].mxu0  ;;  %v3592_v56 = vld [vmem:[#allocation7 + $0x50] sm:$0xff]  }
 0x537   :  { %v1247_v58 = vadd.f32 %v2827_v53, %v1246_v57  ;;  %v3273_v59 = vpop.f32.mrb[15].mxu0  ;;  %v1250_v60 = vadd.f32 %v1244_v55, %v1020_v38  ;;  %3299 = vmatpush3.bf16.msra.mxu0 %v3592_v56  ;;  %v3593_v57 = vld [vmem:[#allocation7 + $0x58] sm:$0xff]   ;;  %v3608_v56 = vld [vmem:[%s4354_s5 + $0x90] sm:$0xff]  }
 0x538   :  { %3300 = vmatprep.subr.bf16.mxu0 %v3794_v9  ;;  %v3595_v59 = vld [vmem:[#allocation7 + $0x68] sm:$0xff]  }
 0x539   :  { %1254 = vadd.xlane.f32.xlu0 %v1250_v60  ;;  %v1251_v61 = vadd.f32 %v1247_v58, %v1021_v39  ;;  %v3594_v58 = vld [vmem:[#allocation7 + $0x60] sm:$0xff]  }
 0x53b   :  { %1256 = vadd.xlane.f32.xlu1 %v1251_v61  ;;  %3301 = vmatpush3.bf16.msra.mxu0 %v3593_v57  ;;  %v3609_v57 = vld [vmem:[%s4354_s5 + $0x98] sm:$0xff]  }
 0x53c   :  { %3302 = vmatprep.subr.bf16.mxu0 %v3794_v9 }
 0x53f   :  { %3303 = vmatpush3.bf16.msra.mxu0 %v3594_v58  ;;  %v3610_v58 = vld [vmem:[%s4354_s5 + $0xa0] sm:$0xff]  }
 0x540   :  { %3304 = vmatprep.subr.bf16.mxu0 %v3794_v9 }
 0x543   :  { %3305 = vmatpush3.bf16.msra.mxu0 %v3595_v59  ;;  %v3611_v59 = vld [vmem:[%s4354_s5 + $0xa8] sm:$0xff]  }
 0x544   :  { %3306 = vmatprep.subr.bf16.mxu0 %v3794_v9 }
 0x5c6   :  { %v1255_v0 = vpop.xlane.xlu0 %1254 }
 0x5c7   :  { %v1258_v2 = vmul.f32 0.03125, %v1255_v0  ;;  %v3600_v0 = vld [vmem:[#allocation8 + $0x50] sm:$0xff]  }
 0x5c8   :  { %v1257_v3 = vpop.xlane.xlu1 %1256 }
 0x5c9   :  { %v1260_v4 = vsub.f32 %v1250_v60, %v1258_v2  ;;  %v1259_v5 = vmul.f32 0.03125, %v1257_v3  ;;  %v3596_v60 = vld [vmem:[#allocation7 + $0x70] sm:$0xff]   ;;  %v3601_v2 = vld [vmem:[#allocation8 + $0x58] sm:$0xff]   ;;  %v3602_v3 = vld [vmem:[#allocation8 + $0x60] sm:$0xff]  }
 0x5ca   :  { %3307 = vmatpush3.bf16.msra.mxu0 %v3596_v60  ;;  %v3612_v60 = vld [vmem:[%s4354_s5 + $0xb0] sm:$0xff]  }
 0x5cb   :  { %v1261_v6 = vsub.f32 %v1251_v61, %v1259_v5  ;;  %v1262_v7 = vmul.f32 %v4032_v1, %v1260_v4  ;;  %v3597_v61 = vld [vmem:[#allocation7 + $0x78] sm:$0xff]   ;;  %3308 = vmatprep.subr.bf16.mxu0 %v3794_v9  ;;  %v3603_v4 = vld [vmem:[#allocation8 + $0x68] sm:$0xff]  }
 0x5cd   :  { %v1264_v8 = vmul.f32 %v1262_v7, %v1262_v7  ;;  %v1263_v10 = vmul.f32 %v4032_v1, %v1261_v6 }
 0x5ce   :  { %3309 = vmatpush3.bf16.msra.mxu0 %v3597_v61  ;;  %v3613_v61 = vld [vmem:[%s4354_s5 + $0xb8] sm:$0xff]  }
 0x5cf   :  { %1266 = vadd.xlane.f32.xlu0 %v1264_v8  ;;  %v1265_v11 = vmul.f32 %v1263_v10, %v1263_v10  ;;  %3334 = vmatprep.subr.bf16.mxu0 %v3794_v9 }
 0x5d1   :  { %1268 = vadd.xlane.f32.xlu1 %v1265_v11 }
 0x65c   :  { %v1267_v18 = vpop.xlane.xlu0 %1266 }
 0x65d   :  { %v1270_v19 = vmul.f32 0.03125, %v1267_v18  ;;  %v2867_v18 = vld [vmem:[%s4357_s8 + $0x1] ss:$0 sm:$0xff] }
 0x65e   :  { %v1269_v20 = vpop.xlane.xlu1 %1268 }
 0x65f   :  { %v1272_v21 = vadd.f32 1e-05, %v1270_v19  ;;  %v1271_v22 = vmul.f32 0.03125, %v1269_v20 }
 0x661   :  { %3666 = vrsqrt.f32 %v1272_v21  ;;  %v1273_v23 = vadd.f32 1e-05, %v1271_v22 }
 0x663   :  { %3668 = vrsqrt.f32 %v1273_v23  ;;  %v3604_v23 = vld [vmem:[#allocation8 + $0x70] sm:$0xff]  }
 0x66b   :  { %v3667_v24 = vpop.eup %3666 }
 0x66c   :  { %v1276_v26 = vmul.f32 %v3667_v24, %v1262_v7  ;;  %v3605_v24 = vld [vmem:[#allocation8 + $0x78] sm:$0xff]  }
 0x66d   :  { %v3669_v27 = vpop.eup %3668 }
 0x66e   :  { %v1277_v28 = vmul.f32 %v3669_v27, %v1263_v10  ;;  %v1284_v29 = vmul.f32 %v2836_v25, %v1276_v26 }
 0x670   :  { %v1285_v31 = vmul.f32 %v2836_v25, %v1277_v28  ;;  %v1292_v32 = vadd.f32 %v2837_v30, %v1284_v29  ;;  %v2869_v25 = vld [vmem:[%s4359_s10 + $0x1] ss:$0 sm:$0xff] }
 0x672   :  { %v1293_v33 = vadd.f32 %v2837_v30, %v1285_v31 }
 0x674   :  { %v1294_v34 = vpack.c.bf16 %v1293_v33, %v1292_v32 }
 0x676   :  { %3291 = vmatmul.mubr.bf16.vlgmr.msra.gmra.mrb[12].mxu1 %v1294_v34 }
 0x677   :  { %3330 = vmatprep.mubr.msk.bf16.mxu1 %vm3795_vm0, %v3794_v9  ;;  %3315 = vmatpush3.bf16.msra.mxu1 %v3598_v62 }
 0x678   :  { %3316 = vmatprep.subr.bf16.mxu1 %v3794_v9 }
 0x67b   :  { %3317 = vmatpush3.bf16.msra.mxu1 %v3599_v63 }
 0x67c   :  { %3318 = vmatprep.subr.bf16.mxu1 %v3794_v9 }
 0x67f   :  { %3319 = vmatpush3.bf16.msra.mxu1 %v3600_v0 }
 0x680   :  { %3320 = vmatprep.subr.bf16.mxu1 %v3794_v9 }
 0x683   :  { %3321 = vmatpush3.bf16.msra.mxu1 %v3601_v2 }
 0x684   :  { %3322 = vmatprep.subr.bf16.mxu1 %v3794_v9 }
 0x687   :  { %3323 = vmatpush3.bf16.msra.mxu1 %v3602_v3 }
 0x688   :  { %3324 = vmatprep.subr.bf16.mxu1 %v3794_v9 }
 0x68b   :  { %3325 = vmatpush3.bf16.msra.mxu1 %v3603_v4 }
 0x68c   :  { %3326 = vmatprep.subr.bf16.mxu1 %v3794_v9 }
 0x68f   :  { %3327 = vmatpush3.bf16.msra.mxu1 %v3604_v23 }
 0x690   :  { %3328 = vmatprep.subr.bf16.mxu1 %v3794_v9 }
 0x693   :  { %3329 = vmatpush3.bf16.msra.mxu1 %v3605_v24 }
 0x694   :  { %3354 = vmatprep.subr.bf16.mxu1 %v3794_v9 }
 0x749   :  { %v1402_v36 = vpop.f32.mrb[12].mxu1 }
 0x74a   :  { %v1403_v37 = vadd.f32 %v2855_v35, %v1402_v36  ;;  %v3292_v38 = vpop.f32.mrb[13].mxu1 }
 0x74b   :  { %v1405_v39 = vpop.f32.mrb[14].mxu1 }
 0x74c   :  { %v1406_v40 = vadd.f32 %v2855_v35, %v1405_v39  ;;  %v3293_v41 = vpop.f32.mrb[15].mxu1  ;;  %v1409_v42 = vadd.f32 %v1403_v37, %v1292_v32  ;;  %v2879_v35 = vld [vmem:[%s4361_s12 + $0x1] ss:$0 sm:$0xff] }
 0x74e   :  { %1415 = vadd.xlane.f32.xlu0 %v1409_v42  ;;  %v1410_v43 = vadd.f32 %v1406_v40, %v1293_v33 }
 0x750   :  { %1417 = vadd.xlane.f32.xlu1 %v1410_v43 }
 0x7db   :  { %v1416_v46 = vpop.xlane.xlu0 %1415 }
 0x7dc   :  { %v1419_v47 = vmul.f32 0.03125, %v1416_v46 }
 0x7dd   :  { %v1418_v48 = vpop.xlane.xlu1 %1417 }
 0x7de   :  { %v1421_v49 = vsub.f32 %v1409_v42, %v1419_v47  ;;  %v1420_v50 = vmul.f32 0.03125, %v1418_v48 }
 0x7e0   :  { %v1422_v51 = vsub.f32 %v1410_v43, %v1420_v50  ;;  %v1423_v52 = vmul.f32 %v4032_v1, %v1421_v49 }
 0x7e2   :  { %v1425_v53 = vmul.f32 %v1423_v52, %v1423_v52  ;;  %v1424_v54 = vmul.f32 %v4032_v1, %v1422_v51 }
 0x7e4   :  { %1427 = vadd.xlane.f32.xlu0 %v1425_v53  ;;  %v1426_v55 = vmul.f32 %v1424_v54, %v1424_v54 }
 0x7e6   :  { %1429 = vadd.xlane.f32.xlu1 %v1426_v55 }
 0x871   :  { %v1428_v5 = vpop.xlane.xlu0 %1427 }
 0x872   :  { %v1431_v6 = vmul.f32 0.03125, %v1428_v5 }
 0x873   :  { %v1430_v7 = vpop.xlane.xlu1 %1429 }
 0x874   :  { %v1433_v8 = vadd.f32 1e-05, %v1431_v6  ;;  %v1432_v10 = vmul.f32 0.03125, %v1430_v7  ;;  %v2890_v6 = vld [vmem:[%s4362_s13 + $0x1] ss:$0 sm:$0xff] }
 0x876   :  { %3670 = vrsqrt.f32 %v1433_v8  ;;  %v1434_v11 = vadd.f32 1e-05, %v1432_v10 }
 0x878   :  { %3672 = vrsqrt.f32 %v1434_v11 }
 0x880   :  { %v3671_v12 = vpop.eup %3670 }
 0x881   :  { %v1437_v14 = vmul.f32 %v3671_v12, %v1423_v52  ;;  %v2891_v12 = vld [vmem:[%s4363_s14 + $0x1] ss:$0 sm:$0xff] }
 0x882   :  { %v3673_v15 = vpop.eup %3672 }
 0x883   :  { %v1438_v16 = vmul.f32 %v3673_v15, %v1424_v54  ;;  %v1445_v17 = vmul.f32 %v2866_v13, %v1437_v14 }
 0x885   :  { %v1446_v19 = vmul.f32 %v2866_v13, %v1438_v16  ;;  %v1453_v20 = vadd.f32 %v2867_v18, %v1445_v17  ;;  %v2909_v17 = vld [vmem:[%s4355_s6 + $0x2] ss:$0 sm:$0xff] }
 0x887   :  { %v1454_v21 = vadd.f32 %v2867_v18, %v1446_v19 }
 0x889   :  { %v1455_v22 = vpack.c.bf16 %v1454_v21, %v1453_v20 }
 0x88b   :  { %3311 = vmatmul.mubr.bf16.vlgmr.msra.gmra.mrb[16].mxu0 %v1455_v22 }
 0x88c   :  { %3350 = vmatprep.mubr.msk.bf16.mxu0 %vm3795_vm0, %v3794_v9  ;;  %3335 = vmatpush3.bf16.msra.mxu0 %v3606_v44  ;;  %v3622_v44 = vld [vmem:[#allocation8 + $0x80] sm:$0xff]  }
 0x88d   :  { %3336 = vmatprep.subr.bf16.mxu0 %v3794_v9 }
 0x890   :  { %3337 = vmatpush3.bf16.msra.mxu0 %v3607_v45  ;;  %v3623_v45 = vld [vmem:[#allocation8 + $0x88] sm:$0xff]  }
 0x891   :  { %3338 = vmatprep.subr.bf16.mxu0 %v3794_v9 }
 0x894   :  { %3339 = vmatpush3.bf16.msra.mxu0 %v3608_v56 }
 0x895   :  { %3340 = vmatprep.subr.bf16.mxu0 %v3794_v9 }
 0x898   :  { %3341 = vmatpush3.bf16.msra.mxu0 %v3609_v57  ;;  %v2920_v57 = vld [vmem:[%s4356_s7 + $0x2] ss:$0 sm:$0xff] }
 0x899   :  { %3342 = vmatprep.subr.bf16.mxu0 %v3794_v9 }
 0x89c   :  { %3343 = vmatpush3.bf16.msra.mxu0 %v3610_v58 }
 0x89d   :  { %3344 = vmatprep.subr.bf16.mxu0 %v3794_v9 }
 0x8a0   :  { %3345 = vmatpush3.bf16.msra.mxu0 %v3611_v59 }
 0x8a1   :  { %3346 = vmatprep.subr.bf16.mxu0 %v3794_v9 }
 0x8a4   :  { %3347 = vmatpush3.bf16.msra.mxu0 %v3612_v60 }
 0x8a5   :  { %3348 = vmatprep.subr.bf16.mxu0 %v3794_v9 }
 0x8a8   :  { %3349 = vmatpush3.bf16.msra.mxu0 %v3613_v61 }
 0x8a9   :  { %3374 = vmatprep.subr.bf16.mxu0 %v3794_v9 }
 0x95e   :  { %v1563_v26 = vpop.f32.mrb[16].mxu0 }
 0x95f   :  { %v1564_v27 = vadd.f32 %v2869_v25, %v1563_v26  ;;  %v3312_v28 = vpop.f32.mrb[17].mxu0  ;;  %v3614_v26 = vld [vmem:[#allocation7 + $0x80] sm:$0xff]  }
 0x960   :  { %v1566_v29 = vpop.f32.mrb[18].mxu0 }
 0x961   :  { %v1567_v30 = vadd.f32 %v2869_v25, %v1566_v29  ;;  %v3313_v31 = vpop.f32.mrb[19].mxu0  ;;  %v1570_v32 = vmax.f32 %v1564_v27, 0.0  ;;  %v3615_v27 = vld [vmem:[#allocation7 + $0x88] sm:$0xff]  }
 0x963   :  { %v1571_v33 = vmax.f32 %v1567_v30, 0.0 }
 0x965   :  { %v1572_v34 = vpack.c.bf16 %v1571_v33, %v1570_v32 }
 0x967   :  { %3331 = vmatmul.mubr.bf16.vlgmr.msra.gmra.mrb[16].mxu1 %v1572_v34 }
 0x968   :  { %3370 = vmatprep.mubr.msk.bf16.mxu1 %vm3795_vm0, %v3794_v9  ;;  %3355 = vmatpush3.bf16.msra.mxu1 %v3614_v26  ;;  %v3630_v26 = vld [vmem:[%s4354_s5 + $0xc0] sm:$0xff]  }
 0x969   :  { %3356 = vmatprep.subr.bf16.mxu1 %v3794_v9 }
 0x96c   :  { %3357 = vmatpush3.bf16.msra.mxu1 %v3615_v27  ;;  %v3631_v27 = vld [vmem:[%s4354_s5 + $0xc8] sm:$0xff]  }
 0x96d   :  { %3358 = vmatprep.subr.bf16.mxu1 %v3794_v9 }
 0xa3a   :  { %v1680_v36 = vpop.f32.mrb[16].mxu1 }
 0xa3b   :  { %v1681_v37 = vadd.f32 %v2879_v35, %v1680_v36  ;;  %v3332_v38 = vpop.f32.mrb[17].mxu1 }
 0xa3c   :  { %v1683_v39 = vpop.f32.mrb[18].mxu1  ;;  %v3616_v38 = vld [vmem:[#allocation7 + $0x90] sm:$0xff]  }
 0xa3d   :  { %v1684_v40 = vadd.f32 %v2879_v35, %v1683_v39  ;;  %v3333_v41 = vpop.f32.mrb[19].mxu1  ;;  %v1687_v42 = vadd.f32 %v1681_v37, %v1453_v20  ;;  %3359 = vmatpush3.bf16.msra.mxu1 %v3616_v38  ;;  %v3617_v39 = vld [vmem:[#allocation7 + $0x98] sm:$0xff]   ;;  %v3632_v38 = vld [vmem:[%s4354_s5 + $0xd0] sm:$0xff]  }
 0xa3e   :  { %3360 = vmatprep.subr.bf16.mxu1 %v3794_v9  ;;  %v3619_v41 = vld [vmem:[#allocation7 + $0xa8] sm:$0xff]  }
 0xa3f   :  { %1693 = vadd.xlane.f32.xlu0 %v1687_v42  ;;  %v1688_v43 = vadd.f32 %v1684_v40, %v1454_v21  ;;  %v3618_v40 = vld [vmem:[#allocation7 + $0xa0] sm:$0xff]  }
 0xa41   :  { %1695 = vadd.xlane.f32.xlu1 %v1688_v43  ;;  %3361 = vmatpush3.bf16.msra.mxu1 %v3617_v39  ;;  %v3633_v39 = vld [vmem:[%s4354_s5 + $0xd8] sm:$0xff]  }
 0xa42   :  { %3362 = vmatprep.subr.bf16.mxu1 %v3794_v9 }
 0xa45   :  { %3363 = vmatpush3.bf16.msra.mxu1 %v3618_v40  ;;  %v3634_v40 = vld [vmem:[%s4354_s5 + $0xe0] sm:$0xff]  }
 0xa46   :  { %3364 = vmatprep.subr.bf16.mxu1 %v3794_v9 }
 0xa49   :  { %3365 = vmatpush3.bf16.msra.mxu1 %v3619_v41  ;;  %v3635_v41 = vld [vmem:[%s4354_s5 + $0xe8] sm:$0xff]  }
 0xa4a   :  { %3366 = vmatprep.subr.bf16.mxu1 %v3794_v9 }
 0xacc   :  { %v1694_v46 = vpop.xlane.xlu0 %1693 }
 0xacd   :  { %v1697_v47 = vmul.f32 0.03125, %v1694_v46  ;;  %v3624_v46 = vld [vmem:[#allocation8 + $0x90] sm:$0xff]  }
 0xace   :  { %v1696_v48 = vpop.xlane.xlu1 %1695 }
 0xacf   :  { %v1699_v49 = vsub.f32 %v1687_v42, %v1697_v47  ;;  %v1698_v50 = vmul.f32 0.03125, %v1696_v48  ;;  %v3620_v42 = vld [vmem:[#allocation7 + $0xb0] sm:$0xff]   ;;  %v3625_v47 = vld [vmem:[#allocation8 + $0x98] sm:$0xff]   ;;  %v3626_v48 = vld [vmem:[#allocation8 + $0xa0] sm:$0xff]  }
 0xad0   :  { %3367 = vmatpush3.bf16.msra.mxu1 %v3620_v42  ;;  %v3636_v42 = vld [vmem:[%s4354_s5 + $0xf0] sm:$0xff]  }
 0xad1   :  { %v1700_v51 = vsub.f32 %v1688_v43, %v1698_v50  ;;  %v1701_v52 = vmul.f32 %v4032_v1, %v1699_v49  ;;  %v3621_v43 = vld [vmem:[#allocation7 + $0xb8] sm:$0xff]   ;;  %3368 = vmatprep.subr.bf16.mxu1 %v3794_v9  ;;  %v3627_v49 = vld [vmem:[#allocation8 + $0xa8] sm:$0xff]  }
 0xad3   :  { %v1703_v53 = vmul.f32 %v1701_v52, %v1701_v52  ;;  %v1702_v54 = vmul.f32 %v4032_v1, %v1700_v51 }
 0xad4   :  { %3369 = vmatpush3.bf16.msra.mxu1 %v3621_v43  ;;  %v3637_v43 = vld [vmem:[%s4354_s5 + $0xf8] sm:$0xff]  }
 0xad5   :  { %1705 = vadd.xlane.f32.xlu0 %v1703_v53  ;;  %v1704_v55 = vmul.f32 %v1702_v54, %v1702_v54  ;;  %3394 = vmatprep.subr.bf16.mxu1 %v3794_v9 }
 0xad7   :  { %1707 = vadd.xlane.f32.xlu1 %v1704_v55 }
 0xb62   :  { %v1706_v62 = vpop.xlane.xlu0 %1705 }
 0xb63   :  { %v1709_v63 = vmul.f32 0.03125, %v1706_v62  ;;  %v2921_v62 = vld [vmem:[%s4357_s8 + $0x2] ss:$0 sm:$0xff] }
 0xb64   :  { %v1708_v0 = vpop.xlane.xlu1 %1707 }
 0xb65   :  { %v1711_v2 = vadd.f32 1e-05, %v1709_v63  ;;  %v1710_v3 = vmul.f32 0.03125, %v1708_v0 }
 0xb67   :  { %3674 = vrsqrt.f32 %v1711_v2  ;;  %v1712_v4 = vadd.f32 1e-05, %v1710_v3 }
 0xb69   :  { %3676 = vrsqrt.f32 %v1712_v4  ;;  %v3628_v4 = vld [vmem:[#allocation8 + $0xb0] sm:$0xff]  }
 0xb71   :  { %v3675_v5 = vpop.eup %3674 }
 0xb72   :  { %v1715_v7 = vmul.f32 %v3675_v5, %v1701_v52  ;;  %v3629_v5 = vld [vmem:[#allocation8 + $0xb8] sm:$0xff]  }
 0xb73   :  { %v3677_v8 = vpop.eup %3676 }
 0xb74   :  { %v1716_v10 = vmul.f32 %v3677_v8, %v1702_v54  ;;  %v1723_v11 = vmul.f32 %v2890_v6, %v1715_v7 }
 0xb76   :  { %v1724_v13 = vmul.f32 %v2890_v6, %v1716_v10  ;;  %v1731_v14 = vadd.f32 %v2891_v12, %v1723_v11  ;;  %v2923_v6 = vld [vmem:[%s4359_s10 + $0x2] ss:$0 sm:$0xff] }
 0xb78   :  { %v1732_v15 = vadd.f32 %v2891_v12, %v1724_v13 }
 0xb7a   :  { %v1733_v16 = vpack.c.bf16 %v1732_v15, %v1731_v14 }
 0xb7c   :  { %3351 = vmatmul.mubr.bf16.vlgmr.msra.gmra.mrb[20].mxu0 %v1733_v16 }
 0xb7d   :  { %3390 = vmatprep.mubr.msk.bf16.mxu0 %vm3795_vm0, %v3794_v9  ;;  %3375 = vmatpush3.bf16.msra.mxu0 %v3622_v44 }
 0xb7e   :  { %3376 = vmatprep.subr.bf16.mxu0 %v3794_v9 }
 0xb81   :  { %3377 = vmatpush3.bf16.msra.mxu0 %v3623_v45 }
 0xb82   :  { %3378 = vmatprep.subr.bf16.mxu0 %v3794_v9 }
 0xb85   :  { %3379 = vmatpush3.bf16.msra.mxu0 %v3624_v46 }
 0xb86   :  { %3380 = vmatprep.subr.bf16.mxu0 %v3794_v9 }
 0xb89   :  { %3381 = vmatpush3.bf16.msra.mxu0 %v3625_v47 }
 0xb8a   :  { %3382 = vmatprep.subr.bf16.mxu0 %v3794_v9 }
 0xb8d   :  { %3383 = vmatpush3.bf16.msra.mxu0 %v3626_v48 }
 0xb8e   :  { %3384 = vmatprep.subr.bf16.mxu0 %v3794_v9 }
 0xb91   :  { %3385 = vmatpush3.bf16.msra.mxu0 %v3627_v49 }
 0xb92   :  { %3386 = vmatprep.subr.bf16.mxu0 %v3794_v9 }
 0xb95   :  { %3387 = vmatpush3.bf16.msra.mxu0 %v3628_v4 }
 0xb96   :  { %3388 = vmatprep.subr.bf16.mxu0 %v3794_v9 }
 0xb99   :  { %3389 = vmatpush3.bf16.msra.mxu0 %v3629_v5 }
 0xb9a   :  { %3414 = vmatprep.subr.bf16.mxu0 %v3794_v9 }
 0xc4f   :  { %v1841_v18 = vpop.f32.mrb[20].mxu0 }
 0xc50   :  { %v1842_v19 = vadd.f32 %v2909_v17, %v1841_v18  ;;  %v3352_v20 = vpop.f32.mrb[21].mxu0 }
 0xc51   :  { %v1844_v21 = vpop.f32.mrb[22].mxu0 }
 0xc52   :  { %v1845_v22 = vadd.f32 %v2909_v17, %v1844_v21  ;;  %v3353_v23 = vpop.f32.mrb[23].mxu0  ;;  %v1848_v24 = vadd.f32 %v1842_v19, %v1731_v14  ;;  %v2933_v17 = vld [vmem:[%s4361_s12 + $0x2] ss:$0 sm:$0xff] }
 0xc54   :  { %1854 = vadd.xlane.f32.xlu0 %v1848_v24  ;;  %v1849_v25 = vadd.f32 %v1845_v22, %v1732_v15 }
 0xc56   :  { %1856 = vadd.xlane.f32.xlu1 %v1849_v25 }
 0xce1   :  { %v1855_v28 = vpop.xlane.xlu0 %1854 }
 0xce2   :  { %v1858_v29 = vmul.f32 0.03125, %v1855_v28 }
 0xce3   :  { %v1857_v30 = vpop.xlane.xlu1 %1856 }
 0xce4   :  { %v1860_v31 = vsub.f32 %v1848_v24, %v1858_v29  ;;  %v1859_v32 = vmul.f32 0.03125, %v1857_v30 }
 0xce6   :  { %v1861_v33 = vsub.f32 %v1849_v25, %v1859_v32  ;;  %v1862_v34 = vmul.f32 %v4032_v1, %v1860_v31 }
 0xce8   :  { %v1864_v35 = vmul.f32 %v1862_v34, %v1862_v34  ;;  %v1863_v36 = vmul.f32 %v4032_v1, %v1861_v33 }
 0xcea   :  { %1866 = vadd.xlane.f32.xlu0 %v1864_v35  ;;  %v1865_v37 = vmul.f32 %v1863_v36, %v1863_v36 }
 0xcec   :  { %1868 = vadd.xlane.f32.xlu1 %v1865_v37 }
 0xd77   :  { %v1867_v50 = vpop.xlane.xlu0 %1866 }
 0xd78   :  { %v1870_v51 = vmul.f32 0.03125, %v1867_v50 }
 0xd79   :  { %v1869_v52 = vpop.xlane.xlu1 %1868 }
 0xd7a   :  { %v1872_v53 = vadd.f32 1e-05, %v1870_v51  ;;  %v1871_v54 = vmul.f32 0.03125, %v1869_v52  ;;  %v2944_v51 = vld [vmem:[%s4362_s13 + $0x2] ss:$0 sm:$0xff] }
 0xd7c   :  { %3678 = vrsqrt.f32 %v1872_v53  ;;  %v1873_v55 = vadd.f32 1e-05, %v1871_v54 }
 0xd7e   :  { %3680 = vrsqrt.f32 %v1873_v55 }
 0xd86   :  { %v3679_v56 = vpop.eup %3678 }
 0xd87   :  { %v1876_v58 = vmul.f32 %v3679_v56, %v1862_v34  ;;  %v2945_v56 = vld [vmem:[%s4363_s14 + $0x2] ss:$0 sm:$0xff] }
 0xd88   :  { %v3681_v59 = vpop.eup %3680 }
 0xd89   :  { %v1877_v60 = vmul.f32 %v3681_v59, %v1863_v36  ;;  %v1884_v61 = vmul.f32 %v2920_v57, %v1876_v58 }
 0xd8b   :  { %v1885_v63 = vmul.f32 %v2920_v57, %v1877_v60  ;;  %v1892_v0 = vadd.f32 %v2921_v62, %v1884_v61  ;;  %v2963_v61 = vld [vmem:[%s4355_s6 + $0x3] ss:$0 sm:$0xff] }
 0xd8d   :  { %v1893_v2 = vadd.f32 %v2921_v62, %v1885_v63 }
 0xd8f   :  { %v1894_v3 = vpack.c.bf16 %v1893_v2, %v1892_v0 }
 0xd91   :  { %3371 = vmatmul.mubr.bf16.vlgmr.msra.gmra.mrb[20].mxu1 %v1894_v3 }
 0xd92   :  { %3410 = vmatprep.mubr.msk.bf16.mxu1 %vm3795_vm0, %v3794_v9  ;;  %3395 = vmatpush3.bf16.msra.mxu1 %v3630_v26  ;;  %v3646_v26 = vld [vmem:[#allocation8 + $0xc0] sm:$0xff]  }
 0xd93   :  { %3396 = vmatprep.subr.bf16.mxu1 %v3794_v9 }
 0xd96   :  { %3397 = vmatpush3.bf16.msra.mxu1 %v3631_v27  ;;  %v3647_v27 = vld [vmem:[#allocation8 + $0xc8] sm:$0xff]  }
 0xd97   :  { %3398 = vmatprep.subr.bf16.mxu1 %v3794_v9 }
 0xd9a   :  { %3399 = vmatpush3.bf16.msra.mxu1 %v3632_v38 }
 0xd9b   :  { %3400 = vmatprep.subr.bf16.mxu1 %v3794_v9 }
 0xd9e   :  { %3401 = vmatpush3.bf16.msra.mxu1 %v3633_v39  ;;  %v2974_v39 = vld [vmem:[%s4356_s7 + $0x3] ss:$0 sm:$0xff] }
 0xd9f   :  { %3402 = vmatprep.subr.bf16.mxu1 %v3794_v9 }
 0xda2   :  { %3403 = vmatpush3.bf16.msra.mxu1 %v3634_v40 }
 0xda3   :  { %3404 = vmatprep.subr.bf16.mxu1 %v3794_v9 }
 0xda6   :  { %3405 = vmatpush3.bf16.msra.mxu1 %v3635_v41 }
 0xda7   :  { %3406 = vmatprep.subr.bf16.mxu1 %v3794_v9 }
 0xdaa   :  { %3407 = vmatpush3.bf16.msra.mxu1 %v3636_v42 }
 0xdab   :  { %3408 = vmatprep.subr.bf16.mxu1 %v3794_v9 }
 0xdae   :  { %3409 = vmatpush3.bf16.msra.mxu1 %v3637_v43 }
 0xdaf   :  { %3434 = vmatprep.subr.bf16.mxu1 %v3794_v9 }
 0xe64   :  { %v2002_v7 = vpop.f32.mrb[20].mxu1 }
 0xe65   :  { %v2003_v8 = vadd.f32 %v2923_v6, %v2002_v7  ;;  %v3372_v10 = vpop.f32.mrb[21].mxu1  ;;  %v3638_v7 = vld [vmem:[#allocation7 + $0xc0] sm:$0xff]  }
 0xe66   :  { %v2005_v11 = vpop.f32.mrb[22].mxu1 }
 0xe67   :  { %v2006_v12 = vadd.f32 %v2923_v6, %v2005_v11  ;;  %v3373_v13 = vpop.f32.mrb[23].mxu1  ;;  %v2009_v14 = vmax.f32 %v2003_v8, 0.0  ;;  %v3639_v8 = vld [vmem:[#allocation7 + $0xc8] sm:$0xff]  }
 0xe69   :  { %v2010_v15 = vmax.f32 %v2006_v12, 0.0 }
 0xe6b   :  { %v2011_v16 = vpack.c.bf16 %v2010_v15, %v2009_v14 }
 0xe6d   :  { %3391 = vmatmul.mubr.bf16.vlgmr.msra.gmra.mrb[24].mxu0 %v2011_v16 }
 0xe6e   :  { %3430 = vmatprep.mubr.msk.bf16.mxu0 %vm3795_vm0, %v3794_v9  ;;  %3415 = vmatpush3.bf16.msra.mxu0 %v3638_v7  ;;  %v3654_v7 = vld [vmem:[%s4364_s15] sm:$0xff]  }
 0xe6f   :  { %3416 = vmatprep.subr.bf16.mxu0 %v3794_v9 }
 0xe72   :  { %3417 = vmatpush3.bf16.msra.mxu0 %v3639_v8  ;;  %v3655_v8 = vld [vmem:[%s4364_s15 + $0x8] sm:$0xff]  }
 0xe73   :  { %3418 = vmatprep.subr.bf16.mxu0 %v3794_v9 }
 0xf40   :  { %v2119_v18 = vpop.f32.mrb[24].mxu0 }
 0xf41   :  { %v2120_v19 = vadd.f32 %v2933_v17, %v2119_v18  ;;  %v3392_v20 = vpop.f32.mrb[25].mxu0 }
 0xf42   :  { %v2122_v21 = vpop.f32.mrb[26].mxu0  ;;  %v3640_v20 = vld [vmem:[#allocation7 + $0xd0] sm:$0xff]  }
 0xf43   :  { %v2123_v22 = vadd.f32 %v2933_v17, %v2122_v21  ;;  %v3393_v23 = vpop.f32.mrb[27].mxu0  ;;  %v2126_v24 = vadd.f32 %v2120_v19, %v1892_v0  ;;  %3419 = vmatpush3.bf16.msra.mxu0 %v3640_v20  ;;  %v3641_v21 = vld [vmem:[#allocation7 + $0xd8] sm:$0xff]   ;;  %v3656_v20 = vld [vmem:[%s4364_s15 + $0x10] sm:$0xff]  }
 0xf44   :  { %3420 = vmatprep.subr.bf16.mxu0 %v3794_v9  ;;  %v3643_v23 = vld [vmem:[#allocation7 + $0xe8] sm:$0xff]  }
 0xf45   :  { %2132 = vadd.xlane.f32.xlu0 %v2126_v24  ;;  %v2127_v25 = vadd.f32 %v2123_v22, %v1893_v2  ;;  %v3642_v22 = vld [vmem:[#allocation7 + $0xe0] sm:$0xff]  }
 0xf47   :  { %2134 = vadd.xlane.f32.xlu1 %v2127_v25  ;;  %3421 = vmatpush3.bf16.msra.mxu0 %v3641_v21  ;;  %v3657_v21 = vld [vmem:[%s4364_s15 + $0x18] sm:$0xff]  }
 0xf48   :  { %3422 = vmatprep.subr.bf16.mxu0 %v3794_v9 }
 0xf4b   :  { %3423 = vmatpush3.bf16.msra.mxu0 %v3642_v22  ;;  %v3659_v22 = vld [vmem:[%s4364_s15 + $0x28] sm:$0xff]  }
 0xf4c   :  { %3424 = vmatprep.subr.bf16.mxu0 %v3794_v9 }
 0xf4f   :  { %3425 = vmatpush3.bf16.msra.mxu0 %v3643_v23  ;;  %v3660_v23 = vld [vmem:[%s4364_s15 + $0x30] sm:$0xff]  }
 0xf50   :  { %3426 = vmatprep.subr.bf16.mxu0 %v3794_v9 }
 0xfd2   :  { %v2133_v28 = vpop.xlane.xlu0 %2132 }
 0xfd3   :  { %v2136_v29 = vmul.f32 0.03125, %v2133_v28  ;;  %v3648_v28 = vld [vmem:[#allocation8 + $0xd0] sm:$0xff]  }
 0xfd4   :  { %v2135_v30 = vpop.xlane.xlu1 %2134 }
 0xfd5   :  { %v2138_v31 = vsub.f32 %v2126_v24, %v2136_v29  ;;  %v2137_v32 = vmul.f32 0.03125, %v2135_v30  ;;  %v3644_v24 = vld [vmem:[#allocation7 + $0xf0] sm:$0xff]   ;;  %v3649_v29 = vld [vmem:[#allocation8 + $0xd8] sm:$0xff]   ;;  %v3650_v30 = vld [vmem:[#allocation8 + $0xe0] sm:$0xff]  }
 0xfd6   :  { %3427 = vmatpush3.bf16.msra.mxu0 %v3644_v24  ;;  %v3661_v24 = vld [vmem:[%s4364_s15 + $0x38] sm:$0xff]  }
 0xfd7   :  { %v2139_v33 = vsub.f32 %v2127_v25, %v2137_v32  ;;  %v2140_v34 = vmul.f32 %v4032_v1, %v2138_v31  ;;  %v3645_v25 = vld [vmem:[#allocation7 + $0xf8] sm:$0xff]   ;;  %3428 = vmatprep.subr.bf16.mxu0 %v3794_v9  ;;  %v3651_v31 = vld [vmem:[#allocation8 + $0xe8] sm:$0xff]  }
 0xfd9   :  { %v2142_v35 = vmul.f32 %v2140_v34, %v2140_v34  ;;  %v2141_v36 = vmul.f32 %v4032_v1, %v2139_v33 }
 0xfda   :  { %3429 = vmatpush3.bf16.msra.mxu0 %v3645_v25 }
 0xfdb   :  { %2144 = vadd.xlane.f32.xlu0 %v2142_v35  ;;  %v2143_v37 = vmul.f32 %v2141_v36, %v2141_v36  ;;  %3454 = vmatprep.subr.bf16.mxu0 %v3794_v9 }
 0xfdd   :  { %2146 = vadd.xlane.f32.xlu1 %v2143_v37 }
0x1068   :  { %v2145_v44 = vpop.xlane.xlu0 %2144 }
0x1069   :  { %v2148_v45 = vmul.f32 0.03125, %v2145_v44  ;;  %v2975_v44 = vld [vmem:[%s4357_s8 + $0x3] ss:$0 sm:$0xff] }
0x106a   :  { %v2147_v46 = vpop.xlane.xlu1 %2146 }
0x106b   :  { %v2150_v47 = vadd.f32 1e-05, %v2148_v45  ;;  %v2149_v48 = vmul.f32 0.03125, %v2147_v46 }
0x106d   :  { %3682 = vrsqrt.f32 %v2150_v47  ;;  %v2151_v49 = vadd.f32 1e-05, %v2149_v48 }
0x106f   :  { %3684 = vrsqrt.f32 %v2151_v49  ;;  %v3652_v49 = vld [vmem:[#allocation8 + $0xf0] sm:$0xff]  }
0x1077   :  { %v3683_v50 = vpop.eup %3682 }
0x1078   :  { %v2154_v52 = vmul.f32 %v3683_v50, %v2140_v34  ;;  %v3653_v50 = vld [vmem:[#allocation8 + $0xf8] sm:$0xff]  }
0x1079   :  { %v3685_v53 = vpop.eup %3684 }
0x107a   :  { %v2155_v54 = vmul.f32 %v3685_v53, %v2141_v36  ;;  %v2162_v55 = vmul.f32 %v2944_v51, %v2154_v52 }
0x107c   :  { %v2163_v57 = vmul.f32 %v2944_v51, %v2155_v54  ;;  %v2170_v58 = vadd.f32 %v2945_v56, %v2162_v55  ;;  %v2977_v51 = vld [vmem:[%s4359_s10 + $0x3] ss:$0 sm:$0xff] }
0x107e   :  { %v2171_v59 = vadd.f32 %v2945_v56, %v2163_v57 }
0x1080   :  { %v2172_v60 = vpack.c.bf16 %v2171_v59, %v2170_v58 }
0x1082   :  { %3411 = vmatmul.mubr.bf16.vlgmr.msra.gmra.mrb[24].mxu1 %v2172_v60 }
0x1083   :  { %3450 = vmatprep.mubr.msk.bf16.mxu1 %vm3795_vm0, %v3794_v9  ;;  %3435 = vmatpush3.bf16.msra.mxu1 %v3646_v26 }
0x1084   :  { %3436 = vmatprep.subr.bf16.mxu1 %v3794_v9 }
0x1087   :  { %3437 = vmatpush3.bf16.msra.mxu1 %v3647_v27 }
0x1088   :  { %3438 = vmatprep.subr.bf16.mxu1 %v3794_v9 }
0x108b   :  { %3439 = vmatpush3.bf16.msra.mxu1 %v3648_v28 }
0x108c   :  { %3440 = vmatprep.subr.bf16.mxu1 %v3794_v9 }
0x108f   :  { %3441 = vmatpush3.bf16.msra.mxu1 %v3649_v29 }
0x1090   :  { %3442 = vmatprep.subr.bf16.mxu1 %v3794_v9 }
0x1093   :  { %3443 = vmatpush3.bf16.msra.mxu1 %v3650_v30 }
0x1094   :  { %3444 = vmatprep.subr.bf16.mxu1 %v3794_v9 }
0x1097   :  { %3445 = vmatpush3.bf16.msra.mxu1 %v3651_v31 }
0x1098   :  { %3446 = vmatprep.subr.bf16.mxu1 %v3794_v9 }
0x109b   :  { %3447 = vmatpush3.bf16.msra.mxu1 %v3652_v49 }
0x109c   :  { %3448 = vmatprep.subr.bf16.mxu1 %v3794_v9 }
0x109f   :  { %3449 = vmatpush3.bf16.msra.mxu1 %v3653_v50 }
0x1155   :  { %v2280_v62 = vpop.f32.mrb[24].mxu1 }
0x1156   :  { %v2281_v63 = vadd.f32 %v2963_v61, %v2280_v62  ;;  %v3412_v0 = vpop.f32.mrb[25].mxu1 }
0x1157   :  { %v2283_v2 = vpop.f32.mrb[26].mxu1 }
0x1158   :  { %v2284_v3 = vadd.f32 %v2963_v61, %v2283_v2  ;;  %v3413_v4 = vpop.f32.mrb[27].mxu1  ;;  %v2287_v5 = vadd.f32 %v2281_v63, %v2170_v58  ;;  %v2987_v61 = vld [vmem:[%s4361_s12 + $0x3] ss:$0 sm:$0xff] }
0x115a   :  { %2293 = vadd.xlane.f32.xlu0 %v2287_v5  ;;  %v2288_v6 = vadd.f32 %v2284_v3, %v2171_v59 }
0x115c   :  { %2295 = vadd.xlane.f32.xlu1 %v2288_v6 }
0x11e7   :  { %v2294_v10 = vpop.xlane.xlu0 %2293 }
0x11e8   :  { %v2297_v11 = vmul.f32 0.03125, %v2294_v10 }
0x11e9   :  { %v2296_v12 = vpop.xlane.xlu1 %2295 }
0x11ea   :  { %v2299_v13 = vsub.f32 %v2287_v5, %v2297_v11  ;;  %v2298_v14 = vmul.f32 0.03125, %v2296_v12 }
0x11ec   :  { %v2300_v15 = vsub.f32 %v2288_v6, %v2298_v14  ;;  %v2301_v16 = vmul.f32 %v4032_v1, %v2299_v13 }
0x11ee   :  { %v2303_v17 = vmul.f32 %v2301_v16, %v2301_v16  ;;  %v2302_v18 = vmul.f32 %v4032_v1, %v2300_v15 }
0x11f0   :  { %2305 = vadd.xlane.f32.xlu0 %v2303_v17  ;;  %v2304_v19 = vmul.f32 %v2302_v18, %v2302_v18 }
0x11f2   :  { %2307 = vadd.xlane.f32.xlu1 %v2304_v19 }
0x127d   :  { %v2306_v32 = vpop.xlane.xlu0 %2305 }
0x127e   :  { %v2309_v33 = vmul.f32 0.03125, %v2306_v32  ;;  %v2998_v32 = vld [vmem:[%s4362_s13 + $0x3] ss:$0 sm:$0xff] }
0x127f   :  { %v2308_v34 = vpop.xlane.xlu1 %2307 }
0x1280   :  { %v2311_v35 = vadd.f32 1e-05, %v2309_v33  ;;  %v2310_v36 = vmul.f32 0.03125, %v2308_v34 }
0x1282   :  { %3686 = vrsqrt.f32 %v2311_v35  ;;  %v2312_v37 = vadd.f32 1e-05, %v2310_v36 }
0x1284   :  { %3688 = vrsqrt.f32 %v2312_v37 }
0x128c   :  { %v3687_v38 = vpop.eup %3686 }
0x128d   :  { %v2315_v40 = vmul.f32 %v3687_v38, %v2301_v16 }
0x128e   :  { %v3689_v41 = vpop.eup %3688 }
0x128f   :  { %v2316_v42 = vmul.f32 %v3689_v41, %v2302_v18  ;;  %v2323_v43 = vmul.f32 %v2974_v39, %v2315_v40  ;;  %v3000_v41 = vld [vmem:[%s4365_s16] ss:$0 sm:$0xff] }
0x1291   :  { %v2324_v45 = vmul.f32 %v2974_v39, %v2316_v42  ;;  %v2331_v46 = vadd.f32 %v2975_v44, %v2323_v43 }
0x1293   :  { %v2332_v47 = vadd.f32 %v2975_v44, %v2324_v45 }
0x1295   :  { %v2333_v48 = vpack.c.bf16 %v2332_v47, %v2331_v46 }
0x1297   :  { %3431 = vmatmul.mubr.bf16.vlgmr.msra.gmra.mrb[28].mxu0 %v2333_v48 }
0x1298   :  { %3470 = vmatprep.mubr.msk.bf16.mxu0 %vm3795_vm0, %v3794_v9  ;;  %3455 = vmatpush3.bf16.msra.mxu0 %v3654_v7 }
0x1299   :  { %3456 = vmatprep.subr.bf16.mxu0 %v3794_v9 }
0x129c   :  { %3457 = vmatpush3.bf16.msra.mxu0 %v3655_v8 }
0x129d   :  { %3458 = vmatprep.subr.bf16.mxu0 %v3794_v9 }
0x12a0   :  { %3459 = vmatpush3.bf16.msra.mxu0 %v3656_v20 }
0x12a1   :  { %3460 = vmatprep.subr.bf16.mxu0 %v3794_v9 }
0x12a4   :  { %3461 = vmatpush3.bf16.msra.mxu0 %v3657_v21 }
0x12a5   :  { %3462 = vmatprep.subr.bf16.mxu0 %v3794_v9 }
0x136a   :  { %v2441_v52 = vpop.f32.mrb[28].mxu0 }
0x136b   :  { %v2442_v53 = vadd.f32 %v2977_v51, %v2441_v52  ;;  %v3432_v54 = vpop.f32.mrb[29].mxu0 }
0x136c   :  { %v2444_v55 = vpop.f32.mrb[30].mxu0 }
0x136d   :  { %v2445_v56 = vadd.f32 %v2977_v51, %v2444_v55  ;;  %v3433_v57 = vpop.f32.mrb[31].mxu0  ;;  %v2448_v58 = vmax.f32 %v2442_v53, 0.0 }
0x136f   :  { %v2449_v59 = vmax.f32 %v2445_v56, 0.0 }
0x1371   :  { %v2450_v60 = vpack.c.bf16 %v2449_v59, %v2448_v58 }
0x1373   :  { %3451 = vmatmul.mubr.bf16.vlgmr.msra.gmra.mrb[28].mxu1 %v2450_v60 }
0x1446   :  { %v2558_v62 = vpop.f32.mrb[28].mxu1 }
0x1447   :  { %v2559_v63 = vadd.f32 %v2987_v61, %v2558_v62  ;;  %v3452_v0 = vpop.f32.mrb[29].mxu1 }
0x1448   :  { %v2561_v2 = vpop.f32.mrb[30].mxu1 }
0x1449   :  { %v2562_v3 = vadd.f32 %v2987_v61, %v2561_v2  ;;  %v3453_v4 = vpop.f32.mrb[31].mxu1  ;;  %v2565_v5 = vadd.f32 %v2559_v63, %v2331_v46 }
0x144b   :  { %2571 = vadd.xlane.f32.xlu0 %v2565_v5  ;;  %v2566_v6 = vadd.f32 %v2562_v3, %v2332_v47 }
0x144d   :  { %2573 = vadd.xlane.f32.xlu1 %v2566_v6 }
0x14d8   :  { %v2572_v10 = vpop.xlane.xlu0 %2571 }
0x14d9   :  { %v2575_v11 = vmul.f32 0.03125, %v2572_v10 }
0x14da   :  { %v2574_v12 = vpop.xlane.xlu1 %2573 }
0x14db   :  { %v2577_v13 = vsub.f32 %v2565_v5, %v2575_v11  ;;  %v2576_v14 = vmul.f32 0.03125, %v2574_v12 }
0x14dd   :  { %v2578_v15 = vsub.f32 %v2566_v6, %v2576_v14  ;;  %v2579_v16 = vmul.f32 %v4032_v1, %v2577_v13 }
0x14df   :  { %v2581_v17 = vmul.f32 %v2579_v16, %v2579_v16  ;;  %v2580_v18 = vmul.f32 %v4032_v1, %v2578_v15  ;;  %v3658_v1 = vld [vmem:[%s4364_s15 + $0x20] sm:$0xff]  }
0x14e0   :  { %3463 = vmatpush3.bf16.msra.mxu0 %v3658_v1 }
0x14e1   :  { %2583 = vadd.xlane.f32.xlu0 %v2581_v17  ;;  %v2582_v19 = vmul.f32 %v2580_v18, %v2580_v18  ;;  %3464 = vmatprep.subr.bf16.mxu0 %v3794_v9 }
0x14e3   :  { %2585 = vadd.xlane.f32.xlu1 %v2582_v19 }
0x14e4   :  { %3465 = vmatpush3.bf16.msra.mxu0 %v3659_v22 }
0x14e5   :  { %3466 = vmatprep.subr.bf16.mxu0 %v3794_v9 }
0x14e8   :  { %3467 = vmatpush3.bf16.msra.mxu0 %v3660_v23 }
0x14e9   :  { %3468 = vmatprep.subr.bf16.mxu0 %v3794_v9  ;;  %v2999_v9 = vld [vmem:[%s4363_s14 + $0x3] ss:$0 sm:$0xff] }
0x14ec   :  { %3469 = vmatpush3.bf16.msra.mxu0 %v3661_v24 }
0x156e   :  { %v2584_v25 = vpop.xlane.xlu0 %2583 }
0x156f   :  { %v2587_v26 = vmul.f32 0.03125, %v2584_v25 }
0x1570   :  { %v2586_v27 = vpop.xlane.xlu1 %2585 }
0x1571   :  { %v2589_v28 = vadd.f32 1e-05, %v2587_v26  ;;  %v2588_v29 = vmul.f32 0.03125, %v2586_v27 }
0x1573   :  { %3690 = vrsqrt.f32 %v2589_v28  ;;  %v2590_v30 = vadd.f32 1e-05, %v2588_v29 }
0x1575   :  { %3692 = vrsqrt.f32 %v2590_v30 }
0x157d   :  { %v3691_v31 = vpop.eup %3690 }
0x157e   :  { %v2593_v33 = vmul.f32 %v3691_v31, %v2579_v16 }
0x157f   :  { %v3693_v34 = vpop.eup %3692 }
0x1580   :  { %v2594_v35 = vmul.f32 %v3693_v34, %v2580_v18  ;;  %v2601_v36 = vmul.f32 %v2998_v32, %v2593_v33 }
0x1582   :  { %v2602_v37 = vmul.f32 %v2998_v32, %v2594_v35  ;;  %v2609_v38 = vadd.f32 %v2999_v9, %v2601_v36 }
0x1584   :  { %v2610_v39 = vadd.f32 %v2999_v9, %v2602_v37 }
0x1586   :  { %v2611_v40 = vpack.c.bf16 %v2610_v39, %v2609_v38 }
0x1588   :  { %3471 = vmatmul.mubr.bf16.vlgmr.msra.gmra.mrb[32].mxu0 %v2611_v40 }
0x165b   :  { %v2717_v42 = vpop.f32.mrb[32].mxu0 }
0x165c   :  { %v2718_v43 = vadd.f32 %v3000_v41, %v2717_v42  ;;  %v3472_v44 = vpop.f32.mrb[33].mxu0 }
0x165d   :  { %v2720_v45 = vpop.f32.mrb[34].mxu0 }
0x165e   :  { %2724 = vst [vmem:[%s4366_s17] sm:$0xff] %v2718_v43  ;;  %v2721_v46 = vadd.f32 %v3000_v41, %v2720_v45  ;;  %v3473_v47 = vpop.f32.mrb[35].mxu0 }
0x1660   :  { %2725 = vst [vmem:[%s4366_s17 + $0x8] sm:$0xff] %v2721_v46 }
0x1661   :  { %2730 = vsyncpa [#allocation4], 1 }
0x1662   :  { %2731 = vsyncpa [#allocation6], 1 }
0x1663   :  { %2732 = vsyncpa [#allocation9], 1 }

// kernel: _forward_impl.1
= control target key start
LH: loop header
LB: loop body
LE: loop exit
PB: predicated region body
PF: predicated region fallthrough
CT: control target
= control target key end

     0   :  { %s4349_s0 = inlined_call_operand.vmem [shape: bf16[16,768], index: 0, kind: input, shape index: {}]   ;;  %s4350_s1 = inlined_call_operand.vmem [shape: bf16[16,256], index: 1, kind: input, shape index: {}]   ;;  %s4351_s2 = inlined_call_operand.hbm [shape: bf16[768,128], index: 2, kind: input, shape index: {}]   ;;  %s4352_s3 = inlined_call_operand.hbm [shape: bf16[256,128], index: 3, kind: input, shape index: {}]   ;;  %s4353_s4 = inlined_call_operand.vmem [shape: f32[1,128], index: 4, kind: input, shape index: {}]   ;;  %s4354_s5 = inlined_call_operand.vmem [shape: bf16[4,128,128], index: 5, kind: input, shape index: {}]   ;;  %s4355_s6 = inlined_call_operand.vmem [shape: f32[4,1,128], index: 6, kind: input, shape index: {}]   ;;  %s4356_s7 = inlined_call_operand.vmem [shape: f32[4,1,128], index: 7, kind: input, shape index: {}]   ;;  %s4357_s8 = inlined_call_operand.vmem [shape: f32[4,1,128], index: 8, kind: input, shape index: {}]   ;;  %s4358_s9 = inlined_call_operand.hbm [shape: bf16[4,128,128], index: 9, kind: input, shape index: {}]   ;;  %s4359_s10 = inlined_call_operand.vmem [shape: f32[4,1,128], index: 10, kind: input, shape index: {}]   ;;  %s4360_s11 = inlined_call_operand.hbm [shape: bf16[4,128,128], index: 11, kind: input, shape index: {}]   ;;  %s4361_s12 = inlined_call_operand.vmem [shape: f32[4,1,128], index: 12, kind: input, shape index: {}]   ;;  %s4362_s13 = inlined_call_operand.vmem [shape: f32[4,1,128], index: 13, kind: input, shape index: {}]   ;;  %s4363_s14 = inlined_call_operand.vmem [shape: f32[4,1,128], index: 14, kind: input, shape index: {}]   ;;  %s4364_s15 = inlined_call_operand.vmem [shape: bf16[128,128], index: 15, kind: input, shape index: {}]   ;;  %s4365_s16 = inlined_call_operand.vmem [shape: f32[1,128], index: 16, kind: input, shape index: {}]   ;;  %s4366_s17 = inlined_call_operand.vmem [shape: f32[16,128], index: 17, kind: output, shape index: {}]  }
   0x1   :  { %4369 = sst [smem:[#allocation13_spill]] %s4349_s0 }
   0x2   :  { %4370 = sst [smem:[#allocation14_spill]] %s4350_s1 }
   0x3   :  { %22 = vsyncpa [#allocation4], 0 }
   0x4   :  { %23 = vsyncpa [#allocation6], 0 }
   0x5   :  { %24 = vsyncpa [#allocation9], 0  ;;  %s3788_s24 = smov [#allocation5]   ;;  %s3789_s26 = smov [#allocation3]  }
   0x6   :  { %s46_s25 = sshll.u32 %s3788_s24, 4  ;;  %s34_s27 = sshll.u32 %s3789_s26, 4  ;;  %s47_s25 = int_to_ptr.vmem [resolvable:$true] %s46_s25  ;;  %s3886_s27 = int_to_ptr.vmem [resolvable:$true] %s34_s27 }
   0x7   :  { %s3694_s0 = scalar_lea.hbm %s4352_s3, 2048 }
   0x8   :  { %p3695_p0 = scmp.ne.s32.totalorder %s4352_s3, %s3694_s0  ;;  %p3698_p1 = scmp.lt.u32.totalorder %s3694_s0, %s4352_s3 }
   0xa   :  { %p3700_p2 = pnand %p3698_p1, %p3695_p0 }
   0xc   :  { %3703 = shalt.err (!%p3700_p2)
}
   0xd   :  { %s3704_s20 = scalar_lea.vmem %s47_s25, 2048  ;;  %p3709_p4 = scmp.lt.s32.totalorder %s47_s25, %s47_s25 }
   0xe   :  { %p3705_p3 = scmp.ne.s32.totalorder %s47_s25, %s3704_s20  ;;  %p3710_p5 = scmp.lt.s32.totalorder %s3704_s20, %s3704_s20 }
  0x10   :  { %p3711_p6 = por %p3710_p5, %p3709_p4 }
  0x12   :  { %p3712_p7 = pnand %p3711_p6, %p3705_p3 }
  0x14   :  { %3715 = shalt.err (!%p3712_p7)
}
  0x15   :  { %s3790_s21 = smov 64   ;;  %s3791_s22 = smov 4  }
  0x16   :  { %52 = dma.hbm_to_vmem [thread:$0]  %s4352_s3, 2048, %s47_s25, [#allocation6], %s3790_s21, %s3790_s21, %s3791_s22  }
  0x17   :  { %s3716_s29 = scalar_lea.hbm %s4351_s2, 6144 }
  0x18   :  { %p3717_p8 = scmp.ne.s32.totalorder %s4351_s2, %s3716_s29  ;;  %p3720_p9 = scmp.lt.u32.totalorder %s3716_s29, %s4351_s2 }
  0x1a   :  { %p3722_p10 = pnand %p3720_p9, %p3717_p8 }
  0x1c   :  { %3725 = shalt.err (!%p3722_p10)
}
  0x1d   :  { %s3726_s1 = scalar_lea.vmem %s3886_s27, 6144  ;;  %p3731_p12 = scmp.lt.s32.totalorder %s3886_s27, %s3886_s27 }
  0x1e   :  { %p3727_p11 = scmp.ne.s32.totalorder %s3886_s27, %s3726_s1  ;;  %p3732_p13 = scmp.lt.s32.totalorder %s3726_s1, %s3726_s1 }
  0x20   :  { %p3733_p0 = por %p3732_p13, %p3731_p12 }
  0x22   :  { %p3734_p1 = pnand %p3733_p0, %p3727_p11 }
  0x24   :  { %3737 = shalt.err (!%p3734_p1)
}
  0x25   :  { %40 = dma.hbm_to_vmem [thread:$0]  %s4351_s2, 6144, %s3886_s27, [#allocation4], %s3790_s21, %s3790_s21, %s3791_s22  }
  0x26   :  { %s3792_s20 = smov [#allocation7]   ;;  %s3793_s24 = smov [#allocation8]  }
  0x27   :  { %s68_s23 = sshll.u32 %s3792_s20, 4  ;;  %s82_s26 = sshll.u32 %s3793_s24, 4  ;;  %s69_s23 = int_to_ptr.vmem [resolvable:$true] %s68_s23  ;;  %s3923_s26 = int_to_ptr.vmem [resolvable:$true] %s82_s26 }
  0x28   :  { %s3738_s0 = scalar_lea.hbm %s4358_s9, 4096 }
  0x29   :  { %p3739_p2 = scmp.ne.s32.totalorder %s4358_s9, %s3738_s0  ;;  %p3742_p3 = scmp.lt.u32.totalorder %s3738_s0, %s4358_s9 }
  0x2b   :  { %p3744_p4 = pnand %p3742_p3, %p3739_p2 }
  0x2d   :  { %3747 = shalt.err (!%p3744_p4)
}
  0x2e   :  { %s3748_s2 = scalar_lea.vmem %s69_s23, 4096  ;;  %p3753_p6 = scmp.lt.s32.totalorder %s69_s23, %s69_s23 }
  0x2f   :  { %p3749_p5 = scmp.ne.s32.totalorder %s69_s23, %s3748_s2  ;;  %p3754_p7 = scmp.lt.s32.totalorder %s3748_s2, %s3748_s2 }
  0x31   :  { %p3755_p8 = por %p3754_p7, %p3753_p6 }
  0x33   :  { %p3756_p9 = pnand %p3755_p8, %p3749_p5 }
  0x35   :  { %3759 = shalt.err (!%p3756_p9)
}
  0x36   :  { %74 = dma.hbm_to_vmem [thread:$0]  %s4358_s9, 4096, %s69_s23, [#allocation6], %s3790_s21, %s3790_s21, %s3791_s22  }
  0x37   :  { %s3760_s24 = scalar_lea.hbm %s4360_s11, 4096 }
  0x38   :  { %p3761_p10 = scmp.ne.s32.totalorder %s4360_s11, %s3760_s24  ;;  %p3764_p11 = scmp.lt.u32.totalorder %s3760_s24, %s4360_s11 }
  0x3a   :  { %p3766_p12 = pnand %p3764_p11, %p3761_p10 }
  0x3c   :  { %3769 = shalt.err (!%p3766_p12)
}
  0x3d   :  { %s3770_s18 = scalar_lea.vmem %s3923_s26, 4096  ;;  %p3775_p0 = scmp.lt.s32.totalorder %s3923_s26, %s3923_s26 }
  0x3e   :  { %p3771_p13 = scmp.ne.s32.totalorder %s3923_s26, %s3770_s18  ;;  %p3776_p1 = scmp.lt.s32.totalorder %s3770_s18, %s3770_s18 }
  0x40   :  { %p3777_p2 = por %p3776_p1, %p3775_p0 }
  0x42   :  { %p3778_p3 = pnand %p3777_p2, %p3771_p13 }
  0x44   :  { %3781 = shalt.err (!%p3778_p3)
}
  0x45   :  { %88 = dma.hbm_to_vmem [thread:$0]  %s4360_s11, 4096, %s3923_s26, [#allocation9], %s3790_s21, %s3790_s21, %s3791_s22  }
  0x46   :  { %3782 = dma.done.wait [#allocation4], 6144  }
  0x47   :  { %3783 = vsyncadd [#allocation4], 4294961152 }
  0x48   :  { %3784 = dma.done.wait [#allocation6], 6144  }
  0x49   :  { %3785 = vsyncadd [#allocation6], 4294961152 }
  0x4a   :  { %3786 = dma.done.wait [#allocation9], 4096  }
  0x4b   :  { %3787 = vsyncadd [#allocation9], 4294963200  ;;  %v3482_v0 = vld [vmem:[#allocation5 + $0x40] sm:$0xff]   ;;  %v3486_v4 = vld [vmem:[#allocation5 + $0x48] sm:$0xff]   ;;  %s4371_s22 = sld [smem:[#allocation14_spill]]  ;;  %s4372_s27 = sld [smem:[#allocation13_spill]] }
  0x4c   :  { %v3483_v1 = vld [vmem:[#allocation3 + $0x40] sm:$0xff]   ;;  %3009 = vmatprep.subr.bf16.mxu0 %v3482_v0  ;;  %v3487_v5 = vld [vmem:[#allocation3 + $0x48] sm:$0xff]   ;;  %v3490_v8 = vld [vmem:[#allocation5 + $0x50] sm:$0xff]   ;;  %vm3795_vm0 = vmmov 0  }
  0x4d   :  { %v3484_v2 = vld [vmem:[#allocation5] sm:$0xff]   ;;  %3031 = vmatprep.subr.bf16.mxu1 %v3483_v1  ;;  %v3488_v6 = vld [vmem:[#allocation5 + $0x8] sm:$0xff]   ;;  %v3491_v9 = vld [vmem:[#allocation3 + $0x50] sm:$0xff]  }
  0x4e   :  { %v3485_v3 = vld [vmem:[#allocation3] sm:$0xff]   ;;  %3010 = vmatpush3.bf16.msra.mxu0 %v3484_v2  ;;  %v3489_v7 = vld [vmem:[#allocation3 + $0x8] sm:$0xff]   ;;  %v3492_v10 = vld [vmem:[#allocation5 + $0x10] sm:$0xff]  }
  0x4f   :  { %3032 = vmatpush3.bf16.msra.mxu1 %v3485_v3  ;;  %3011 = vmatprep.subr.bf16.mxu0 %v3486_v4  ;;  %v3493_v11 = vld [vmem:[#allocation3 + $0x10] sm:$0xff]   ;;  %v3494_v12 = vld [vmem:[#allocation5 + $0x58] sm:$0xff]   ;;  %v3498_v16 = vld [vmem:[#allocation5 + $0x60] sm:$0xff]  }
  0x50   :  { %3033 = vmatprep.subr.bf16.mxu1 %v3487_v5  ;;  %v3495_v13 = vld [vmem:[#allocation3 + $0x58] sm:$0xff]   ;;  %v3499_v17 = vld [vmem:[#allocation3 + $0x60] sm:$0xff]   ;;  %v3502_v20 = vld [vmem:[#allocation5 + $0x68] sm:$0xff]  }
  0x51   :  { %v3496_v14 = vld [vmem:[#allocation5 + $0x18] sm:$0xff]   ;;  %v3500_v18 = vld [vmem:[#allocation5 + $0x20] sm:$0xff]   ;;  %v3503_v21 = vld [vmem:[#allocation3 + $0x68] sm:$0xff]  }
  0x52   :  { %3012 = vmatpush3.bf16.msra.mxu0 %v3488_v6  ;;  %v3497_v15 = vld [vmem:[#allocation3 + $0x18] sm:$0xff]   ;;  %v3501_v19 = vld [vmem:[#allocation3 + $0x20] sm:$0xff]   ;;  %v3504_v22 = vld [vmem:[#allocation5 + $0x28] sm:$0xff]  }
  0x53   :  { %3034 = vmatpush3.bf16.msra.mxu1 %v3489_v7  ;;  %3013 = vmatprep.subr.bf16.mxu0 %v3490_v8  ;;  %v3505_v23 = vld [vmem:[#allocation3 + $0x28] sm:$0xff]   ;;  %v3506_v24 = vld [vmem:[#allocation5 + $0x70] sm:$0xff]   ;;  %v3510_v28 = vld [vmem:[#allocation5 + $0x78] sm:$0xff]  }
  0x54   :  { %3035 = vmatprep.subr.bf16.mxu1 %v3491_v9  ;;  %v3507_v25 = vld [vmem:[#allocation3 + $0x70] sm:$0xff]   ;;  %v3511_v29 = vld [vmem:[#allocation3 + $0x78] sm:$0xff]   ;;  %v3514_v32 = vld [vmem:[%s4371_s22] ss:$8 sps:$4 sm:$0xff]   ;;  %v3794_v9 = vmov 0.0  }
  0x55   :  { %v3508_v26 = vld [vmem:[#allocation5 + $0x30] sm:$0xff]   ;;  %v3512_v30 = vld [vmem:[#allocation5 + $0x38] sm:$0xff]   ;;  %v3516_v33 = vld [vmem:[%s4371_s22 + $0x4] ss:$8 sps:$4 sm:$0xff]  }
  0x56   :  { %3014 = vmatpush3.bf16.msra.mxu0 %v3492_v10  ;;  %v3509_v27 = vld [vmem:[#allocation3 + $0x30] sm:$0xff]   ;;  %v3513_v31 = vld [vmem:[#allocation3 + $0x38] sm:$0xff]   ;;  %401 = vmatprep.mubr.bf16.mxu0 %v3516_v33  ;;  %v3520_v36 = vld [vmem:[#allocation3 + $0xc0] sm:$0xff]  }
  0x57   :  { %3036 = vmatpush3.bf16.msra.mxu1 %v3493_v11  ;;  %3015 = vmatprep.subr.bf16.mxu0 %v3494_v12  ;;  %v3517_v34 = vld [vmem:[%s4372_s27] ss:$24 sps:$4 sm:$0xff]   ;;  %v3519_v35 = vld [vmem:[%s4372_s27 + $0x4] ss:$24 sps:$4 sm:$0xff]   ;;  %v3524_v40 = vld [vmem:[#allocation3 + $0xc8] sm:$0xff]  }
  0x58   :  { %3037 = vmatprep.subr.bf16.mxu1 %v3495_v13  ;;  %760 = vmatprep.mubr.bf16.mxu1 %v3519_v35  ;;  %v3521_v37 = vld [vmem:[#allocation3 + $0x140] sm:$0xff]   ;;  %v3525_v41 = vld [vmem:[#allocation3 + $0x148] sm:$0xff]   ;;  %v3528_v44 = vld [vmem:[#allocation3 + $0xd0] sm:$0xff]  }
  0x59   :  { %v3522_v38 = vld [vmem:[#allocation3 + $0x80] sm:$0xff]   ;;  %v3526_v42 = vld [vmem:[#allocation3 + $0x88] sm:$0xff]   ;;  %v3529_v45 = vld [vmem:[#allocation3 + $0x150] sm:$0xff]  }
  0x5a   :  { %3016 = vmatpush3.bf16.msra.mxu0 %v3496_v14  ;;  %v3523_v39 = vld [vmem:[#allocation3 + $0x100] sm:$0xff]   ;;  %v3527_v43 = vld [vmem:[#allocation3 + $0x108] sm:$0xff]   ;;  %v3530_v46 = vld [vmem:[#allocation3 + $0x90] sm:$0xff]  }
  0x5b   :  { %3038 = vmatpush3.bf16.msra.mxu1 %v3497_v15  ;;  %3017 = vmatprep.subr.bf16.mxu0 %v3498_v16  ;;  %v3531_v47 = vld [vmem:[#allocation3 + $0x110] sm:$0xff]   ;;  %v3532_v48 = vld [vmem:[#allocation3 + $0xd8] sm:$0xff]   ;;  %v3536_v52 = vld [vmem:[#allocation3 + $0xe0] sm:$0xff]  }
  0x5c   :  { %3039 = vmatprep.subr.bf16.mxu1 %v3499_v17  ;;  %v3533_v49 = vld [vmem:[#allocation3 + $0x158] sm:$0xff]   ;;  %v3537_v53 = vld [vmem:[#allocation3 + $0x160] sm:$0xff]   ;;  %v3540_v56 = vld [vmem:[#allocation3 + $0xe8] sm:$0xff]  }
  0x5d   :  { %v3534_v50 = vld [vmem:[#allocation3 + $0x98] sm:$0xff]   ;;  %v3538_v54 = vld [vmem:[#allocation3 + $0xa0] sm:$0xff]   ;;  %v3541_v57 = vld [vmem:[#allocation3 + $0x168] sm:$0xff]  }
  0x5e   :  { %3018 = vmatpush3.bf16.msra.mxu0 %v3500_v18  ;;  %v3535_v51 = vld [vmem:[#allocation3 + $0x118] sm:$0xff]   ;;  %v3539_v55 = vld [vmem:[#allocation3 + $0x120] sm:$0xff]   ;;  %v3542_v58 = vld [vmem:[#allocation3 + $0xa8] sm:$0xff]  }
  0x5f   :  { %3040 = vmatpush3.bf16.msra.mxu1 %v3501_v19  ;;  %3019 = vmatprep.subr.bf16.mxu0 %v3502_v20  ;;  %v3543_v59 = vld [vmem:[#allocation3 + $0x128] sm:$0xff]   ;;  %v3544_v60 = vld [vmem:[#allocation3 + $0xf0] sm:$0xff]   ;;  %v3548_v0 = vld [vmem:[#allocation3 + $0xf8] sm:$0xff]  }
  0x60   :  { %3041 = vmatprep.subr.bf16.mxu1 %v3503_v21  ;;  %v3545_v61 = vld [vmem:[#allocation3 + $0x170] sm:$0xff]   ;;  %v3549_v1 = vld [vmem:[#allocation3 + $0x178] sm:$0xff]   ;;  %v3552_v4 = vld [vmem:[%s4372_s27 + $0x8] ss:$24 sps:$4 sm:$0xff]  }
  0x61   :  { %v3546_v62 = vld [vmem:[#allocation3 + $0xb0] sm:$0xff]   ;;  %v3550_v2 = vld [vmem:[#allocation3 + $0xb8] sm:$0xff]   ;;  %v3554_v5 = vld [vmem:[%s4372_s27 + $0xc] ss:$24 sps:$4 sm:$0xff]  }
  0x62   :  { %3020 = vmatpush3.bf16.msra.mxu0 %v3504_v22  ;;  %v3547_v63 = vld [vmem:[#allocation3 + $0x130] sm:$0xff]   ;;  %v3551_v3 = vld [vmem:[#allocation3 + $0x138] sm:$0xff]   ;;  %v3558_v8 = vld [vmem:[%s4354_s5] sm:$0xff]  }
  0x63   :  { %3042 = vmatpush3.bf16.msra.mxu1 %v3505_v23  ;;  %3021 = vmatprep.subr.bf16.mxu0 %v3506_v24  ;;  %v3555_v6 = vld [vmem:[%s4372_s27 + $0x10] ss:$24 sps:$4 sm:$0xff]   ;;  %v3557_v7 = vld [vmem:[%s4372_s27 + $0x14] ss:$24 sps:$4 sm:$0xff]   ;;  %v3561_v12 = vld [vmem:[%s4354_s5 + $0x18] sm:$0xff]  }
  0x64   :  { %3043 = vmatprep.subr.bf16.mxu1 %v3507_v25  ;;  %v3559_v10 = vld [vmem:[%s4354_s5 + $0x8] sm:$0xff]   ;;  %v3560_v11 = vld [vmem:[%s4354_s5 + $0x10] sm:$0xff]   ;;  %v3562_v13 = vld [vmem:[%s4354_s5 + $0x20] sm:$0xff]  }
  0x65   :  { %v3563_v14 = vld [vmem:[%s4354_s5 + $0x28] sm:$0xff]   ;;  %v3564_v15 = vld [vmem:[%s4354_s5 + $0x30] sm:$0xff]   ;;  %v3565_v16 = vld [vmem:[%s4354_s5 + $0x38] sm:$0xff]  }
  0x66   :  { %3022 = vmatpush3.bf16.msra.mxu0 %v3508_v26 }
  0x67   :  { %3044 = vmatpush3.bf16.msra.mxu1 %v3509_v27  ;;  %3023 = vmatprep.subr.bf16.mxu0 %v3510_v28 }
  0x68   :  { %3045 = vmatprep.subr.bf16.mxu1 %v3511_v29 }
  0x6a   :  { %3024 = vmatpush3.bf16.msra.mxu0 %v3512_v30 }
  0x6b   :  { %3046 = vmatpush3.bf16.msra.mxu1 %v3513_v31  ;;  %3053 = vmatprep.subr.bf16.mxu0 %v3520_v36 }
  0x6c   :  { %3075 = vmatprep.subr.bf16.mxu1 %v3521_v37 }
  0x6d   :  { %402 = vmatmul.mubr.bf16.vlgmr.msra.gmra.mrb[0].mxu0 %v3514_v32 }
  0x6e   :  { %761 = vmatmul.mubr.bf16.vlgmr.msra.gmra.mrb[0].mxu1 %v3517_v34  ;;  %3054 = vmatpush3.bf16.msra.mxu0 %v3522_v38 }
  0x6f   :  { %3076 = vmatpush3.bf16.msra.mxu1 %v3523_v39  ;;  %3055 = vmatprep.subr.bf16.mxu0 %v3524_v40 }
  0x70   :  { %3077 = vmatprep.subr.bf16.mxu1 %v3525_v41  ;;  %801 = vmatprep.mubr.bf16.mxu0 %v3554_v5 }
  0x71   :  { %842 = vmatprep.mubr.bf16.mxu1 %v3557_v7 }
  0x72   :  { %3056 = vmatpush3.bf16.msra.mxu0 %v3526_v42 }
  0x73   :  { %3078 = vmatpush3.bf16.msra.mxu1 %v3527_v43  ;;  %3057 = vmatprep.subr.bf16.mxu0 %v3528_v44 }
  0x74   :  { %3079 = vmatprep.subr.bf16.mxu1 %v3529_v45 }
  0x76   :  { %3058 = vmatpush3.bf16.msra.mxu0 %v3530_v46  ;;  %v2733_v46 = vld [vmem:[%s4353_s4] ss:$0 sm:$0xff] }
  0x77   :  { %3080 = vmatpush3.bf16.msra.mxu1 %v3531_v47  ;;  %3059 = vmatprep.subr.bf16.mxu0 %v3532_v48 }
  0x78   :  { %3081 = vmatprep.subr.bf16.mxu1 %v3533_v49 }
  0x7a   :  { %3060 = vmatpush3.bf16.msra.mxu0 %v3534_v50 }
  0x7b   :  { %3082 = vmatpush3.bf16.msra.mxu1 %v3535_v51  ;;  %3061 = vmatprep.subr.bf16.mxu0 %v3536_v52  ;;  %v2807_v51 = vld [vmem:[%s4355_s6] ss:$0 sm:$0xff] }
  0x7c   :  { %3083 = vmatprep.subr.bf16.mxu1 %v3537_v53 }
  0x7e   :  { %3062 = vmatpush3.bf16.msra.mxu0 %v3538_v54 }
  0x7f   :  { %3084 = vmatpush3.bf16.msra.mxu1 %v3539_v55  ;;  %3063 = vmatprep.subr.bf16.mxu0 %v3540_v56 }
  0x80   :  { %3085 = vmatprep.subr.bf16.mxu1 %v3541_v57 }
  0x82   :  { %3064 = vmatpush3.bf16.msra.mxu0 %v3542_v58 }
  0x83   :  { %3086 = vmatpush3.bf16.msra.mxu1 %v3543_v59  ;;  %3065 = vmatprep.subr.bf16.mxu0 %v3544_v60  ;;  %v3566_v60 = vld [vmem:[#allocation7] sm:$0xff]  }
  0x84   :  { %3087 = vmatprep.subr.bf16.mxu1 %v3545_v61  ;;  %v860_v61 = vlaneseq }
  0x86   :  { %3066 = vmatpush3.bf16.msra.mxu0 %v3546_v62  ;;  %v861_v62 = vand.u32 127, %v860_v61 }
  0x87   :  { %3088 = vmatpush3.bf16.msra.mxu1 %v3547_v63  ;;  %3067 = vmatprep.subr.bf16.mxu0 %v3548_v0 }
  0x88   :  { %3089 = vmatprep.subr.bf16.mxu1 %v3549_v1  ;;  %vm862_vm1 = vcmp.lt.s32.totalorder %v861_v62, 32  ;;  %v3582_v62 = vld [vmem:[%s4354_s5 + $0x40] sm:$0xff]  }
  0x89   :  { %v4032_v1 = vsel %vm862_vm1, 1.0, %v3794_v9 }
  0x8a   :  { %3068 = vmatpush3.bf16.msra.mxu0 %v3550_v2 }
  0x8b   :  { %3090 = vmatpush3.bf16.msra.mxu1 %v3551_v3  ;;  %3214 = vmatprep.subr.bf16.mxu0 %v3794_v9 }
  0x8c   :  { %3234 = vmatprep.subr.bf16.mxu1 %v3794_v9 }
  0x8d   :  { %802 = vmatmul.mubr.bf16.vlgmr.msra.gmra.mrb[4].mxu0 %v3552_v4 }
  0x8e   :  { %843 = vmatmul.mubr.bf16.vlgmr.msra.gmra.mrb[4].mxu1 %v3555_v6  ;;  %3215 = vmatpush3.bf16.msra.mxu0 %v3558_v8 }
  0x8f   :  { %3216 = vmatprep.subr.bf16.mxu0 %v3794_v9  ;;  %3230 = vmatprep.mubr.msk.bf16.mxu0 %vm3795_vm0, %v3794_v9 }
  0x90   :  { %3250 = vmatprep.mubr.msk.bf16.mxu1 %vm3795_vm0, %v3794_v9  ;;  %3235 = vmatpush3.bf16.msra.mxu1 %v3566_v60 }
  0x91   :  { %3236 = vmatprep.subr.bf16.mxu1 %v3794_v9 }
  0x92   :  { %3217 = vmatpush3.bf16.msra.mxu0 %v3559_v10 }
  0x93   :  { %3218 = vmatprep.subr.bf16.mxu0 %v3794_v9 }
  0x96   :  { %3219 = vmatpush3.bf16.msra.mxu0 %v3560_v11  ;;  %v3567_v11 = vld [vmem:[#allocation7 + $0x8] sm:$0xff]  }
  0x97   :  { %3220 = vmatprep.subr.bf16.mxu0 %v3794_v9  ;;  %3237 = vmatpush3.bf16.msra.mxu1 %v3567_v11 }
  0x98   :  { %3238 = vmatprep.subr.bf16.mxu1 %v3794_v9 }
  0x9a   :  { %3221 = vmatpush3.bf16.msra.mxu0 %v3561_v12  ;;  %v3568_v12 = vld [vmem:[#allocation7 + $0x10] sm:$0xff]  }
  0x9b   :  { %3222 = vmatprep.subr.bf16.mxu0 %v3794_v9  ;;  %3239 = vmatpush3.bf16.msra.mxu1 %v3568_v12  ;;  %v3584_v12 = vld [vmem:[%s4354_s5 + $0x50] sm:$0xff]  }
  0x9c   :  { %3240 = vmatprep.subr.bf16.mxu1 %v3794_v9 }
  0x9e   :  { %3223 = vmatpush3.bf16.msra.mxu0 %v3562_v13  ;;  %v3569_v13 = vld [vmem:[#allocation7 + $0x18] sm:$0xff]  }
  0x9f   :  { %3224 = vmatprep.subr.bf16.mxu0 %v3794_v9  ;;  %3241 = vmatpush3.bf16.msra.mxu1 %v3569_v13  ;;  %v3585_v13 = vld [vmem:[%s4354_s5 + $0x58] sm:$0xff]  }
  0xa0   :  { %3242 = vmatprep.subr.bf16.mxu1 %v3794_v9 }
  0xa2   :  { %3225 = vmatpush3.bf16.msra.mxu0 %v3563_v14  ;;  %v3570_v14 = vld [vmem:[#allocation7 + $0x20] sm:$0xff]  }
  0xa3   :  { %3226 = vmatprep.subr.bf16.mxu0 %v3794_v9  ;;  %3243 = vmatpush3.bf16.msra.mxu1 %v3570_v14  ;;  %v3586_v14 = vld [vmem:[%s4354_s5 + $0x60] sm:$0xff]  }
  0xa4   :  { %3244 = vmatprep.subr.bf16.mxu1 %v3794_v9 }
  0xa6   :  { %3227 = vmatpush3.bf16.msra.mxu0 %v3564_v15  ;;  %v3571_v15 = vld [vmem:[#allocation7 + $0x28] sm:$0xff]  }
  0xa7   :  { %3228 = vmatprep.subr.bf16.mxu0 %v3794_v9  ;;  %3245 = vmatpush3.bf16.msra.mxu1 %v3571_v15  ;;  %v3587_v15 = vld [vmem:[%s4354_s5 + $0x68] sm:$0xff]  }
  0xa8   :  { %3246 = vmatprep.subr.bf16.mxu1 %v3794_v9 }
  0xaa   :  { %3229 = vmatpush3.bf16.msra.mxu0 %v3565_v16  ;;  %v3572_v16 = vld [vmem:[#allocation7 + $0x30] sm:$0xff]  }
  0xab   :  { %3254 = vmatprep.subr.bf16.mxu0 %v3794_v9  ;;  %3247 = vmatpush3.bf16.msra.mxu1 %v3572_v16  ;;  %v3588_v16 = vld [vmem:[%s4354_s5 + $0x70] sm:$0xff]  }
  0xac   :  { %3248 = vmatprep.subr.bf16.mxu1 %v3794_v9 }
 0x140   :  { %v3025_v17 = vpop.f32.mrb[0].mxu0 }
 0x141   :  { %v3047_v18 = vpop.f32.mrb[0].mxu1  ;;  %v3026_v19 = vpop.f32.mrb[1].mxu0 }
 0x142   :  { %v3027_v20 = vadd.f32 %v3026_v19, %v3025_v17  ;;  %v3048_v21 = vpop.f32.mrb[1].mxu1  ;;  %v3028_v22 = vpop.f32.mrb[2].mxu0  ;;  %v3573_v17 = vld [vmem:[#allocation7 + $0x38] sm:$0xff]   ;;  %v3575_v19 = vld [vmem:[#allocation8 + $0x8] sm:$0xff]  }
 0x143   :  { %v3049_v23 = vadd.f32 %v3048_v21, %v3047_v18  ;;  %v3050_v24 = vpop.f32.mrb[2].mxu1  ;;  %v3029_v25 = vpop.f32.mrb[3].mxu0  ;;  %3249 = vmatpush3.bf16.msra.mxu1 %v3573_v17  ;;  %v3574_v18 = vld [vmem:[#allocation8] sm:$0xff]   ;;  %v3577_v21 = vld [vmem:[#allocation8 + $0x18] sm:$0xff]  }
 0x144   :  { %v3030_v26 = vadd.f32 %v3029_v25, %v3028_v22  ;;  %v3051_v27 = vpop.f32.mrb[3].mxu1  ;;  %3274 = vmatprep.subr.bf16.mxu1 %v3794_v9  ;;  %v3578_v22 = vld [vmem:[#allocation8 + $0x20] sm:$0xff]   ;;  %v3589_v17 = vld [vmem:[%s4354_s5 + $0x78] sm:$0xff]  }
 0x145   :  { %v763_v28 = vadd.f32 %v3049_v23, %v3027_v20  ;;  %v3052_v29 = vadd.f32 %v3051_v27, %v3050_v24  ;;  %v3576_v20 = vld [vmem:[#allocation8 + $0x10] sm:$0xff]   ;;  %v3579_v23 = vld [vmem:[#allocation8 + $0x28] sm:$0xff]  }
 0x147   :  { %v766_v30 = vadd.f32 %v3052_v29, %v3030_v26 }
 0x160   :  { %v3069_v31 = vpop.f32.mrb[4].mxu0 }
 0x161   :  { %v3070_v32 = vpop.f32.mrb[5].mxu0  ;;  %v3091_v33 = vpop.f32.mrb[4].mxu1 }
 0x162   :  { %v3071_v34 = vadd.f32 %v3070_v32, %v3069_v31  ;;  %v3072_v35 = vpop.f32.mrb[6].mxu0  ;;  %v3092_v36 = vpop.f32.mrb[5].mxu1  ;;  %v2816_v32 = vld [vmem:[%s4356_s7] ss:$0 sm:$0xff] }
 0x163   :  { %v3073_v37 = vpop.f32.mrb[7].mxu0  ;;  %v3093_v39 = vadd.f32 %v3092_v36, %v3091_v33  ;;  %v3094_v40 = vpop.f32.mrb[6].mxu1  ;;  %v2817_v36 = vld [vmem:[%s4357_s8] ss:$0 sm:$0xff] }
 0x164   :  { %v804_v38 = vadd.f32 %v3071_v34, %v763_v28  ;;  %v3074_v41 = vadd.f32 %v3073_v37, %v3072_v35  ;;  %v3095_v42 = vpop.f32.mrb[7].mxu1 }
 0x165   :  { %v3096_v45 = vadd.f32 %v3095_v42, %v3094_v40  ;;  %v3581_v42 = vld [vmem:[#allocation8 + $0x38] sm:$0xff]  }
 0x166   :  { %v845_v43 = vadd.f32 %v3093_v39, %v804_v38  ;;  %v807_v44 = vadd.f32 %v3074_v41, %v766_v30  ;;  %v3580_v41 = vld [vmem:[#allocation8 + $0x30] sm:$0xff]  }
 0x168   :  { %v848_v47 = vadd.f32 %v3096_v45, %v807_v44  ;;  %v851_v48 = vadd.f32 %v2733_v46, %v845_v43  ;;  %v2818_v43 = vld [vmem:[%s4359_s10] ss:$0 sm:$0xff] }
 0x16a   :  { %v852_v49 = vadd.f32 %v2733_v46, %v848_v47 }
 0x16c   :  { %v865_v50 = vpack.c.bf16 %v852_v49, %v851_v48 }
 0x16e   :  { %3231 = vmatmul.mubr.bf16.vlgmr.msra.gmra.mrb[8].mxu0 %v865_v50 }
 0x16f   :  { %3270 = vmatprep.mubr.msk.bf16.mxu0 %vm3795_vm0, %v3794_v9  ;;  %3255 = vmatpush3.bf16.msra.mxu0 %v3574_v18 }
 0x170   :  { %3256 = vmatprep.subr.bf16.mxu0 %v3794_v9 }
 0x173   :  { %3257 = vmatpush3.bf16.msra.mxu0 %v3575_v19 }
 0x174   :  { %3258 = vmatprep.subr.bf16.mxu0 %v3794_v9 }
 0x177   :  { %3259 = vmatpush3.bf16.msra.mxu0 %v3576_v20 }
 0x178   :  { %3260 = vmatprep.subr.bf16.mxu0 %v3794_v9 }
 0x17b   :  { %3261 = vmatpush3.bf16.msra.mxu0 %v3577_v21 }
 0x17c   :  { %3262 = vmatprep.subr.bf16.mxu0 %v3794_v9 }
 0x17f   :  { %3263 = vmatpush3.bf16.msra.mxu0 %v3578_v22 }
 0x180   :  { %3264 = vmatprep.subr.bf16.mxu0 %v3794_v9 }
 0x183   :  { %3265 = vmatpush3.bf16.msra.mxu0 %v3579_v23 }
 0x184   :  { %3266 = vmatprep.subr.bf16.mxu0 %v3794_v9 }
 0x187   :  { %3267 = vmatpush3.bf16.msra.mxu0 %v3580_v41 }
 0x188   :  { %3268 = vmatprep.subr.bf16.mxu0 %v3794_v9 }
 0x18b   :  { %3269 = vmatpush3.bf16.msra.mxu0 %v3581_v42 }
 0x18c   :  { %3294 = vmatprep.subr.bf16.mxu0 %v3794_v9 }
 0x241   :  { %v971_v52 = vpop.f32.mrb[8].mxu0 }
 0x242   :  { %v972_v53 = vadd.f32 %v2807_v51, %v971_v52  ;;  %v3232_v54 = vpop.f32.mrb[9].mxu0 }
 0x243   :  { %v974_v55 = vpop.f32.mrb[10].mxu0 }
 0x244   :  { %v975_v56 = vadd.f32 %v2807_v51, %v974_v55  ;;  %v3233_v57 = vpop.f32.mrb[11].mxu0  ;;  %v978_v58 = vadd.f32 %v972_v53, %v851_v48  ;;  %v2827_v53 = vld [vmem:[%s4361_s12] ss:$0 sm:$0xff] }
 0x246   :  { %982 = vadd.xlane.f32.xlu0 %v978_v58  ;;  %v979_v59 = vadd.f32 %v975_v56, %v852_v49 }
 0x24a   :  { %984 = vadd.xlane.f32.xlu0 %v979_v59 }
 0x2d3   :  { %v983_v63 = vpop.xlane.xlu0 %982 }
 0x2d4   :  { %v986_v0 = vmul.f32 0.03125, %v983_v63  ;;  %v3583_v63 = vld [vmem:[%s4354_s5 + $0x48] sm:$0xff]  }
 0x2d6   :  { %v988_v2 = vsub.f32 %v978_v58, %v986_v0 }
 0x2d7   :  { %v985_v3 = vpop.xlane.xlu0 %984 }
 0x2d8   :  { %v987_v4 = vmul.f32 0.03125, %v985_v3  ;;  %v990_v5 = vmul.f32 %v4032_v1, %v988_v2 }
 0x2da   :  { %v989_v6 = vsub.f32 %v979_v59, %v987_v4  ;;  %v992_v7 = vmul.f32 %v990_v5, %v990_v5 }
 0x2dc   :  { %994 = vadd.xlane.f32.xlu1 %v992_v7  ;;  %v991_v8 = vmul.f32 %v4032_v1, %v989_v6 }
 0x2de   :  { %v993_v10 = vmul.f32 %v991_v8, %v991_v8 }
 0x2e0   :  { %996 = vadd.xlane.f32.xlu1 %v993_v10 }
 0x369   :  { %v995_v24 = vpop.xlane.xlu1 %994 }
 0x36a   :  { %v998_v25 = vmul.f32 0.03125, %v995_v24 }
 0x36c   :  { %v1000_v26 = vadd.f32 1e-05, %v998_v25  ;;  %v2836_v25 = vld [vmem:[%s4362_s13] ss:$0 sm:$0xff] }
 0x36d   :  { %v997_v27 = vpop.xlane.xlu1 %996 }
 0x36e   :  { %3662 = vrsqrt.f32 %v1000_v26  ;;  %v999_v28 = vmul.f32 0.03125, %v997_v27 }
 0x370   :  { %v1001_v29 = vadd.f32 1e-05, %v999_v28 }
 0x372   :  { %3664 = vrsqrt.f32 %v1001_v29 }
 0x378   :  { %v3663_v30 = vpop.eup %3662 }
 0x379   :  { %v1004_v31 = vmul.f32 %v3663_v30, %v990_v5  ;;  %v2837_v30 = vld [vmem:[%s4363_s14] ss:$0 sm:$0xff] }
 0x37b   :  { %v1012_v35 = vmul.f32 %v2816_v32, %v1004_v31 }
 0x37c   :  { %v3665_v33 = vpop.eup %3664 }
 0x37d   :  { %v1005_v34 = vmul.f32 %v3665_v33, %v991_v8  ;;  %v1020_v38 = vadd.f32 %v2817_v36, %v1012_v35  ;;  %v2855_v35 = vld [vmem:[%s4355_s6 + $0x1] ss:$0 sm:$0xff] }
 0x37f   :  { %v1013_v37 = vmul.f32 %v2816_v32, %v1005_v34 }
 0x381   :  { %v1021_v39 = vadd.f32 %v2817_v36, %v1013_v37 }
 0x383   :  { %v1022_v40 = vpack.c.bf16 %v1021_v39, %v1020_v38 }
 0x385   :  { %3251 = vmatmul.mubr.bf16.vlgmr.msra.gmra.mrb[8].mxu1 %v1022_v40 }
 0x386   :  { %3290 = vmatprep.mubr.msk.bf16.mxu1 %vm3795_vm0, %v3794_v9  ;;  %3275 = vmatpush3.bf16.msra.mxu1 %v3582_v62  ;;  %v3598_v62 = vld [vmem:[#allocation8 + $0x40] sm:$0xff]  }
 0x387   :  { %3276 = vmatprep.subr.bf16.mxu1 %v3794_v9 }
 0x38a   :  { %3277 = vmatpush3.bf16.msra.mxu1 %v3583_v63  ;;  %v3599_v63 = vld [vmem:[#allocation8 + $0x48] sm:$0xff]  }
 0x38b   :  { %3278 = vmatprep.subr.bf16.mxu1 %v3794_v9 }
 0x38e   :  { %3279 = vmatpush3.bf16.msra.mxu1 %v3584_v12 }
 0x38f   :  { %3280 = vmatprep.subr.bf16.mxu1 %v3794_v9 }
 0x392   :  { %3281 = vmatpush3.bf16.msra.mxu1 %v3585_v13  ;;  %v2866_v13 = vld [vmem:[%s4356_s7 + $0x1] ss:$0 sm:$0xff] }
 0x393   :  { %3282 = vmatprep.subr.bf16.mxu1 %v3794_v9 }
 0x396   :  { %3283 = vmatpush3.bf16.msra.mxu1 %v3586_v14 }
 0x397   :  { %3284 = vmatprep.subr.bf16.mxu1 %v3794_v9 }
 0x39a   :  { %3285 = vmatpush3.bf16.msra.mxu1 %v3587_v15 }
 0x39b   :  { %3286 = vmatprep.subr.bf16.mxu1 %v3794_v9 }
 0x39e   :  { %3287 = vmatpush3.bf16.msra.mxu1 %v3588_v16 }
 0x39f   :  { %3288 = vmatprep.subr.bf16.mxu1 %v3794_v9 }
 0x3a2   :  { %3289 = vmatpush3.bf16.msra.mxu1 %v3589_v17 }
 0x3a3   :  { %3314 = vmatprep.subr.bf16.mxu1 %v3794_v9 }
 0x458   :  { %v1128_v44 = vpop.f32.mrb[8].mxu1 }
 0x459   :  { %v1129_v45 = vadd.f32 %v2818_v43, %v1128_v44  ;;  %v3252_v46 = vpop.f32.mrb[9].mxu1  ;;  %v3590_v44 = vld [vmem:[#allocation7 + $0x40] sm:$0xff]  }
 0x45a   :  { %v1131_v47 = vpop.f32.mrb[10].mxu1 }
 0x45b   :  { %v1132_v48 = vadd.f32 %v2818_v43, %v1131_v47  ;;  %v3253_v49 = vpop.f32.mrb[11].mxu1  ;;  %v1135_v50 = vmax.f32 %v1129_v45, 0.0  ;;  %v3591_v45 = vld [vmem:[#allocation7 + $0x48] sm:$0xff]  }
 0x45d   :  { %v1136_v51 = vmax.f32 %v1132_v48, 0.0 }
 0x45f   :  { %v1137_v52 = vpack.c.bf16 %v1136_v51, %v1135_v50 }
 0x461   :  { %3271 = vmatmul.mubr.bf16.vlgmr.msra.gmra.mrb[12].mxu0 %v1137_v52 }
 0x462   :  { %3310 = vmatprep.mubr.msk.bf16.mxu0 %vm3795_vm0, %v3794_v9  ;;  %3295 = vmatpush3.bf16.msra.mxu0 %v3590_v44  ;;  %v3606_v44 = vld [vmem:[%s4354_s5 + $0x80] sm:$0xff]  }
 0x463   :  { %3296 = vmatprep.subr.bf16.mxu0 %v3794_v9 }
 0x466   :  { %3297 = vmatpush3.bf16.msra.mxu0 %v3591_v45  ;;  %v3607_v45 = vld [vmem:[%s4354_s5 + $0x88] sm:$0xff]  }
 0x467   :  { %3298 = vmatprep.subr.bf16.mxu0 %v3794_v9 }
 0x534   :  { %v1243_v54 = vpop.f32.mrb[12].mxu0 }
 0x535   :  { %v1244_v55 = vadd.f32 %v2827_v53, %v1243_v54  ;;  %v3272_v56 = vpop.f32.mrb[13].mxu0 }
 0x536   :  { %v1246_v57 = vpop.f32.mrb[14].mxu0  ;;  %v3592_v56 = vld [vmem:[#allocation7 + $0x50] sm:$0xff]  }
 0x537   :  { %v1247_v58 = vadd.f32 %v2827_v53, %v1246_v57  ;;  %v3273_v59 = vpop.f32.mrb[15].mxu0  ;;  %v1250_v60 = vadd.f32 %v1244_v55, %v1020_v38  ;;  %3299 = vmatpush3.bf16.msra.mxu0 %v3592_v56  ;;  %v3593_v57 = vld [vmem:[#allocation7 + $0x58] sm:$0xff]   ;;  %v3608_v56 = vld [vmem:[%s4354_s5 + $0x90] sm:$0xff]  }
 0x538   :  { %3300 = vmatprep.subr.bf16.mxu0 %v3794_v9  ;;  %v3595_v59 = vld [vmem:[#allocation7 + $0x68] sm:$0xff]  }
 0x539   :  { %1254 = vadd.xlane.f32.xlu0 %v1250_v60  ;;  %v1251_v61 = vadd.f32 %v1247_v58, %v1021_v39  ;;  %v3594_v58 = vld [vmem:[#allocation7 + $0x60] sm:$0xff]  }
 0x53b   :  { %1256 = vadd.xlane.f32.xlu1 %v1251_v61  ;;  %3301 = vmatpush3.bf16.msra.mxu0 %v3593_v57  ;;  %v3609_v57 = vld [vmem:[%s4354_s5 + $0x98] sm:$0xff]  }
 0x53c   :  { %3302 = vmatprep.subr.bf16.mxu0 %v3794_v9 }
 0x53f   :  { %3303 = vmatpush3.bf16.msra.mxu0 %v3594_v58  ;;  %v3610_v58 = vld [vmem:[%s4354_s5 + $0xa0] sm:$0xff]  }
 0x540   :  { %3304 = vmatprep.subr.bf16.mxu0 %v3794_v9 }
 0x543   :  { %3305 = vmatpush3.bf16.msra.mxu0 %v3595_v59  ;;  %v3611_v59 = vld [vmem:[%s4354_s5 + $0xa8] sm:$0xff]  }
 0x544   :  { %3306 = vmatprep.subr.bf16.mxu0 %v3794_v9 }
 0x5c6   :  { %v1255_v0 = vpop.xlane.xlu0 %1254 }
 0x5c7   :  { %v1258_v2 = vmul.f32 0.03125, %v1255_v0  ;;  %v3600_v0 = vld [vmem:[#allocation8 + $0x50] sm:$0xff]  }
 0x5c8   :  { %v1257_v3 = vpop.xlane.xlu1 %1256 }
 0x5c9   :  { %v1260_v4 = vsub.f32 %v1250_v60, %v1258_v2  ;;  %v1259_v5 = vmul.f32 0.03125, %v1257_v3  ;;  %v3596_v60 = vld [vmem:[#allocation7 + $0x70] sm:$0xff]   ;;  %v3601_v2 = vld [vmem:[#allocation8 + $0x58] sm:$0xff]   ;;  %v3602_v3 = vld [vmem:[#allocation8 + $0x60] sm:$0xff]  }
 0x5ca   :  { %3307 = vmatpush3.bf16.msra.mxu0 %v3596_v60  ;;  %v3612_v60 = vld [vmem:[%s4354_s5 + $0xb0] sm:$0xff]  }
 0x5cb   :  { %v1261_v6 = vsub.f32 %v1251_v61, %v1259_v5  ;;  %v1262_v7 = vmul.f32 %v4032_v1, %v1260_v4  ;;  %v3597_v61 = vld [vmem:[#allocation7 + $0x78] sm:$0xff]   ;;  %3308 = vmatprep.subr.bf16.mxu0 %v3794_v9  ;;  %v3603_v4 = vld [vmem:[#allocation8 + $0x68] sm:$0xff]  }
 0x5cd   :  { %v1264_v8 = vmul.f32 %v1262_v7, %v1262_v7  ;;  %v1263_v10 = vmul.f32 %v4032_v1, %v1261_v6 }
 0x5ce   :  { %3309 = vmatpush3.bf16.msra.mxu0 %v3597_v61  ;;  %v3613_v61 = vld [vmem:[%s4354_s5 + $0xb8] sm:$0xff]  }
 0x5cf   :  { %1266 = vadd.xlane.f32.xlu0 %v1264_v8  ;;  %v1265_v11 = vmul.f32 %v1263_v10, %v1263_v10  ;;  %3334 = vmatprep.subr.bf16.mxu0 %v3794_v9 }
 0x5d1   :  { %1268 = vadd.xlane.f32.xlu1 %v1265_v11 }
 0x65c   :  { %v1267_v18 = vpop.xlane.xlu0 %1266 }
 0x65d   :  { %v1270_v19 = vmul.f32 0.03125, %v1267_v18  ;;  %v2867_v18 = vld [vmem:[%s4357_s8 + $0x1] ss:$0 sm:$0xff] }
 0x65e   :  { %v1269_v20 = vpop.xlane.xlu1 %1268 }
 0x65f   :  { %v1272_v21 = vadd.f32 1e-05, %v1270_v19  ;;  %v1271_v22 = vmul.f32 0.03125, %v1269_v20 }
 0x661   :  { %3666 = vrsqrt.f32 %v1272_v21  ;;  %v1273_v23 = vadd.f32 1e-05, %v1271_v22 }
 0x663   :  { %3668 = vrsqrt.f32 %v1273_v23  ;;  %v3604_v23 = vld [vmem:[#allocation8 + $0x70] sm:$0xff]  }
 0x66b   :  { %v3667_v24 = vpop.eup %3666 }
 0x66c   :  { %v1276_v26 = vmul.f32 %v3667_v24, %v1262_v7  ;;  %v3605_v24 = vld [vmem:[#allocation8 + $0x78] sm:$0xff]  }
 0x66d   :  { %v3669_v27 = vpop.eup %3668 }
 0x66e   :  { %v1277_v28 = vmul.f32 %v3669_v27, %v1263_v10  ;;  %v1284_v29 = vmul.f32 %v2836_v25, %v1276_v26 }
 0x670   :  { %v1285_v31 = vmul.f32 %v2836_v25, %v1277_v28  ;;  %v1292_v32 = vadd.f32 %v2837_v30, %v1284_v29  ;;  %v2869_v25 = vld [vmem:[%s4359_s10 + $0x1] ss:$0 sm:$0xff] }
 0x672   :  { %v1293_v33 = vadd.f32 %v2837_v30, %v1285_v31 }
 0x674   :  { %v1294_v34 = vpack.c.bf16 %v1293_v33, %v1292_v32 }
 0x676   :  { %3291 = vmatmul.mubr.bf16.vlgmr.msra.gmra.mrb[12].mxu1 %v1294_v34 }
 0x677   :  { %3330 = vmatprep.mubr.msk.bf16.mxu1 %vm3795_vm0, %v3794_v9  ;;  %3315 = vmatpush3.bf16.msra.mxu1 %v3598_v62 }
 0x678   :  { %3316 = vmatprep.subr.bf16.mxu1 %v3794_v9 }
 0x67b   :  { %3317 = vmatpush3.bf16.msra.mxu1 %v3599_v63 }
 0x67c   :  { %3318 = vmatprep.subr.bf16.mxu1 %v3794_v9 }
 0x67f   :  { %3319 = vmatpush3.bf16.msra.mxu1 %v3600_v0 }
 0x680   :  { %3320 = vmatprep.subr.bf16.mxu1 %v3794_v9 }
 0x683   :  { %3321 = vmatpush3.bf16.msra.mxu1 %v3601_v2 }
 0x684   :  { %3322 = vmatprep.subr.bf16.mxu1 %v3794_v9 }
 0x687   :  { %3323 = vmatpush3.bf16.msra.mxu1 %v3602_v3 }
 0x688   :  { %3324 = vmatprep.subr.bf16.mxu1 %v3794_v9 }
 0x68b   :  { %3325 = vmatpush3.bf16.msra.mxu1 %v3603_v4 }
 0x68c   :  { %3326 = vmatprep.subr.bf16.mxu1 %v3794_v9 }
 0x68f   :  { %3327 = vmatpush3.bf16.msra.mxu1 %v3604_v23 }
 0x690   :  { %3328 = vmatprep.subr.bf16.mxu1 %v3794_v9 }
 0x693   :  { %3329 = vmatpush3.bf16.msra.mxu1 %v3605_v24 }
 0x694   :  { %3354 = vmatprep.subr.bf16.mxu1 %v3794_v9 }
 0x749   :  { %v1402_v36 = vpop.f32.mrb[12].mxu1 }
 0x74a   :  { %v1403_v37 = vadd.f32 %v2855_v35, %v1402_v36  ;;  %v3292_v38 = vpop.f32.mrb[13].mxu1 }
 0x74b   :  { %v1405_v39 = vpop.f32.mrb[14].mxu1 }
 0x74c   :  { %v1406_v40 = vadd.f32 %v2855_v35, %v1405_v39  ;;  %v3293_v41 = vpop.f32.mrb[15].mxu1  ;;  %v1409_v42 = vadd.f32 %v1403_v37, %v1292_v32  ;;  %v2879_v35 = vld [vmem:[%s4361_s12 + $0x1] ss:$0 sm:$0xff] }
 0x74e   :  { %1415 = vadd.xlane.f32.xlu0 %v1409_v42  ;;  %v1410_v43 = vadd.f32 %v1406_v40, %v1293_v33 }
 0x750   :  { %1417 = vadd.xlane.f32.xlu1 %v1410_v43 }
 0x7db   :  { %v1416_v46 = vpop.xlane.xlu0 %1415 }
 0x7dc   :  { %v1419_v47 = vmul.f32 0.03125, %v1416_v46 }
 0x7dd   :  { %v1418_v48 = vpop.xlane.xlu1 %1417 }
 0x7de   :  { %v1421_v49 = vsub.f32 %v1409_v42, %v1419_v47  ;;  %v1420_v50 = vmul.f32 0.03125, %v1418_v48 }
 0x7e0   :  { %v1422_v51 = vsub.f32 %v1410_v43, %v1420_v50  ;;  %v1423_v52 = vmul.f32 %v4032_v1, %v1421_v49 }
 0x7e2   :  { %v1425_v53 = vmul.f32 %v1423_v52, %v1423_v52  ;;  %v1424_v54 = vmul.f32 %v4032_v1, %v1422_v51 }
 0x7e4   :  { %1427 = vadd.xlane.f32.xlu0 %v1425_v53  ;;  %v1426_v55 = vmul.f32 %v1424_v54, %v1424_v54 }
 0x7e6   :  { %1429 = vadd.xlane.f32.xlu1 %v1426_v55 }
 0x871   :  { %v1428_v5 = vpop.xlane.xlu0 %1427 }
 0x872   :  { %v1431_v6 = vmul.f32 0.03125, %v1428_v5 }
 0x873   :  { %v1430_v7 = vpop.xlane.xlu1 %1429 }
 0x874   :  { %v1433_v8 = vadd.f32 1e-05, %v1431_v6  ;;  %v1432_v10 = vmul.f32 0.03125, %v1430_v7  ;;  %v2890_v6 = vld [vmem:[%s4362_s13 + $0x1] ss:$0 sm:$0xff] }
 0x876   :  { %3670 = vrsqrt.f32 %v1433_v8  ;;  %v1434_v11 = vadd.f32 1e-05, %v1432_v10 }
 0x878   :  { %3672 = vrsqrt.f32 %v1434_v11 }
 0x880   :  { %v3671_v12 = vpop.eup %3670 }
 0x881   :  { %v1437_v14 = vmul.f32 %v3671_v12, %v1423_v52  ;;  %v2891_v12 = vld [vmem:[%s4363_s14 + $0x1] ss:$0 sm:$0xff] }
 0x882   :  { %v3673_v15 = vpop.eup %3672 }
 0x883   :  { %v1438_v16 = vmul.f32 %v3673_v15, %v1424_v54  ;;  %v1445_v17 = vmul.f32 %v2866_v13, %v1437_v14 }
 0x885   :  { %v1446_v19 = vmul.f32 %v2866_v13, %v1438_v16  ;;  %v1453_v20 = vadd.f32 %v2867_v18, %v1445_v17  ;;  %v2909_v17 = vld [vmem:[%s4355_s6 + $0x2] ss:$0 sm:$0xff] }
 0x887   :  { %v1454_v21 = vadd.f32 %v2867_v18, %v1446_v19 }
 0x889   :  { %v1455_v22 = vpack.c.bf16 %v1454_v21, %v1453_v20 }
 0x88b   :  { %3311 = vmatmul.mubr.bf16.vlgmr.msra.gmra.mrb[16].mxu0 %v1455_v22 }
 0x88c   :  { %3350 = vmatprep.mubr.msk.bf16.mxu0 %vm3795_vm0, %v3794_v9  ;;  %3335 = vmatpush3.bf16.msra.mxu0 %v3606_v44  ;;  %v3622_v44 = vld [vmem:[#allocation8 + $0x80] sm:$0xff]  }
 0x88d   :  { %3336 = vmatprep.subr.bf16.mxu0 %v3794_v9 }
 0x890   :  { %3337 = vmatpush3.bf16.msra.mxu0 %v3607_v45  ;;  %v3623_v45 = vld [vmem:[#allocation8 + $0x88] sm:$0xff]  }
 0x891   :  { %3338 = vmatprep.subr.bf16.mxu0 %v3794_v9 }
 0x894   :  { %3339 = vmatpush3.bf16.msra.mxu0 %v3608_v56 }
 0x895   :  { %3340 = vmatprep.subr.bf16.mxu0 %v3794_v9 }
 0x898   :  { %3341 = vmatpush3.bf16.msra.mxu0 %v3609_v57  ;;  %v2920_v57 = vld [vmem:[%s4356_s7 + $0x2] ss:$0 sm:$0xff] }
 0x899   :  { %3342 = vmatprep.subr.bf16.mxu0 %v3794_v9 }
 0x89c   :  { %3343 = vmatpush3.bf16.msra.mxu0 %v3610_v58 }
 0x89d   :  { %3344 = vmatprep.subr.bf16.mxu0 %v3794_v9 }
 0x8a0   :  { %3345 = vmatpush3.bf16.msra.mxu0 %v3611_v59 }
 0x8a1   :  { %3346 = vmatprep.subr.bf16.mxu0 %v3794_v9 }
 0x8a4   :  { %3347 = vmatpush3.bf16.msra.mxu0 %v3612_v60 }
 0x8a5   :  { %3348 = vmatprep.subr.bf16.mxu0 %v3794_v9 }
 0x8a8   :  { %3349 = vmatpush3.bf16.msra.mxu0 %v3613_v61 }
 0x8a9   :  { %3374 = vmatprep.subr.bf16.mxu0 %v3794_v9 }
 0x95e   :  { %v1563_v26 = vpop.f32.mrb[16].mxu0 }
 0x95f   :  { %v1564_v27 = vadd.f32 %v2869_v25, %v1563_v26  ;;  %v3312_v28 = vpop.f32.mrb[17].mxu0  ;;  %v3614_v26 = vld [vmem:[#allocation7 + $0x80] sm:$0xff]  }
 0x960   :  { %v1566_v29 = vpop.f32.mrb[18].mxu0 }
 0x961   :  { %v1567_v30 = vadd.f32 %v2869_v25, %v1566_v29  ;;  %v3313_v31 = vpop.f32.mrb[19].mxu0  ;;  %v1570_v32 = vmax.f32 %v1564_v27, 0.0  ;;  %v3615_v27 = vld [vmem:[#allocation7 + $0x88] sm:$0xff]  }
 0x963   :  { %v1571_v33 = vmax.f32 %v1567_v30, 0.0 }
 0x965   :  { %v1572_v34 = vpack.c.bf16 %v1571_v33, %v1570_v32 }
 0x967   :  { %3331 = vmatmul.mubr.bf16.vlgmr.msra.gmra.mrb[16].mxu1 %v1572_v34 }
 0x968   :  { %3370 = vmatprep.mubr.msk.bf16.mxu1 %vm3795_vm0, %v3794_v9  ;;  %3355 = vmatpush3.bf16.msra.mxu1 %v3614_v26  ;;  %v3630_v26 = vld [vmem:[%s4354_s5 + $0xc0] sm:$0xff]  }
 0x969   :  { %3356 = vmatprep.subr.bf16.mxu1 %v3794_v9 }
 0x96c   :  { %3357 = vmatpush3.bf16.msra.mxu1 %v3615_v27  ;;  %v3631_v27 = vld [vmem:[%s4354_s5 + $0xc8] sm:$0xff]  }
 0x96d   :  { %3358 = vmatprep.subr.bf16.mxu1 %v3794_v9 }
 0xa3a   :  { %v1680_v36 = vpop.f32.mrb[16].mxu1 }
 0xa3b   :  { %v1681_v37 = vadd.f32 %v2879_v35, %v1680_v36  ;;  %v3332_v38 = vpop.f32.mrb[17].mxu1 }
 0xa3c   :  { %v1683_v39 = vpop.f32.mrb[18].mxu1  ;;  %v3616_v38 = vld [vmem:[#allocation7 + $0x90] sm:$0xff]  }
 0xa3d   :  { %v1684_v40 = vadd.f32 %v2879_v35, %v1683_v39  ;;  %v3333_v41 = vpop.f32.mrb[19].mxu1  ;;  %v1687_v42 = vadd.f32 %v1681_v37, %v1453_v20  ;;  %3359 = vmatpush3.bf16.msra.mxu1 %v3616_v38  ;;  %v3617_v39 = vld [vmem:[#allocation7 + $0x98] sm:$0xff]   ;;  %v3632_v38 = vld [vmem:[%s4354_s5 + $0xd0] sm:$0xff]  }
 0xa3e   :  { %3360 = vmatprep.subr.bf16.mxu1 %v3794_v9  ;;  %v3619_v41 = vld [vmem:[#allocation7 + $0xa8] sm:$0xff]  }
 0xa3f   :  { %1693 = vadd.xlane.f32.xlu0 %v1687_v42  ;;  %v1688_v43 = vadd.f32 %v1684_v40, %v1454_v21  ;;  %v3618_v40 = vld [vmem:[#allocation7 + $0xa0] sm:$0xff]  }
 0xa41   :  { %1695 = vadd.xlane.f32.xlu1 %v1688_v43  ;;  %3361 = vmatpush3.bf16.msra.mxu1 %v3617_v39  ;;  %v3633_v39 = vld [vmem:[%s4354_s5 + $0xd8] sm:$0xff]  }
 0xa42   :  { %3362 = vmatprep.subr.bf16.mxu1 %v3794_v9 }
 0xa45   :  { %3363 = vmatpush3.bf16.msra.mxu1 %v3618_v40  ;;  %v3634_v40 = vld [vmem:[%s4354_s5 + $0xe0] sm:$0xff]  }
 0xa46   :  { %3364 = vmatprep.subr.bf16.mxu1 %v3794_v9 }
 0xa49   :  { %3365 = vmatpush3.bf16.msra.mxu1 %v3619_v41  ;;  %v3635_v41 = vld [vmem:[%s4354_s5 + $0xe8] sm:$0xff]  }
 0xa4a   :  { %3366 = vmatprep.subr.bf16.mxu1 %v3794_v9 }
 0xacc   :  { %v1694_v46 = vpop.xlane.xlu0 %1693 }
 0xacd   :  { %v1697_v47 = vmul.f32 0.03125, %v1694_v46  ;;  %v3624_v46 = vld [vmem:[#allocation8 + $0x90] sm:$0xff]  }
 0xace   :  { %v1696_v48 = vpop.xlane.xlu1 %1695 }
 0xacf   :  { %v1699_v49 = vsub.f32 %v1687_v42, %v1697_v47  ;;  %v1698_v50 = vmul.f32 0.03125, %v1696_v48  ;;  %v3620_v42 = vld [vmem:[#allocation7 + $0xb0] sm:$0xff]   ;;  %v3625_v47 = vld [vmem:[#allocation8 + $0x98] sm:$0xff]   ;;  %v3626_v48 = vld [vmem:[#allocation8 + $0xa0] sm:$0xff]  }
 0xad0   :  { %3367 = vmatpush3.bf16.msra.mxu1 %v3620_v42  ;;  %v3636_v42 = vld [vmem:[%s4354_s5 + $0xf0] sm:$0xff]  }
 0xad1   :  { %v1700_v51 = vsub.f32 %v1688_v43, %v1698_v50  ;;  %v1701_v52 = vmul.f32 %v4032_v1, %v1699_v49  ;;  %v3621_v43 = vld [vmem:[#allocation7 + $0xb8] sm:$0xff]   ;;  %3368 = vmatprep.subr.bf16.mxu1 %v3794_v9  ;;  %v3627_v49 = vld [vmem:[#allocation8 + $0xa8] sm:$0xff]  }
 0xad3   :  { %v1703_v53 = vmul.f32 %v1701_v52, %v1701_v52  ;;  %v1702_v54 = vmul.f32 %v4032_v1, %v1700_v51 }
 0xad4   :  { %3369 = vmatpush3.bf16.msra.mxu1 %v3621_v43  ;;  %v3637_v43 = vld [vmem:[%s4354_s5 + $0xf8] sm:$0xff]  }
 0xad5   :  { %1705 = vadd.xlane.f32.xlu0 %v1703_v53  ;;  %v1704_v55 = vmul.f32 %v1702_v54, %v1702_v54  ;;  %3394 = vmatprep.subr.bf16.mxu1 %v3794_v9 }
 0xad7   :  { %1707 = vadd.xlane.f32.xlu1 %v1704_v55 }
 0xb62   :  { %v1706_v62 = vpop.xlane.xlu0 %1705 }
 0xb63   :  { %v1709_v63 = vmul.f32 0.03125, %v1706_v62  ;;  %v2921_v62 = vld [vmem:[%s4357_s8 + $0x2] ss:$0 sm:$0xff] }
 0xb64   :  { %v1708_v0 = vpop.xlane.xlu1 %1707 }
 0xb65   :  { %v1711_v2 = vadd.f32 1e-05, %v1709_v63  ;;  %v1710_v3 = vmul.f32 0.03125, %v1708_v0 }
 0xb67   :  { %3674 = vrsqrt.f32 %v1711_v2  ;;  %v1712_v4 = vadd.f32 1e-05, %v1710_v3 }
 0xb69   :  { %3676 = vrsqrt.f32 %v1712_v4  ;;  %v3628_v4 = vld [vmem:[#allocation8 + $0xb0] sm:$0xff]  }
 0xb71   :  { %v3675_v5 = vpop.eup %3674 }
 0xb72   :  { %v1715_v7 = vmul.f32 %v3675_v5, %v1701_v52  ;;  %v3629_v5 = vld [vmem:[#allocation8 + $0xb8] sm:$0xff]  }
 0xb73   :  { %v3677_v8 = vpop.eup %3676 }
 0xb74   :  { %v1716_v10 = vmul.f32 %v3677_v8, %v1702_v54  ;;  %v1723_v11 = vmul.f32 %v2890_v6, %v1715_v7 }
 0xb76   :  { %v1724_v13 = vmul.f32 %v2890_v6, %v1716_v10  ;;  %v1731_v14 = vadd.f32 %v2891_v12, %v1723_v11  ;;  %v2923_v6 = vld [vmem:[%s4359_s10 + $0x2] ss:$0 sm:$0xff] }
 0xb78   :  { %v1732_v15 = vadd.f32 %v2891_v12, %v1724_v13 }
 0xb7a   :  { %v1733_v16 = vpack.c.bf16 %v1732_v15, %v1731_v14 }
 0xb7c   :  { %3351 = vmatmul.mubr.bf16.vlgmr.msra.gmra.mrb[20].mxu0 %v1733_v16 }
 0xb7d   :  { %3390 = vmatprep.mubr.msk.bf16.mxu0 %vm3795_vm0, %v3794_v9  ;;  %3375 = vmatpush3.bf16.msra.mxu0 %v3622_v44 }
 0xb7e   :  { %3376 = vmatprep.subr.bf16.mxu0 %v3794_v9 }
 0xb81   :  { %3377 = vmatpush3.bf16.msra.mxu0 %v3623_v45 }
 0xb82   :  { %3378 = vmatprep.subr.bf16.mxu0 %v3794_v9 }
 0xb85   :  { %3379 = vmatpush3.bf16.msra.mxu0 %v3624_v46 }
 0xb86   :  { %3380 = vmatprep.subr.bf16.mxu0 %v3794_v9 }
 0xb89   :  { %3381 = vmatpush3.bf16.msra.mxu0 %v3625_v47 }
 0xb8a   :  { %3382 = vmatprep.subr.bf16.mxu0 %v3794_v9 }
 0xb8d   :  { %3383 = vmatpush3.bf16.msra.mxu0 %v3626_v48 }
 0xb8e   :  { %3384 = vmatprep.subr.bf16.mxu0 %v3794_v9 }
 0xb91   :  { %3385 = vmatpush3.bf16.msra.mxu0 %v3627_v49 }
 0xb92   :  { %3386 = vmatprep.subr.bf16.mxu0 %v3794_v9 }
 0xb95   :  { %3387 = vmatpush3.bf16.msra.mxu0 %v3628_v4 }
 0xb96   :  { %3388 = vmatprep.subr.bf16.mxu0 %v3794_v9 }
 0xb99   :  { %3389 = vmatpush3.bf16.msra.mxu0 %v3629_v5 }
 0xb9a   :  { %3414 = vmatprep.subr.bf16.mxu0 %v3794_v9 }
 0xc4f   :  { %v1841_v18 = vpop.f32.mrb[20].mxu0 }
 0xc50   :  { %v1842_v19 = vadd.f32 %v2909_v17, %v1841_v18  ;;  %v3352_v20 = vpop.f32.mrb[21].mxu0 }
 0xc51   :  { %v1844_v21 = vpop.f32.mrb[22].mxu0 }
 0xc52   :  { %v1845_v22 = vadd.f32 %v2909_v17, %v1844_v21  ;;  %v3353_v23 = vpop.f32.mrb[23].mxu0  ;;  %v1848_v24 = vadd.f32 %v1842_v19, %v1731_v14  ;;  %v2933_v17 = vld [vmem:[%s4361_s12 + $0x2] ss:$0 sm:$0xff] }
 0xc54   :  { %1854 = vadd.xlane.f32.xlu0 %v1848_v24  ;;  %v1849_v25 = vadd.f32 %v1845_v22, %v1732_v15 }
 0xc56   :  { %1856 = vadd.xlane.f32.xlu1 %v1849_v25 }
 0xce1   :  { %v1855_v28 = vpop.xlane.xlu0 %1854 }
 0xce2   :  { %v1858_v29 = vmul.f32 0.03125, %v1855_v28 }
 0xce3   :  { %v1857_v30 = vpop.xlane.xlu1 %1856 }
 0xce4   :  { %v1860_v31 = vsub.f32 %v1848_v24, %v1858_v29  ;;  %v1859_v32 = vmul.f32 0.03125, %v1857_v30 }
 0xce6   :  { %v1861_v33 = vsub.f32 %v1849_v25, %v1859_v32  ;;  %v1862_v34 = vmul.f32 %v4032_v1, %v1860_v31 }
 0xce8   :  { %v1864_v35 = vmul.f32 %v1862_v34, %v1862_v34  ;;  %v1863_v36 = vmul.f32 %v4032_v1, %v1861_v33 }
 0xcea   :  { %1866 = vadd.xlane.f32.xlu0 %v1864_v35  ;;  %v1865_v37 = vmul.f32 %v1863_v36, %v1863_v36 }
 0xcec   :  { %1868 = vadd.xlane.f32.xlu1 %v1865_v37 }
 0xd77   :  { %v1867_v50 = vpop.xlane.xlu0 %1866 }
 0xd78   :  { %v1870_v51 = vmul.f32 0.03125, %v1867_v50 }
 0xd79   :  { %v1869_v52 = vpop.xlane.xlu1 %1868 }
 0xd7a   :  { %v1872_v53 = vadd.f32 1e-05, %v1870_v51  ;;  %v1871_v54 = vmul.f32 0.03125, %v1869_v52  ;;  %v2944_v51 = vld [vmem:[%s4362_s13 + $0x2] ss:$0 sm:$0xff] }
 0xd7c   :  { %3678 = vrsqrt.f32 %v1872_v53  ;;  %v1873_v55 = vadd.f32 1e-05, %v1871_v54 }
 0xd7e   :  { %3680 = vrsqrt.f32 %v1873_v55 }
 0xd86   :  { %v3679_v56 = vpop.eup %3678 }
 0xd87   :  { %v1876_v58 = vmul.f32 %v3679_v56, %v1862_v34  ;;  %v2945_v56 = vld [vmem:[%s4363_s14 + $0x2] ss:$0 sm:$0xff] }
 0xd88   :  { %v3681_v59 = vpop.eup %3680 }
 0xd89   :  { %v1877_v60 = vmul.f32 %v3681_v59, %v1863_v36  ;;  %v1884_v61 = vmul.f32 %v2920_v57, %v1876_v58 }
 0xd8b   :  { %v1885_v63 = vmul.f32 %v2920_v57, %v1877_v60  ;;  %v1892_v0 = vadd.f32 %v2921_v62, %v1884_v61  ;;  %v2963_v61 = vld [vmem:[%s4355_s6 + $0x3] ss:$0 sm:$0xff] }
 0xd8d   :  { %v1893_v2 = vadd.f32 %v2921_v62, %v1885_v63 }
 0xd8f   :  { %v1894_v3 = vpack.c.bf16 %v1893_v2, %v1892_v0 }
 0xd91   :  { %3371 = vmatmul.mubr.bf16.vlgmr.msra.gmra.mrb[20].mxu1 %v1894_v3 }
 0xd92   :  { %3410 = vmatprep.mubr.msk.bf16.mxu1 %vm3795_vm0, %v3794_v9  ;;  %3395 = vmatpush3.bf16.msra.mxu1 %v3630_v26  ;;  %v3646_v26 = vld [vmem:[#allocation8 + $0xc0] sm:$0xff]  }
 0xd93   :  { %3396 = vmatprep.subr.bf16.mxu1 %v3794_v9 }
 0xd96   :  { %3397 = vmatpush3.bf16.msra.mxu1 %v3631_v27  ;;  %v3647_v27 = vld [vmem:[#allocation8 + $0xc8] sm:$0xff]  }
 0xd97   :  { %3398 = vmatprep.subr.bf16.mxu1 %v3794_v9 }
 0xd9a   :  { %3399 = vmatpush3.bf16.msra.mxu1 %v3632_v38 }
 0xd9b   :  { %3400 = vmatprep.subr.bf16.mxu1 %v3794_v9 }
 0xd9e   :  { %3401 = vmatpush3.bf16.msra.mxu1 %v3633_v39  ;;  %v2974_v39 = vld [vmem:[%s4356_s7 + $0x3] ss:$0 sm:$0xff] }
 0xd9f   :  { %3402 = vmatprep.subr.bf16.mxu1 %v3794_v9 }
 0xda2   :  { %3403 = vmatpush3.bf16.msra.mxu1 %v3634_v40 }
 0xda3   :  { %3404 = vmatprep.subr.bf16.mxu1 %v3794_v9 }
 0xda6   :  { %3405 = vmatpush3.bf16.msra.mxu1 %v3635_v41 }
 0xda7   :  { %3406 = vmatprep.subr.bf16.mxu1 %v3794_v9 }
 0xdaa   :  { %3407 = vmatpush3.bf16.msra.mxu1 %v3636_v42 }
 0xdab   :  { %3408 = vmatprep.subr.bf16.mxu1 %v3794_v9 }
 0xdae   :  { %3409 = vmatpush3.bf16.msra.mxu1 %v3637_v43 }
 0xdaf   :  { %3434 = vmatprep.subr.bf16.mxu1 %v3794_v9 }
 0xe64   :  { %v2002_v7 = vpop.f32.mrb[20].mxu1 }
 0xe65   :  { %v2003_v8 = vadd.f32 %v2923_v6, %v2002_v7  ;;  %v3372_v10 = vpop.f32.mrb[21].mxu1  ;;  %v3638_v7 = vld [vmem:[#allocation7 + $0xc0] sm:$0xff]  }
 0xe66   :  { %v2005_v11 = vpop.f32.mrb[22].mxu1 }
 0xe67   :  { %v2006_v12 = vadd.f32 %v2923_v6, %v2005_v11  ;;  %v3373_v13 = vpop.f32.mrb[23].mxu1  ;;  %v2009_v14 = vmax.f32 %v2003_v8, 0.0  ;;  %v3639_v8 = vld [vmem:[#allocation7 + $0xc8] sm:$0xff]  }
 0xe69   :  { %v2010_v15 = vmax.f32 %v2006_v12, 0.0 }
 0xe6b   :  { %v2011_v16 = vpack.c.bf16 %v2010_v15, %v2009_v14 }
 0xe6d   :  { %3391 = vmatmul.mubr.bf16.vlgmr.msra.gmra.mrb[24].mxu0 %v2011_v16 }
 0xe6e   :  { %3430 = vmatprep.mubr.msk.bf16.mxu0 %vm3795_vm0, %v3794_v9  ;;  %3415 = vmatpush3.bf16.msra.mxu0 %v3638_v7  ;;  %v3654_v7 = vld [vmem:[%s4364_s15] sm:$0xff]  }
 0xe6f   :  { %3416 = vmatprep.subr.bf16.mxu0 %v3794_v9 }
 0xe72   :  { %3417 = vmatpush3.bf16.msra.mxu0 %v3639_v8  ;;  %v3655_v8 = vld [vmem:[%s4364_s15 + $0x8] sm:$0xff]  }
 0xe73   :  { %3418 = vmatprep.subr.bf16.mxu0 %v3794_v9 }
 0xf40   :  { %v2119_v18 = vpop.f32.mrb[24].mxu0 }
 0xf41   :  { %v2120_v19 = vadd.f32 %v2933_v17, %v2119_v18  ;;  %v3392_v20 = vpop.f32.mrb[25].mxu0 }
 0xf42   :  { %v2122_v21 = vpop.f32.mrb[26].mxu0  ;;  %v3640_v20 = vld [vmem:[#allocation7 + $0xd0] sm:$0xff]  }
 0xf43   :  { %v2123_v22 = vadd.f32 %v2933_v17, %v2122_v21  ;;  %v3393_v23 = vpop.f32.mrb[27].mxu0  ;;  %v2126_v24 = vadd.f32 %v2120_v19, %v1892_v0  ;;  %3419 = vmatpush3.bf16.msra.mxu0 %v3640_v20  ;;  %v3641_v21 = vld [vmem:[#allocation7 + $0xd8] sm:$0xff]   ;;  %v3656_v20 = vld [vmem:[%s4364_s15 + $0x10] sm:$0xff]  }
 0xf44   :  { %3420 = vmatprep.subr.bf16.mxu0 %v3794_v9  ;;  %v3643_v23 = vld [vmem:[#allocation7 + $0xe8] sm:$0xff]  }
 0xf45   :  { %2132 = vadd.xlane.f32.xlu0 %v2126_v24  ;;  %v2127_v25 = vadd.f32 %v2123_v22, %v1893_v2  ;;  %v3642_v22 = vld [vmem:[#allocation7 + $0xe0] sm:$0xff]  }
 0xf47   :  { %2134 = vadd.xlane.f32.xlu1 %v2127_v25  ;;  %3421 = vmatpush3.bf16.msra.mxu0 %v3641_v21  ;;  %v3657_v21 = vld [vmem:[%s4364_s15 + $0x18] sm:$0xff]  }
 0xf48   :  { %3422 = vmatprep.subr.bf16.mxu0 %v3794_v9 }
 0xf4b   :  { %3423 = vmatpush3.bf16.msra.mxu0 %v3642_v22  ;;  %v3659_v22 = vld [vmem:[%s4364_s15 + $0x28] sm:$0xff]  }
 0xf4c   :  { %3424 = vmatprep.subr.bf16.mxu0 %v3794_v9 }
 0xf4f   :  { %3425 = vmatpush3.bf16.msra.mxu0 %v3643_v23  ;;  %v3660_v23 = vld [vmem:[%s4364_s15 + $0x30] sm:$0xff]  }
 0xf50   :  { %3426 = vmatprep.subr.bf16.mxu0 %v3794_v9 }
 0xfd2   :  { %v2133_v28 = vpop.xlane.xlu0 %2132 }
 0xfd3   :  { %v2136_v29 = vmul.f32 0.03125, %v2133_v28  ;;  %v3648_v28 = vld [vmem:[#allocation8 + $0xd0] sm:$0xff]  }
 0xfd4   :  { %v2135_v30 = vpop.xlane.xlu1 %2134 }
 0xfd5   :  { %v2138_v31 = vsub.f32 %v2126_v24, %v2136_v29  ;;  %v2137_v32 = vmul.f32 0.03125, %v2135_v30  ;;  %v3644_v24 = vld [vmem:[#allocation7 + $0xf0] sm:$0xff]   ;;  %v3649_v29 = vld [vmem:[#allocation8 + $0xd8] sm:$0xff]   ;;  %v3650_v30 = vld [vmem:[#allocation8 + $0xe0] sm:$0xff]  }
 0xfd6   :  { %3427 = vmatpush3.bf16.msra.mxu0 %v3644_v24  ;;  %v3661_v24 = vld [vmem:[%s4364_s15 + $0x38] sm:$0xff]  }
 0xfd7   :  { %v2139_v33 = vsub.f32 %v2127_v25, %v2137_v32  ;;  %v2140_v34 = vmul.f32 %v4032_v1, %v2138_v31  ;;  %v3645_v25 = vld [vmem:[#allocation7 + $0xf8] sm:$0xff]   ;;  %3428 = vmatprep.subr.bf16.mxu0 %v3794_v9  ;;  %v3651_v31 = vld [vmem:[#allocation8 + $0xe8] sm:$0xff]  }
 0xfd9   :  { %v2142_v35 = vmul.f32 %v2140_v34, %v2140_v34  ;;  %v2141_v36 = vmul.f32 %v4032_v1, %v2139_v33 }
 0xfda   :  { %3429 = vmatpush3.bf16.msra.mxu0 %v3645_v25 }
 0xfdb   :  { %2144 = vadd.xlane.f32.xlu0 %v2142_v35  ;;  %v2143_v37 = vmul.f32 %v2141_v36, %v2141_v36  ;;  %3454 = vmatprep.subr.bf16.mxu0 %v3794_v9 }
 0xfdd   :  { %2146 = vadd.xlane.f32.xlu1 %v2143_v37 }
0x1068   :  { %v2145_v44 = vpop.xlane.xlu0 %2144 }
0x1069   :  { %v2148_v45 = vmul.f32 0.03125, %v2145_v44  ;;  %v2975_v44 = vld [vmem:[%s4357_s8 + $0x3] ss:$0 sm:$0xff] }
0x106a   :  { %v2147_v46 = vpop.xlane.xlu1 %2146 }
0x106b   :  { %v2150_v47 = vadd.f32 1e-05, %v2148_v45  ;;  %v2149_v48 = vmul.f32 0.03125, %v2147_v46 }
0x106d   :  { %3682 = vrsqrt.f32 %v2150_v47  ;;  %v2151_v49 = vadd.f32 1e-05, %v2149_v48 }
0x106f   :  { %3684 = vrsqrt.f32 %v2151_v49  ;;  %v3652_v49 = vld [vmem:[#allocation8 + $0xf0] sm:$0xff]  }
0x1077   :  { %v3683_v50 = vpop.eup %3682 }
0x1078   :  { %v2154_v52 = vmul.f32 %v3683_v50, %v2140_v34  ;;  %v3653_v50 = vld [vmem:[#allocation8 + $0xf8] sm:$0xff]  }
0x1079   :  { %v3685_v53 = vpop.eup %3684 }
0x107a   :  { %v2155_v54 = vmul.f32 %v3685_v53, %v2141_v36  ;;  %v2162_v55 = vmul.f32 %v2944_v51, %v2154_v52 }
0x107c   :  { %v2163_v57 = vmul.f32 %v2944_v51, %v2155_v54  ;;  %v2170_v58 = vadd.f32 %v2945_v56, %v2162_v55  ;;  %v2977_v51 = vld [vmem:[%s4359_s10 + $0x3] ss:$0 sm:$0xff] }
0x107e   :  { %v2171_v59 = vadd.f32 %v2945_v56, %v2163_v57 }
0x1080   :  { %v2172_v60 = vpack.c.bf16 %v2171_v59, %v2170_v58 }
0x1082   :  { %3411 = vmatmul.mubr.bf16.vlgmr.msra.gmra.mrb[24].mxu1 %v2172_v60 }
0x1083   :  { %3450 = vmatprep.mubr.msk.bf16.mxu1 %vm3795_vm0, %v3794_v9  ;;  %3435 = vmatpush3.bf16.msra.mxu1 %v3646_v26 }
0x1084   :  { %3436 = vmatprep.subr.bf16.mxu1 %v3794_v9 }
0x1087   :  { %3437 = vmatpush3.bf16.msra.mxu1 %v3647_v27 }
0x1088   :  { %3438 = vmatprep.subr.bf16.mxu1 %v3794_v9 }
0x108b   :  { %3439 = vmatpush3.bf16.msra.mxu1 %v3648_v28 }
0x108c   :  { %3440 = vmatprep.subr.bf16.mxu1 %v3794_v9 }
0x108f   :  { %3441 = vmatpush3.bf16.msra.mxu1 %v3649_v29 }
0x1090   :  { %3442 = vmatprep.subr.bf16.mxu1 %v3794_v9 }
0x1093   :  { %3443 = vmatpush3.bf16.msra.mxu1 %v3650_v30 }
0x1094   :  { %3444 = vmatprep.subr.bf16.mxu1 %v3794_v9 }
0x1097   :  { %3445 = vmatpush3.bf16.msra.mxu1 %v3651_v31 }
0x1098   :  { %3446 = vmatprep.subr.bf16.mxu1 %v3794_v9 }
0x109b   :  { %3447 = vmatpush3.bf16.msra.mxu1 %v3652_v49 }
0x109c   :  { %3448 = vmatprep.subr.bf16.mxu1 %v3794_v9 }
0x109f   :  { %3449 = vmatpush3.bf16.msra.mxu1 %v3653_v50 }
0x1155   :  { %v2280_v62 = vpop.f32.mrb[24].mxu1 }
0x1156   :  { %v2281_v63 = vadd.f32 %v2963_v61, %v2280_v62  ;;  %v3412_v0 = vpop.f32.mrb[25].mxu1 }
0x1157   :  { %v2283_v2 = vpop.f32.mrb[26].mxu1 }
0x1158   :  { %v2284_v3 = vadd.f32 %v2963_v61, %v2283_v2  ;;  %v3413_v4 = vpop.f32.mrb[27].mxu1  ;;  %v2287_v5 = vadd.f32 %v2281_v63, %v2170_v58  ;;  %v2987_v61 = vld [vmem:[%s4361_s12 + $0x3] ss:$0 sm:$0xff] }
0x115a   :  { %2293 = vadd.xlane.f32.xlu0 %v2287_v5  ;;  %v2288_v6 = vadd.f32 %v2284_v3, %v2171_v59 }
0x115c   :  { %2295 = vadd.xlane.f32.xlu1 %v2288_v6 }
0x11e7   :  { %v2294_v10 = vpop.xlane.xlu0 %2293 }
0x11e8   :  { %v2297_v11 = vmul.f32 0.03125, %v2294_v10 }
0x11e9   :  { %v2296_v12 = vpop.xlane.xlu1 %2295 }
0x11ea   :  { %v2299_v13 = vsub.f32 %v2287_v5, %v2297_v11  ;;  %v2298_v14 = vmul.f32 0.03125, %v2296_v12 }
0x11ec   :  { %v2300_v15 = vsub.f32 %v2288_v6, %v2298_v14  ;;  %v2301_v16 = vmul.f32 %v4032_v1, %v2299_v13 }
0x11ee   :  { %v2303_v17 = vmul.f32 %v2301_v16, %v2301_v16  ;;  %v2302_v18 = vmul.f32 %v4032_v1, %v2300_v15 }
0x11f0   :  { %2305 = vadd.xlane.f32.xlu0 %v2303_v17  ;;  %v2304_v19 = vmul.f32 %v2302_v18, %v2302_v18 }
0x11f2   :  { %2307 = vadd.xlane.f32.xlu1 %v2304_v19 }
0x127d   :  { %v2306_v32 = vpop.xlane.xlu0 %2305 }
0x127e   :  { %v2309_v33 = vmul.f32 0.03125, %v2306_v32  ;;  %v2998_v32 = vld [vmem:[%s4362_s13 + $0x3] ss:$0 sm:$0xff] }
0x127f   :  { %v2308_v34 = vpop.xlane.xlu1 %2307 }
0x1280   :  { %v2311_v35 = vadd.f32 1e-05, %v2309_v33  ;;  %v2310_v36 = vmul.f32 0.03125, %v2308_v34 }
0x1282   :  { %3686 = vrsqrt.f32 %v2311_v35  ;;  %v2312_v37 = vadd.f32 1e-05, %v2310_v36 }
0x1284   :  { %3688 = vrsqrt.f32 %v2312_v37 }
0x128c   :  { %v3687_v38 = vpop.eup %3686 }
0x128d   :  { %v2315_v40 = vmul.f32 %v3687_v38, %v2301_v16 }
0x128e   :  { %v3689_v41 = vpop.eup %3688 }
0x128f   :  { %v2316_v42 = vmul.f32 %v3689_v41, %v2302_v18  ;;  %v2323_v43 = vmul.f32 %v2974_v39, %v2315_v40  ;;  %v3000_v41 = vld [vmem:[%s4365_s16] ss:$0 sm:$0xff] }
0x1291   :  { %v2324_v45 = vmul.f32 %v2974_v39, %v2316_v42  ;;  %v2331_v46 = vadd.f32 %v2975_v44, %v2323_v43 }
0x1293   :  { %v2332_v47 = vadd.f32 %v2975_v44, %v2324_v45 }
0x1295   :  { %v2333_v48 = vpack.c.bf16 %v2332_v47, %v2331_v46 }
0x1297   :  { %3431 = vmatmul.mubr.bf16.vlgmr.msra.gmra.mrb[28].mxu0 %v2333_v48 }
0x1298   :  { %3470 = vmatprep.mubr.msk.bf16.mxu0 %vm3795_vm0, %v3794_v9  ;;  %3455 = vmatpush3.bf16.msra.mxu0 %v3654_v7 }
0x1299   :  { %3456 = vmatprep.subr.bf16.mxu0 %v3794_v9 }
0x129c   :  { %3457 = vmatpush3.bf16.msra.mxu0 %v3655_v8 }
0x129d   :  { %3458 = vmatprep.subr.bf16.mxu0 %v3794_v9 }
0x12a0   :  { %3459 = vmatpush3.bf16.msra.mxu0 %v3656_v20 }
0x12a1   :  { %3460 = vmatprep.subr.bf16.mxu0 %v3794_v9 }
0x12a4   :  { %3461 = vmatpush3.bf16.msra.mxu0 %v3657_v21 }
0x12a5   :  { %3462 = vmatprep.subr.bf16.mxu0 %v3794_v9 }
0x136a   :  { %v2441_v52 = vpop.f32.mrb[28].mxu0 }
0x136b   :  { %v2442_v53 = vadd.f32 %v2977_v51, %v2441_v52  ;;  %v3432_v54 = vpop.f32.mrb[29].mxu0 }
0x136c   :  { %v2444_v55 = vpop.f32.mrb[30].mxu0 }
0x136d   :  { %v2445_v56 = vadd.f32 %v2977_v51, %v2444_v55  ;;  %v3433_v57 = vpop.f32.mrb[31].mxu0  ;;  %v2448_v58 = vmax.f32 %v2442_v53, 0.0 }
0x136f   :  { %v2449_v59 = vmax.f32 %v2445_v56, 0.0 }
0x1371   :  { %v2450_v60 = vpack.c.bf16 %v2449_v59, %v2448_v58 }
0x1373   :  { %3451 = vmatmul.mubr.bf16.vlgmr.msra.gmra.mrb[28].mxu1 %v2450_v60 }
0x1446   :  { %v2558_v62 = vpop.f32.mrb[28].mxu1 }
0x1447   :  { %v2559_v63 = vadd.f32 %v2987_v61, %v2558_v62  ;;  %v3452_v0 = vpop.f32.mrb[29].mxu1 }
0x1448   :  { %v2561_v2 = vpop.f32.mrb[30].mxu1 }
0x1449   :  { %v2562_v3 = vadd.f32 %v2987_v61, %v2561_v2  ;;  %v3453_v4 = vpop.f32.mrb[31].mxu1  ;;  %v2565_v5 = vadd.f32 %v2559_v63, %v2331_v46 }
0x144b   :  { %2571 = vadd.xlane.f32.xlu0 %v2565_v5  ;;  %v2566_v6 = vadd.f32 %v2562_v3, %v2332_v47 }
0x144d   :  { %2573 = vadd.xlane.f32.xlu1 %v2566_v6 }
0x14d8   :  { %v2572_v10 = vpop.xlane.xlu0 %2571 }
0x14d9   :  { %v2575_v11 = vmul.f32 0.03125, %v2572_v10 }
0x14da   :  { %v2574_v12 = vpop.xlane.xlu1 %2573 }
0x14db   :  { %v2577_v13 = vsub.f32 %v2565_v5, %v2575_v11  ;;  %v2576_v14 = vmul.f32 0.03125, %v2574_v12 }
0x14dd   :  { %v2578_v15 = vsub.f32 %v2566_v6, %v2576_v14  ;;  %v2579_v16 = vmul.f32 %v4032_v1, %v2577_v13 }
0x14df   :  { %v2581_v17 = vmul.f32 %v2579_v16, %v2579_v16  ;;  %v2580_v18 = vmul.f32 %v4032_v1, %v2578_v15  ;;  %v3658_v1 = vld [vmem:[%s4364_s15 + $0x20] sm:$0xff]  }
0x14e0   :  { %3463 = vmatpush3.bf16.msra.mxu0 %v3658_v1 }
0x14e1   :  { %2583 = vadd.xlane.f32.xlu0 %v2581_v17  ;;  %v2582_v19 = vmul.f32 %v2580_v18, %v2580_v18  ;;  %3464 = vmatprep.subr.bf16.mxu0 %v3794_v9 }
0x14e3   :  { %2585 = vadd.xlane.f32.xlu1 %v2582_v19 }
0x14e4   :  { %3465 = vmatpush3.bf16.msra.mxu0 %v3659_v22 }
0x14e5   :  { %3466 = vmatprep.subr.bf16.mxu0 %v3794_v9 }
0x14e8   :  { %3467 = vmatpush3.bf16.msra.mxu0 %v3660_v23 }
0x14e9   :  { %3468 = vmatprep.subr.bf16.mxu0 %v3794_v9  ;;  %v2999_v9 = vld [vmem:[%s4363_s14 + $0x3] ss:$0 sm:$0xff] }
0x14ec   :  { %3469 = vmatpush3.bf16.msra.mxu0 %v3661_v24 }
0x156e   :  { %v2584_v25 = vpop.xlane.xlu0 %2583 }
0x156f   :  { %v2587_v26 = vmul.f32 0.03125, %v2584_v25 }
0x1570   :  { %v2586_v27 = vpop.xlane.xlu1 %2585 }
0x1571   :  { %v2589_v28 = vadd.f32 1e-05, %v2587_v26  ;;  %v2588_v29 = vmul.f32 0.03125, %v2586_v27 }
0x1573   :  { %3690 = vrsqrt.f32 %v2589_v28  ;;  %v2590_v30 = vadd.f32 1e-05, %v2588_v29 }
0x1575   :  { %3692 = vrsqrt.f32 %v2590_v30 }
0x157d   :  { %v3691_v31 = vpop.eup %3690 }
0x157e   :  { %v2593_v33 = vmul.f32 %v3691_v31, %v2579_v16 }
0x157f   :  { %v3693_v34 = vpop.eup %3692 }
0x1580   :  { %v2594_v35 = vmul.f32 %v3693_v34, %v2580_v18  ;;  %v2601_v36 = vmul.f32 %v2998_v32, %v2593_v33 }
0x1582   :  { %v2602_v37 = vmul.f32 %v2998_v32, %v2594_v35  ;;  %v2609_v38 = vadd.f32 %v2999_v9, %v2601_v36 }
0x1584   :  { %v2610_v39 = vadd.f32 %v2999_v9, %v2602_v37 }
0x1586   :  { %v2611_v40 = vpack.c.bf16 %v2610_v39, %v2609_v38 }
0x1588   :  { %3471 = vmatmul.mubr.bf16.vlgmr.msra.gmra.mrb[32].mxu0 %v2611_v40 }
0x165b   :  { %v2717_v42 = vpop.f32.mrb[32].mxu0 }
0x165c   :  { %v2718_v43 = vadd.f32 %v3000_v41, %v2717_v42  ;;  %v3472_v44 = vpop.f32.mrb[33].mxu0 }
0x165d   :  { %v2720_v45 = vpop.f32.mrb[34].mxu0 }
0x165e   :  { %2724 = vst [vmem:[%s4366_s17] sm:$0xff] %v2718_v43  ;;  %v2721_v46 = vadd.f32 %v3000_v41, %v2720_v45  ;;  %v3473_v47 = vpop.f32.mrb[35].mxu0 }
0x1660   :  { %2725 = vst [vmem:[%s4366_s17 + $0x8] sm:$0xff] %v2721_v46 }
0x1661   :  { %2730 = vsyncpa [#allocation4], 1 }
0x1662   :  { %2731 = vsyncpa [#allocation6], 1 }
0x1663   :  { %2732 = vsyncpa [#allocation9], 1 }

</bundles_post_ra>
